<compile_context>
chip_gen: v6e
topology: v6e:2x2x1
jax: 0.10.0
libtpu: 0.0.40
codegen_flags: <defaults>
</compile_context>

<pallas_src>
import jax
import jax.numpy as jnp
from jax import lax
from jax.experimental import pallas as pl
from jax.experimental.pallas import tpu as pltpu


def _residual_blk_kernel(xpad_ref, w1_ref, w2_ref,
                         scale1_ref, shift1_ref, alpha_ref,
                         scale2_ref, shift2_ref,
                         out_ref, midpad_ref):
    # xpad_ref : (1, H+2, W+2, C) zero-padded NHWC input, one batch element
    # w1/w2    : (9, C, C)        conv taps, tap = ky*3 + kx, layout (in, out)
    # scale/shift/alpha : (1, C)  per-channel affine / PReLU slope
    # out_ref  : (1, H, W, C)
    # midpad_ref : VMEM scratch (H+2, W+2, C) f32
    Hp, Wp, C = xpad_ref.shape[1], xpad_ref.shape[2], xpad_ref.shape[3]
    H, W = Hp - 2, Wp - 2

    xp = xpad_ref[0].astype(jnp.float32)              # (H+2, W+2, C)

    # ---- conv1 (3x3, pad=1) as 9 shifted channel matmuls on the MXU ----
    acc = jnp.zeros((H * W, C), jnp.float32)
    for tap in range(9):
        dy, dx = tap // 3, tap % 3
        patch = xp[dy:dy + H, dx:dx + W, :].reshape(H * W, C)
        acc = acc + jnp.dot(patch, w1_ref[tap],
                            preferred_element_type=jnp.float32)

    # fused conv-bias + BatchNorm (inference) affine, then PReLU
    acc = acc * scale1_ref[...] + shift1_ref[...]
    acc = jnp.where(acc > 0, acc, acc * alpha_ref[...])

    # ---- write intermediate into zero-padded scratch (halo for conv2) ----
    midpad_ref[...] = jnp.zeros_like(midpad_ref)
    midpad_ref[1:H + 1, 1:W + 1, :] = acc.reshape(H, W, C)

    # ---- conv2 (3x3, pad=1) ----
    acc2 = jnp.zeros((H * W, C), jnp.float32)
    for tap in range(9):
        dy, dx = tap // 3, tap % 3
        patch = midpad_ref[dy:dy + H, dx:dx + W, :].reshape(H * W, C)
        acc2 = acc2 + jnp.dot(patch, w2_ref[tap],
                              preferred_element_type=jnp.float32)
    acc2 = acc2 * scale2_ref[...] + shift2_ref[...]

    # ---- residual add ----
    x_center = xp[1:H + 1, 1:W + 1, :].reshape(H * W, C)
    out = x_center + acc2
    out_ref[0] = out.reshape(H, W, C).astype(out_ref.dtype)


def sr_residual_blk(x, params, eps=1e-5):
    """Pallas TPU forward of SR_ResidualBlk.  x: [B, C, H, W] (NCHW)."""
    B, C, H, W = x.shape
    f32 = jnp.float32

    # --- layout plumbing outside the kernel: NCHW -> NHWC, zero-pad H/W ---
    x_nhwc = jnp.transpose(x, (0, 2, 3, 1))
    x_pad = jnp.pad(x_nhwc.astype(f32), ((0, 0), (1, 1), (1, 1), (0, 0)))

    # conv weights: PyTorch OIHW -> (9 taps, Cin, Cout)
    w1_t = jnp.transpose(params["w1"].astype(f32), (2, 3, 1, 0)).reshape(9, C, C)
    w2_t = jnp.transpose(params["w2"].astype(f32), (2, 3, 1, 0)).reshape(9, C, C)

    # fold conv bias + BatchNorm (inference) into per-channel scale/shift
    s1 = params["gamma1"].astype(f32) / jnp.sqrt(params["var1"].astype(f32) + eps)
    sh1 = (params["b1"].astype(f32) - params["mean1"].astype(f32)) * s1 \
        + params["beta1"].astype(f32)
    s2 = params["gamma2"].astype(f32) / jnp.sqrt(params["var2"].astype(f32) + eps)
    sh2 = (params["b2"].astype(f32) - params["mean2"].astype(f32)) * s2 \
        + params["beta2"].astype(f32)

    alpha = jnp.broadcast_to(jnp.asarray(params["alpha"], f32).reshape(-1), (C,))

    scale1, shift1 = s1.reshape(1, C), sh1.reshape(1, C)
    scale2, shift2 = s2.reshape(1, C), sh2.reshape(1, C)
    alpha_v = alpha.reshape(1, C)

    flops = 2 * 2 * 9 * B * H * W * C * C            # two 3x3 convs on the MXU
    bytes_accessed = (x_pad.size + B * H * W * C) * 4 + (w1_t.size + w2_t.size) * 4

    out_nhwc = pl.pallas_call(
        _residual_blk_kernel,
        out_shape=jax.ShapeDtypeStruct((B, H, W, C), x.dtype),
        grid_spec=pltpu.PrefetchScalarGridSpec(
            num_scalar_prefetch=0,
            grid=(B,),
            in_specs=[
                pl.BlockSpec((1, H + 2, W + 2, C), lambda b: (b, 0, 0, 0)),
                pl.BlockSpec((9, C, C), lambda b: (0, 0, 0)),
                pl.BlockSpec((9, C, C), lambda b: (0, 0, 0)),
                pl.BlockSpec((1, C), lambda b: (0, 0)),
                pl.BlockSpec((1, C), lambda b: (0, 0)),
                pl.BlockSpec((1, C), lambda b: (0, 0)),
                pl.BlockSpec((1, C), lambda b: (0, 0)),
                pl.BlockSpec((1, C), lambda b: (0, 0)),
            ],
            out_specs=pl.BlockSpec((1, H, W, C), lambda b: (b, 0, 0, 0)),
            scratch_shapes=[pltpu.VMEM((H + 2, W + 2, C), jnp.float32)],
        ),
        compiler_params=pltpu.CompilerParams(
            dimension_semantics=("parallel",),   # independent batch steps -> megacore OK
        ),
        cost_estimate=pl.CostEstimate(
            flops=flops, transcendentals=0, bytes_accessed=bytes_accessed),
    )(x_pad, w1_t, w2_t, scale1, shift1, alpha_v, scale2, shift2)

    return jnp.transpose(out_nhwc, (0, 3, 1, 2))


def sr_residual_blk_ref(x, params, eps=1e-5):
    """Pure-JAX reference mirroring the PyTorch module (BN in eval mode)."""
    f32 = jnp.float32
    xf = x.astype(f32)
    C = x.shape[1]

    def conv(y, w, b):
        out = lax.conv_general_dilated(
            y, w.astype(f32), window_strides=(1, 1), padding=((1, 1), (1, 1)),
            dimension_numbers=("NCHW", "OIHW", "NCHW"))
        return out + b.astype(f32)[None, :, None, None]

    def bn(y, g, bt, m, v):
        return (y - m[None, :, None, None]) / jnp.sqrt(v[None, :, None, None] + eps) \
            * g[None, :, None, None] + bt[None, :, None, None]

    r = conv(xf, params["w1"], params["b1"])
    r = bn(r, params["gamma1"].astype(f32), params["beta1"].astype(f32),
           params["mean1"].astype(f32), params["var1"].astype(f32))
    a = jnp.asarray(params["alpha"], f32).reshape(-1)
    a = a[None, :, None, None] if a.shape[0] == C else a.reshape(1, 1, 1, 1)
    r = jnp.where(r > 0, r, a * r)
    r = conv(r, params["w2"], params["b2"])
    r = bn(r, params["gamma2"].astype(f32), params["beta2"].astype(f32),
           params["mean2"].astype(f32), params["var2"].astype(f32))
    return (xf + r).astype(x.dtype)


if __name__ == "__main__":
    key = jax.random.PRNGKey(0)
    B, C, H, W = 2, 64, 16, 16
    keys = jax.random.split(key, 13)

    x = jax.random.normal(keys[0], (B, C, H, W), dtype=jnp.float32)
    params = {
        "w1": jax.random.normal(keys[1], (C, C, 3, 3), jnp.float32) * 0.05,
        "b1": jax.random.normal(keys[2], (C,), jnp.float32) * 0.1,
        "gamma1": 1.0 + 0.1 * jax.random.normal(keys[3], (C,), jnp.float32),
        "beta1": 0.1 * jax.random.normal(keys[4], (C,), jnp.float32),
        "mean1": 0.1 * jax.random.normal(keys[5], (C,), jnp.float32),
        "var1": 0.5 + jax.random.uniform(keys[6], (C,), jnp.float32),
        "alpha": jnp.float32(0.25),   # nn.PReLU() default single slope
        "w2": jax.random.normal(keys[7], (C, C, 3, 3), jnp.float32) * 0.05,
        "b2": jax.random.normal(keys[8], (C,), jnp.float32) * 0.1,
        "gamma2": 1.0 + 0.1 * jax.random.normal(keys[9], (C,), jnp.float32),
        "beta2": 0.1 * jax.random.normal(keys[10], (C,), jnp.float32),
        "mean2": 0.1 * jax.random.normal(keys[11], (C,), jnp.float32),
        "var2": 0.5 + jax.random.uniform(keys[12], (C,), jnp.float32),
    }

    out = sr_residual_blk(x, params)
    out = jax.block_until_ready(out)

    ref = sr_residual_blk_ref(x, params)
    assert out.shape == ref.shape, (out.shape, ref.shape)
    assert jnp.allclose(out, ref, rtol=2e-4, atol=2e-4), (
        "max abs err:", float(jnp.max(jnp.abs(out - ref))))

    print("KERNEL_OK")
</pallas_src>

<mosaic_0001>
module attributes {stable_mosaic.version = 11 : i64} {
  func.func @_residual_blk_kernel(%arg0: i32, %arg1: memref<1x18x18x64xf32, #tpu.memory_space<vmem>>, %arg2: memref<9x64x64xf32, #tpu.memory_space<vmem>>, %arg3: memref<9x64x64xf32, #tpu.memory_space<vmem>>, %arg4: memref<1x64xf32, #tpu.memory_space<vmem>>, %arg5: memref<1x64xf32, #tpu.memory_space<vmem>>, %arg6: memref<1x64xf32, #tpu.memory_space<vmem>>, %arg7: memref<1x64xf32, #tpu.memory_space<vmem>>, %arg8: memref<1x64xf32, #tpu.memory_space<vmem>>, %arg9: memref<1x16x16x64xf32, #tpu.memory_space<vmem>>, %arg10: memref<18x18x64xf32, #tpu.memory_space<vmem>>) attributes {dimension_semantics = [#tpu.dimension_semantics<parallel>], iteration_bounds = array<i64: 2>, scalar_prefetch = 0 : i64, scratch_operands = 1 : i64, tpu.core_type = #tpu.core_type<tc>, window_params = [{transform_indices = @transform_0, window_bounds = array<i64: 1, 18, 18, 64>}, {pipeline_mode = #tpu.pipeline_mode<synchronous>, transform_indices = @transform_1, window_bounds = array<i64: 9, 64, 64>}, {pipeline_mode = #tpu.pipeline_mode<synchronous>, transform_indices = @transform_2, window_bounds = array<i64: 9, 64, 64>}, {pipeline_mode = #tpu.pipeline_mode<synchronous>, transform_indices = @transform_3, window_bounds = array<i64: 1, 64>}, {pipeline_mode = #tpu.pipeline_mode<synchronous>, transform_indices = @transform_4, window_bounds = array<i64: 1, 64>}, {pipeline_mode = #tpu.pipeline_mode<synchronous>, transform_indices = @transform_5, window_bounds = array<i64: 1, 64>}, {pipeline_mode = #tpu.pipeline_mode<synchronous>, transform_indices = @transform_6, window_bounds = array<i64: 1, 64>}, {pipeline_mode = #tpu.pipeline_mode<synchronous>, transform_indices = @transform_7, window_bounds = array<i64: 1, 64>}, {transform_indices = @transform_8, window_bounds = array<i64: 1, 16, 16, 64>}]} {
    %c0 = arith.constant 0 : index
    %c0_0 = arith.constant 0 : index
    %c0_1 = arith.constant 0 : index
    %c0_2 = arith.constant 0 : index
    %0 = vector.load %arg1[%c0, %c0_0, %c0_1, %c0_2] : memref<1x18x18x64xf32, #tpu.memory_space<vmem>>, vector<1x18x18x64xf32>
    %1 = vector.shape_cast %0 : vector<1x18x18x64xf32> to vector<18x18x64xf32>
    %cst = arith.constant 0.000000e+00 : f32
    %2 = vector.broadcast %cst : f32 to vector<256x64xf32>
    %3 = vector.extract_strided_slice %1 {offsets = [0, 0, 0], sizes = [16, 16, 64], strides = [1, 1, 1]} : vector<18x18x64xf32> to vector<16x16x64xf32>
    %4 = vector.shape_cast %3 : vector<16x16x64xf32> to vector<256x64xf32>
    %c0_3 = arith.constant 0 : index
    %c0_4 = arith.constant 0 : index
    %c0_5 = arith.constant 0 : index
    %5 = vector.load %arg2[%c0_3, %c0_4, %c0_5] : memref<9x64x64xf32, #tpu.memory_space<vmem>>, vector<1x64x64xf32>
    %6 = vector.shape_cast %5 : vector<1x64x64xf32> to vector<64x64xf32>
    %cst_6 = arith.constant dense<0.000000e+00> : vector<256x64xf32>
    %7 = tpu.matmul %4, %6, %cst_6 {dimension_numbers = #tpu.dot_dimension_numbers<[1], [0], [0], [1], [0, 0, 1, 1], [], []>} : vector<256x64xf32>, vector<64x64xf32>, vector<256x64xf32> -> vector<256x64xf32>
    %8 = arith.addf %2, %7 : vector<256x64xf32>
    %9 = vector.extract_strided_slice %1 {offsets = [0, 1, 0], sizes = [16, 16, 64], strides = [1, 1, 1]} : vector<18x18x64xf32> to vector<16x16x64xf32>
    %10 = vector.shape_cast %9 : vector<16x16x64xf32> to vector<256x64xf32>
    %c1 = arith.constant 1 : index
    %c0_7 = arith.constant 0 : index
    %c0_8 = arith.constant 0 : index
    %11 = vector.load %arg2[%c1, %c0_7, %c0_8] : memref<9x64x64xf32, #tpu.memory_space<vmem>>, vector<1x64x64xf32>
    %12 = vector.shape_cast %11 : vector<1x64x64xf32> to vector<64x64xf32>
    %cst_9 = arith.constant dense<0.000000e+00> : vector<256x64xf32>
    %13 = tpu.matmul %10, %12, %cst_9 {dimension_numbers = #tpu.dot_dimension_numbers<[1], [0], [0], [1], [0, 0, 1, 1], [], []>} : vector<256x64xf32>, vector<64x64xf32>, vector<256x64xf32> -> vector<256x64xf32>
    %14 = arith.addf %8, %13 : vector<256x64xf32>
    %15 = vector.extract_strided_slice %1 {offsets = [0, 2, 0], sizes = [16, 16, 64], strides = [1, 1, 1]} : vector<18x18x64xf32> to vector<16x16x64xf32>
    %16 = vector.shape_cast %15 : vector<16x16x64xf32> to vector<256x64xf32>
    %c2 = arith.constant 2 : index
    %c0_10 = arith.constant 0 : index
    %c0_11 = arith.constant 0 : index
    %17 = vector.load %arg2[%c2, %c0_10, %c0_11] : memref<9x64x64xf32, #tpu.memory_space<vmem>>, vector<1x64x64xf32>
    %18 = vector.shape_cast %17 : vector<1x64x64xf32> to vector<64x64xf32>
    %cst_12 = arith.constant dense<0.000000e+00> : vector<256x64xf32>
    %19 = tpu.matmul %16, %18, %cst_12 {dimension_numbers = #tpu.dot_dimension_numbers<[1], [0], [0], [1], [0, 0, 1, 1], [], []>} : vector<256x64xf32>, vector<64x64xf32>, vector<256x64xf32> -> vector<256x64xf32>
    %20 = arith.addf %14, %19 : vector<256x64xf32>
    %21 = vector.extract_strided_slice %1 {offsets = [1, 0, 0], sizes = [16, 16, 64], strides = [1, 1, 1]} : vector<18x18x64xf32> to vector<16x16x64xf32>
    %22 = vector.shape_cast %21 : vector<16x16x64xf32> to vector<256x64xf32>
    %c3 = arith.constant 3 : index
    %c0_13 = arith.constant 0 : index
    %c0_14 = arith.constant 0 : index
    %23 = vector.load %arg2[%c3, %c0_13, %c0_14] : memref<9x64x64xf32, #tpu.memory_space<vmem>>, vector<1x64x64xf32>
    %24 = vector.shape_cast %23 : vector<1x64x64xf32> to vector<64x64xf32>
    %cst_15 = arith.constant dense<0.000000e+00> : vector<256x64xf32>
    %25 = tpu.matmul %22, %24, %cst_15 {dimension_numbers = #tpu.dot_dimension_numbers<[1], [0], [0], [1], [0, 0, 1, 1], [], []>} : vector<256x64xf32>, vector<64x64xf32>, vector<256x64xf32> -> vector<256x64xf32>
    %26 = arith.addf %20, %25 : vector<256x64xf32>
    %27 = vector.extract_strided_slice %1 {offsets = [1, 1, 0], sizes = [16, 16, 64], strides = [1, 1, 1]} : vector<18x18x64xf32> to vector<16x16x64xf32>
    %28 = vector.shape_cast %27 : vector<16x16x64xf32> to vector<256x64xf32>
    %c4 = arith.constant 4 : index
    %c0_16 = arith.constant 0 : index
    %c0_17 = arith.constant 0 : index
    %29 = vector.load %arg2[%c4, %c0_16, %c0_17] : memref<9x64x64xf32, #tpu.memory_space<vmem>>, vector<1x64x64xf32>
    %30 = vector.shape_cast %29 : vector<1x64x64xf32> to vector<64x64xf32>
    %cst_18 = arith.constant dense<0.000000e+00> : vector<256x64xf32>
    %31 = tpu.matmul %28, %30, %cst_18 {dimension_numbers = #tpu.dot_dimension_numbers<[1], [0], [0], [1], [0, 0, 1, 1], [], []>} : vector<256x64xf32>, vector<64x64xf32>, vector<256x64xf32> -> vector<256x64xf32>
    %32 = arith.addf %26, %31 : vector<256x64xf32>
    %33 = vector.extract_strided_slice %1 {offsets = [1, 2, 0], sizes = [16, 16, 64], strides = [1, 1, 1]} : vector<18x18x64xf32> to vector<16x16x64xf32>
    %34 = vector.shape_cast %33 : vector<16x16x64xf32> to vector<256x64xf32>
    %c5 = arith.constant 5 : index
    %c0_19 = arith.constant 0 : index
    %c0_20 = arith.constant 0 : index
    %35 = vector.load %arg2[%c5, %c0_19, %c0_20] : memref<9x64x64xf32, #tpu.memory_space<vmem>>, vector<1x64x64xf32>
    %36 = vector.shape_cast %35 : vector<1x64x64xf32> to vector<64x64xf32>
    %cst_21 = arith.constant dense<0.000000e+00> : vector<256x64xf32>
    %37 = tpu.matmul %34, %36, %cst_21 {dimension_numbers = #tpu.dot_dimension_numbers<[1], [0], [0], [1], [0, 0, 1, 1], [], []>} : vector<256x64xf32>, vector<64x64xf32>, vector<256x64xf32> -> vector<256x64xf32>
    %38 = arith.addf %32, %37 : vector<256x64xf32>
    %39 = vector.extract_strided_slice %1 {offsets = [2, 0, 0], sizes = [16, 16, 64], strides = [1, 1, 1]} : vector<18x18x64xf32> to vector<16x16x64xf32>
    %40 = vector.shape_cast %39 : vector<16x16x64xf32> to vector<256x64xf32>
    %c6 = arith.constant 6 : index
    %c0_22 = arith.constant 0 : index
    %c0_23 = arith.constant 0 : index
    %41 = vector.load %arg2[%c6, %c0_22, %c0_23] : memref<9x64x64xf32, #tpu.memory_space<vmem>>, vector<1x64x64xf32>
    %42 = vector.shape_cast %41 : vector<1x64x64xf32> to vector<64x64xf32>
    %cst_24 = arith.constant dense<0.000000e+00> : vector<256x64xf32>
    %43 = tpu.matmul %40, %42, %cst_24 {dimension_numbers = #tpu.dot_dimension_numbers<[1], [0], [0], [1], [0, 0, 1, 1], [], []>} : vector<256x64xf32>, vector<64x64xf32>, vector<256x64xf32> -> vector<256x64xf32>
    %44 = arith.addf %38, %43 : vector<256x64xf32>
    %45 = vector.extract_strided_slice %1 {offsets = [2, 1, 0], sizes = [16, 16, 64], strides = [1, 1, 1]} : vector<18x18x64xf32> to vector<16x16x64xf32>
    %46 = vector.shape_cast %45 : vector<16x16x64xf32> to vector<256x64xf32>
    %c7 = arith.constant 7 : index
    %c0_25 = arith.constant 0 : index
    %c0_26 = arith.constant 0 : index
    %47 = vector.load %arg2[%c7, %c0_25, %c0_26] : memref<9x64x64xf32, #tpu.memory_space<vmem>>, vector<1x64x64xf32>
    %48 = vector.shape_cast %47 : vector<1x64x64xf32> to vector<64x64xf32>
    %cst_27 = arith.constant dense<0.000000e+00> : vector<256x64xf32>
    %49 = tpu.matmul %46, %48, %cst_27 {dimension_numbers = #tpu.dot_dimension_numbers<[1], [0], [0], [1], [0, 0, 1, 1], [], []>} : vector<256x64xf32>, vector<64x64xf32>, vector<256x64xf32> -> vector<256x64xf32>
    %50 = arith.addf %44, %49 : vector<256x64xf32>
    %51 = vector.extract_strided_slice %1 {offsets = [2, 2, 0], sizes = [16, 16, 64], strides = [1, 1, 1]} : vector<18x18x64xf32> to vector<16x16x64xf32>
    %52 = vector.shape_cast %51 : vector<16x16x64xf32> to vector<256x64xf32>
    %c8 = arith.constant 8 : index
    %c0_28 = arith.constant 0 : index
    %c0_29 = arith.constant 0 : index
    %53 = vector.load %arg2[%c8, %c0_28, %c0_29] : memref<9x64x64xf32, #tpu.memory_space<vmem>>, vector<1x64x64xf32>
    %54 = vector.shape_cast %53 : vector<1x64x64xf32> to vector<64x64xf32>
    %cst_30 = arith.constant dense<0.000000e+00> : vector<256x64xf32>
    %55 = tpu.matmul %52, %54, %cst_30 {dimension_numbers = #tpu.dot_dimension_numbers<[1], [0], [0], [1], [0, 0, 1, 1], [], []>} : vector<256x64xf32>, vector<64x64xf32>, vector<256x64xf32> -> vector<256x64xf32>
    %56 = arith.addf %50, %55 : vector<256x64xf32>
    %c0_31 = arith.constant 0 : index
    %c0_32 = arith.constant 0 : index
    %57 = vector.load %arg4[%c0_31, %c0_32] : memref<1x64xf32, #tpu.memory_space<vmem>>, vector<1x64xf32>
    %58 = vector.broadcast %57 : vector<1x64xf32> to vector<256x64xf32>
    %59 = arith.mulf %56, %58 : vector<256x64xf32>
    %c0_33 = arith.constant 0 : index
    %c0_34 = arith.constant 0 : index
    %60 = vector.load %arg5[%c0_33, %c0_34] : memref<1x64xf32, #tpu.memory_space<vmem>>, vector<1x64xf32>
    %61 = vector.broadcast %60 : vector<1x64xf32> to vector<256x64xf32>
    %62 = arith.addf %59, %61 : vector<256x64xf32>
    %cst_35 = arith.constant 0.000000e+00 : f32
    %63 = vector.broadcast %cst_35 : f32 to vector<256x64xf32>
    %64 = arith.cmpf ogt, %62, %63 : vector<256x64xf32>
    %c0_36 = arith.constant 0 : index
    %c0_37 = arith.constant 0 : index
    %65 = vector.load %arg6[%c0_36, %c0_37] : memref<1x64xf32, #tpu.memory_space<vmem>>, vector<1x64xf32>
    %66 = vector.broadcast %65 : vector<1x64xf32> to vector<256x64xf32>
    %67 = arith.mulf %62, %66 : vector<256x64xf32>
    %68 = arith.select %64, %62, %67 : vector<256x64xi1>, vector<256x64xf32>
    %cst_38 = arith.constant 0.000000e+00 : f32
    %69 = vector.broadcast %cst_38 : f32 to vector<18x18x64xf32>
    %c0_39 = arith.constant 0 : index
    %c0_40 = arith.constant 0 : index
    %c0_41 = arith.constant 0 : index
    %70 = vector.load %arg10[%c0_39, %c0_40, %c0_41] : memref<18x18x64xf32, #tpu.memory_space<vmem>>, vector<18x18x64xf32>
    tpu.vector_store %arg10[%c0_39, %c0_40, %c0_41], %69 {strides = array<i32>} : memref<18x18x64xf32, #tpu.memory_space<vmem>>, vector<18x18x64xf32>,
    %71 = vector.shape_cast %68 : vector<256x64xf32> to vector<16x16x64xf32>
    %c1_42 = arith.constant 1 : index
    %c1_43 = arith.constant 1 : index
    %c0_44 = arith.constant 0 : index
    %72 = vector.load %arg10[%c1_42, %c1_43, %c0_44] : memref<18x18x64xf32, #tpu.memory_space<vmem>>, vector<16x16x64xf32>
    tpu.vector_store %arg10[%c1_42, %c1_43, %c0_44], %71 {strides = array<i32>} : memref<18x18x64xf32, #tpu.memory_space<vmem>>, vector<16x16x64xf32>,
    %cst_45 = arith.constant 0.000000e+00 : f32
    %73 = vector.broadcast %cst_45 : f32 to vector<256x64xf32>
    %c0_46 = arith.constant 0 : index
    %c0_47 = arith.constant 0 : index
    %c0_48 = arith.constant 0 : index
    %74 = vector.load %arg10[%c0_46, %c0_47, %c0_48] : memref<18x18x64xf32, #tpu.memory_space<vmem>>, vector<16x16x64xf32>
    %75 = vector.shape_cast %74 : vector<16x16x64xf32> to vector<256x64xf32>
    %c0_49 = arith.constant 0 : index
    %c0_50 = arith.constant 0 : index
    %c0_51 = arith.constant 0 : index
    %76 = vector.load %arg3[%c0_49, %c0_50, %c0_51] : memref<9x64x64xf32, #tpu.memory_space<vmem>>, vector<1x64x64xf32>
    %77 = vector.shape_cast %76 : vector<1x64x64xf32> to vector<64x64xf32>
    %cst_52 = arith.constant dense<0.000000e+00> : vector<256x64xf32>
    %78 = tpu.matmul %75, %77, %cst_52 {dimension_numbers = #tpu.dot_dimension_numbers<[1], [0], [0], [1], [0, 0, 1, 1], [], []>} : vector<256x64xf32>, vector<64x64xf32>, vector<256x64xf32> -> vector<256x64xf32>
    %79 = arith.addf %73, %78 : vector<256x64xf32>
    %c0_53 = arith.constant 0 : index
    %c1_54 = arith.constant 1 : index
    %c0_55 = arith.constant 0 : index
    %80 = vector.load %arg10[%c0_53, %c1_54, %c0_55] : memref<18x18x64xf32, #tpu.memory_space<vmem>>, vector<16x16x64xf32>
    %81 = vector.shape_cast %80 : vector<16x16x64xf32> to vector<256x64xf32>
    %c1_56 = arith.constant 1 : index
    %c0_57 = arith.constant 0 : index
    %c0_58 = arith.constant 0 : index
    %82 = vector.load %arg3[%c1_56, %c0_57, %c0_58] : memref<9x64x64xf32, #tpu.memory_space<vmem>>, vector<1x64x64xf32>
    %83 = vector.shape_cast %82 : vector<1x64x64xf32> to vector<64x64xf32>
    %cst_59 = arith.constant dense<0.000000e+00> : vector<256x64xf32>
    %84 = tpu.matmul %81, %83, %cst_59 {dimension_numbers = #tpu.dot_dimension_numbers<[1], [0], [0], [1], [0, 0, 1, 1], [], []>} : vector<256x64xf32>, vector<64x64xf32>, vector<256x64xf32> -> vector<256x64xf32>
    %85 = arith.addf %79, %84 : vector<256x64xf32>
    %c0_60 = arith.constant 0 : index
    %c2_61 = arith.constant 2 : index
    %c0_62 = arith.constant 0 : index
    %86 = vector.load %arg10[%c0_60, %c2_61, %c0_62] : memref<18x18x64xf32, #tpu.memory_space<vmem>>, vector<16x16x64xf32>
    %87 = vector.shape_cast %86 : vector<16x16x64xf32> to vector<256x64xf32>
    %c2_63 = arith.constant 2 : index
    %c0_64 = arith.constant 0 : index
    %c0_65 = arith.constant 0 : index
    %88 = vector.load %arg3[%c2_63, %c0_64, %c0_65] : memref<9x64x64xf32, #tpu.memory_space<vmem>>, vector<1x64x64xf32>
    %89 = vector.shape_cast %88 : vector<1x64x64xf32> to vector<64x64xf32>
    %cst_66 = arith.constant dense<0.000000e+00> : vector<256x64xf32>
    %90 = tpu.matmul %87, %89, %cst_66 {dimension_numbers = #tpu.dot_dimension_numbers<[1], [0], [0], [1], [0, 0, 1, 1], [], []>} : vector<256x64xf32>, vector<64x64xf32>, vector<256x64xf32> -> vector<256x64xf32>
    %91 = arith.addf %85, %90 : vector<256x64xf32>
    %c1_67 = arith.constant 1 : index
    %c0_68 = arith.constant 0 : index
    %c0_69 = arith.constant 0 : index
    %92 = vector.load %arg10[%c1_67, %c0_68, %c0_69] : memref<18x18x64xf32, #tpu.memory_space<vmem>>, vector<16x16x64xf32>
    %93 = vector.shape_cast %92 : vector<16x16x64xf32> to vector<256x64xf32>
    %c3_70 = arith.constant 3 : index
    %c0_71 = arith.constant 0 : index
    %c0_72 = arith.constant 0 : index
    %94 = vector.load %arg3[%c3_70, %c0_71, %c0_72] : memref<9x64x64xf32, #tpu.memory_space<vmem>>, vector<1x64x64xf32>
    %95 = vector.shape_cast %94 : vector<1x64x64xf32> to vector<64x64xf32>
    %cst_73 = arith.constant dense<0.000000e+00> : vector<256x64xf32>
    %96 = tpu.matmul %93, %95, %cst_73 {dimension_numbers = #tpu.dot_dimension_numbers<[1], [0], [0], [1], [0, 0, 1, 1], [], []>} : vector<256x64xf32>, vector<64x64xf32>, vector<256x64xf32> -> vector<256x64xf32>
    %97 = arith.addf %91, %96 : vector<256x64xf32>
    %c1_74 = arith.constant 1 : index
    %c1_75 = arith.constant 1 : index
    %c0_76 = arith.constant 0 : index
    %98 = vector.load %arg10[%c1_74, %c1_75, %c0_76] : memref<18x18x64xf32, #tpu.memory_space<vmem>>, vector<16x16x64xf32>
    %99 = vector.shape_cast %98 : vector<16x16x64xf32> to vector<256x64xf32>
    %c4_77 = arith.constant 4 : index
    %c0_78 = arith.constant 0 : index
    %c0_79 = arith.constant 0 : index
    %100 = vector.load %arg3[%c4_77, %c0_78, %c0_79] : memref<9x64x64xf32, #tpu.memory_space<vmem>>, vector<1x64x64xf32>
    %101 = vector.shape_cast %100 : vector<1x64x64xf32> to vector<64x64xf32>
    %cst_80 = arith.constant dense<0.000000e+00> : vector<256x64xf32>
    %102 = tpu.matmul %99, %101, %cst_80 {dimension_numbers = #tpu.dot_dimension_numbers<[1], [0], [0], [1], [0, 0, 1, 1], [], []>} : vector<256x64xf32>, vector<64x64xf32>, vector<256x64xf32> -> vector<256x64xf32>
    %103 = arith.addf %97, %102 : vector<256x64xf32>
    %c1_81 = arith.constant 1 : index
    %c2_82 = arith.constant 2 : index
    %c0_83 = arith.constant 0 : index
    %104 = vector.load %arg10[%c1_81, %c2_82, %c0_83] : memref<18x18x64xf32, #tpu.memory_space<vmem>>, vector<16x16x64xf32>
    %105 = vector.shape_cast %104 : vector<16x16x64xf32> to vector<256x64xf32>
    %c5_84 = arith.constant 5 : index
    %c0_85 = arith.constant 0 : index
    %c0_86 = arith.constant 0 : index
    %106 = vector.load %arg3[%c5_84, %c0_85, %c0_86] : memref<9x64x64xf32, #tpu.memory_space<vmem>>, vector<1x64x64xf32>
    %107 = vector.shape_cast %106 : vector<1x64x64xf32> to vector<64x64xf32>
    %cst_87 = arith.constant dense<0.000000e+00> : vector<256x64xf32>
    %108 = tpu.matmul %105, %107, %cst_87 {dimension_numbers = #tpu.dot_dimension_numbers<[1], [0], [0], [1], [0, 0, 1, 1], [], []>} : vector<256x64xf32>, vector<64x64xf32>, vector<256x64xf32> -> vector<256x64xf32>
    %109 = arith.addf %103, %108 : vector<256x64xf32>
    %c2_88 = arith.constant 2 : index
    %c0_89 = arith.constant 0 : index
    %c0_90 = arith.constant 0 : index
    %110 = vector.load %arg10[%c2_88, %c0_89, %c0_90] : memref<18x18x64xf32, #tpu.memory_space<vmem>>, vector<16x16x64xf32>
    %111 = vector.shape_cast %110 : vector<16x16x64xf32> to vector<256x64xf32>
    %c6_91 = arith.constant 6 : index
    %c0_92 = arith.constant 0 : index
    %c0_93 = arith.constant 0 : index
    %112 = vector.load %arg3[%c6_91, %c0_92, %c0_93] : memref<9x64x64xf32, #tpu.memory_space<vmem>>, vector<1x64x64xf32>
    %113 = vector.shape_cast %112 : vector<1x64x64xf32> to vector<64x64xf32>
    %cst_94 = arith.constant dense<0.000000e+00> : vector<256x64xf32>
    %114 = tpu.matmul %111, %113, %cst_94 {dimension_numbers = #tpu.dot_dimension_numbers<[1], [0], [0], [1], [0, 0, 1, 1], [], []>} : vector<256x64xf32>, vector<64x64xf32>, vector<256x64xf32> -> vector<256x64xf32>
    %115 = arith.addf %109, %114 : vector<256x64xf32>
    %c2_95 = arith.constant 2 : index
    %c1_96 = arith.constant 1 : index
    %c0_97 = arith.constant 0 : index
    %116 = vector.load %arg10[%c2_95, %c1_96, %c0_97] : memref<18x18x64xf32, #tpu.memory_space<vmem>>, vector<16x16x64xf32>
    %117 = vector.shape_cast %116 : vector<16x16x64xf32> to vector<256x64xf32>
    %c7_98 = arith.constant 7 : index
    %c0_99 = arith.constant 0 : index
    %c0_100 = arith.constant 0 : index
    %118 = vector.load %arg3[%c7_98, %c0_99, %c0_100] : memref<9x64x64xf32, #tpu.memory_space<vmem>>, vector<1x64x64xf32>
    %119 = vector.shape_cast %118 : vector<1x64x64xf32> to vector<64x64xf32>
    %cst_101 = arith.constant dense<0.000000e+00> : vector<256x64xf32>
    %120 = tpu.matmul %117, %119, %cst_101 {dimension_numbers = #tpu.dot_dimension_numbers<[1], [0], [0], [1], [0, 0, 1, 1], [], []>} : vector<256x64xf32>, vector<64x64xf32>, vector<256x64xf32> -> vector<256x64xf32>
    %121 = arith.addf %115, %120 : vector<256x64xf32>
    %c2_102 = arith.constant 2 : index
    %c2_103 = arith.constant 2 : index
    %c0_104 = arith.constant 0 : index
    %122 = vector.load %arg10[%c2_102, %c2_103, %c0_104] : memref<18x18x64xf32, #tpu.memory_space<vmem>>, vector<16x16x64xf32>
    %123 = vector.shape_cast %122 : vector<16x16x64xf32> to vector<256x64xf32>
    %c8_105 = arith.constant 8 : index
    %c0_106 = arith.constant 0 : index
    %c0_107 = arith.constant 0 : index
    %124 = vector.load %arg3[%c8_105, %c0_106, %c0_107] : memref<9x64x64xf32, #tpu.memory_space<vmem>>, vector<1x64x64xf32>
    %125 = vector.shape_cast %124 : vector<1x64x64xf32> to vector<64x64xf32>
    %cst_108 = arith.constant dense<0.000000e+00> : vector<256x64xf32>
    %126 = tpu.matmul %123, %125, %cst_108 {dimension_numbers = #tpu.dot_dimension_numbers<[1], [0], [0], [1], [0, 0, 1, 1], [], []>} : vector<256x64xf32>, vector<64x64xf32>, vector<256x64xf32> -> vector<256x64xf32>
    %127 = arith.addf %121, %126 : vector<256x64xf32>
    %c0_109 = arith.constant 0 : index
    %c0_110 = arith.constant 0 : index
    %128 = vector.load %arg7[%c0_109, %c0_110] : memref<1x64xf32, #tpu.memory_space<vmem>>, vector<1x64xf32>
    %129 = vector.broadcast %128 : vector<1x64xf32> to vector<256x64xf32>
    %130 = arith.mulf %127, %129 : vector<256x64xf32>
    %c0_111 = arith.constant 0 : index
    %c0_112 = arith.constant 0 : index
    %131 = vector.load %arg8[%c0_111, %c0_112] : memref<1x64xf32, #tpu.memory_space<vmem>>, vector<1x64xf32>
    %132 = vector.broadcast %131 : vector<1x64xf32> to vector<256x64xf32>
    %133 = arith.addf %130, %132 : vector<256x64xf32>
    %134 = vector.extract_strided_slice %1 {offsets = [1, 1, 0], sizes = [16, 16, 64], strides = [1, 1, 1]} : vector<18x18x64xf32> to vector<16x16x64xf32>
    %135 = vector.shape_cast %134 : vector<16x16x64xf32> to vector<256x64xf32>
    %136 = arith.addf %135, %133 : vector<256x64xf32>
    %137 = vector.shape_cast %136 : vector<256x64xf32> to vector<16x16x64xf32>
    %c0_113 = arith.constant 0 : index
    %c0_114 = arith.constant 0 : index
    %c0_115 = arith.constant 0 : index
    %c0_116 = arith.constant 0 : index
    %138 = vector.load %arg9[%c0_113, %c0_114, %c0_115, %c0_116] : memref<1x16x16x64xf32, #tpu.memory_space<vmem>>, vector<1x16x16x64xf32>
    %139 = vector.shape_cast %138 : vector<1x16x16x64xf32> to vector<16x16x64xf32>
    %140 = vector.shape_cast %137 : vector<16x16x64xf32> to vector<1x16x16x64xf32>
    tpu.vector_store %arg9[%c0_113, %c0_114, %c0_115, %c0_116], %140 {strides = array<i32>} : memref<1x16x16x64xf32, #tpu.memory_space<vmem>>, vector<1x16x16x64xf32>,
    return
  }
  func.func @transform_0(%arg0: i32) -> (i32, i32, i32, i32) {
    %c0_i32 = arith.constant 0 : i32
    %c0_i32_0 = arith.constant 0 : i32
    %c0_i32_1 = arith.constant 0 : i32
    %c0_i32_2 = arith.constant 0 : i32
    return %arg0, %c0_i32, %c0_i32_0, %c0_i32_1 : i32, i32, i32, i32
  }
  func.func @transform_1(%arg0: i32) -> (i32, i32, i32) {
    %c0_i32 = arith.constant 0 : i32
    %c0_i32_0 = arith.constant 0 : i32
    %c0_i32_1 = arith.constant 0 : i32
    %c0_i32_2 = arith.constant 0 : i32
    return %c0_i32, %c0_i32_0, %c0_i32_1 : i32, i32, i32
  }
  func.func @transform_2(%arg0: i32) -> (i32, i32, i32) {
    %c0_i32 = arith.constant 0 : i32
    %c0_i32_0 = arith.constant 0 : i32
    %c0_i32_1 = arith.constant 0 : i32
    %c0_i32_2 = arith.constant 0 : i32
    return %c0_i32, %c0_i32_0, %c0_i32_1 : i32, i32, i32
  }
  func.func @transform_3(%arg0: i32) -> (i32, i32) {
    %c0_i32 = arith.constant 0 : i32
    %c0_i32_0 = arith.constant 0 : i32
    %c0_i32_1 = arith.constant 0 : i32
    return %c0_i32, %c0_i32_0 : i32, i32
  }
  func.func @transform_4(%arg0: i32) -> (i32, i32) {
    %c0_i32 = arith.constant 0 : i32
    %c0_i32_0 = arith.constant 0 : i32
    %c0_i32_1 = arith.constant 0 : i32
    return %c0_i32, %c0_i32_0 : i32, i32
  }
  func.func @transform_5(%arg0: i32) -> (i32, i32) {
    %c0_i32 = arith.constant 0 : i32
    %c0_i32_0 = arith.constant 0 : i32
    %c0_i32_1 = arith.constant 0 : i32
    return %c0_i32, %c0_i32_0 : i32, i32
  }
  func.func @transform_6(%arg0: i32) -> (i32, i32) {
    %c0_i32 = arith.constant 0 : i32
    %c0_i32_0 = arith.constant 0 : i32
    %c0_i32_1 = arith.constant 0 : i32
    return %c0_i32, %c0_i32_0 : i32, i32
  }
  func.func @transform_7(%arg0: i32) -> (i32, i32) {
    %c0_i32 = arith.constant 0 : i32
    %c0_i32_0 = arith.constant 0 : i32
    %c0_i32_1 = arith.constant 0 : i32
    return %c0_i32, %c0_i32_0 : i32, i32
  }
  func.func @transform_8(%arg0: i32) -> (i32, i32, i32, i32) {
    %c0_i32 = arith.constant 0 : i32
    %c0_i32_0 = arith.constant 0 : i32
    %c0_i32_1 = arith.constant 0 : i32
    %c0_i32_2 = arith.constant 0 : i32
    return %arg0, %c0_i32, %c0_i32_0, %c0_i32_1 : i32, i32, i32, i32
  }
}

</mosaic_0001>

<bundles_post_ra>
// kernel: tpu_custom_call.1
= control target key start
LH: loop header
LB: loop body
LE: loop exit
PB: predicated region body
PF: predicated region fallthrough
CT: control target
= control target key end

     0   :  { %13 = vsyncpa [#allocation4], 0  ;;  %s13852_s0 = inlined_call_operand.vmem [shape: f32[2,18,18,64], index: 0, kind: input, shape index: {}]   ;;  %s13853_s1 = inlined_call_operand.vmem [shape: f32[9,64,64], index: 1, kind: input, shape index: {}]   ;;  %s13854_s2 = inlined_call_operand.vmem [shape: f32[9,64,64], index: 2, kind: input, shape index: {}]   ;;  %s13855_s3 = inlined_call_operand.vmem [shape: f32[1,64], index: 3, kind: input, shape index: {}]   ;;  %s13856_s4 = inlined_call_operand.vmem [shape: f32[1,64], index: 4, kind: input, shape index: {}]   ;;  %s13857_s5 = inlined_call_operand.vmem [shape: f32[1,64], index: 5, kind: input, shape index: {}]   ;;  %s13858_s6 = inlined_call_operand.vmem [shape: f32[1,64], index: 6, kind: input, shape index: {}]   ;;  %s13859_s7 = inlined_call_operand.vmem [shape: f32[1,64], index: 7, kind: input, shape index: {}]   ;;  %s13860_s8 = inlined_call_operand.hbm [shape: f32[2,16,16,64], index: 8, kind: output, shape index: {}]  }
   0x1   :  { %15 = vsyncpa [#allocation4 + $0x1], 0  ;;  %s9910_s27 = smov 0   ;;  %s9912_s28 = smov 0  }
   0x2   :  { %s9914_s29 = smov 0   ;;  %s9916_s30 = smov 0  }
   0x3 LB: > { %s9931_s9 = sadd.s32 4294967295, %s9859_s30   ;;  %s7141_s10 = sadd.s32 4294967294, %s9859_s30   ;;  %s9859_s30 = sphi %s9916_s30, %s14400_s30   ;;  %s9855_s29 = sphi %s9914_s29, %s14399_s29   ;;  %s9851_s28 = sphi %s9912_s28, %s14398_s28   ;;  %s9847_s27 = sphi %s9910_s27, %s14397_s27  }
   0x4   : > { %s9935_s11 = sadd.s32 1, %s9859_s30   ;;  %s201_s12 = sadd.s32 1, %s9855_s29 }
   0x5   : > { %s198_s13 = ssub.s32 %s9859_s30, %s9935_s11  ;;  %p211_p0 = scmp.ne.s32.totalorder %s9855_s29, %s9851_s28 }
   0x6   : > { %p199_p1 = scmp.eq.s32.totalorder %s198_s13, 0  ;;  %p212_p2 = scmp.eq.s32.totalorder %s9931_s9, 1 }
   0x7   : > { %p217_p3 = scmp.ne.s32.totalorder %s9851_s28, %s9847_s27  ;;  %p218_p4 = scmp.eq.s32.totalorder %s7141_s10, 1 }
   0x8   : > { %s9946_s14 = scalar_select %p199_p1, %s9855_s29, %s201_s12  }
   0x9   : > { %p9948_p5 = por %p212_p2, %p211_p0  ;;  %p9952_p6 = por %p218_p4, %p217_p3 }
   0xa   : > { %p7144_p7 = scmp.ge.s32.totalorder %s9859_s30, 1  ;;  %p265_p8 = scmp.lt.s32.totalorder %s9859_s30, 3 }
   0xc   : > { %p266_p9 = pnand %p7144_p7, %p265_p8 }
   0xe   : > { %269 = sbr.rel (%p266_p9) target bundleno = 1051 (0x41b), region = 52 }
  0x13   : > { %v7154_v0 = vld [vmem:[%s13853_s1 + $0x78] sm:$0xff]  ;;  %v7153_v2 = vld [vmem:[%s13853_s1 + $0x70] sm:$0xff]  ;;  %p299_p10 = scmp.lt.s32.totalorder %s9931_s9, 1  ;;  %v7152_v4 = vld [vmem:[%s13853_s1 + $0x68] sm:$0xff]  ;;  %vm414_vm0 = vcmask 1046528   ;;  %vm504_vm1 = vcmask 523264  }
  0x14   : > { %v365_v1 = vld [vmem:[%s13853_s1 + $0x38] sm:$0xff]  ;;  %8582 = vmatprep.subr.mxu0 %v7154_v0  ;;  %v364_v3 = vld [vmem:[%s13853_s1 + $0x30] sm:$0xff]  ;;  %v363_v5 = vld [vmem:[%s13853_s1 + $0x28] sm:$0xff]  ;;  %vm1083_vm2 = vcmask 1045504   ;;  %vm3355_vm3 = vcmask 517120   ;;  %s7861_s22 = sshll.u32 %s9931_s9, 12 }
  0x15   : > { %8646 = vmatprep.subr.mxu1 %v365_v1  ;;  %8583 = vmatpush3.msra.mxu0 %v7154_v0  ;;  %s300_s13 = scalar_select %p299_p10, %s9931_s9, 1  ;;  %v7151_v6 = vld [vmem:[%s13853_s1 + $0x60] sm:$0xff]  ;;  %v7150_v8 = vld [vmem:[%s13853_s1 + $0x58] sm:$0xff]  ;;  %v7149_v12 = vld [vmem:[%s13853_s1 + $0x50] sm:$0xff] }
  0x16   : > { %8647 = vmatpush3.msra.mxu1 %v365_v1  ;;  %8584 = vmatprep.subr.mxu0 %v7153_v2  ;;  %v362_v7 = vld [vmem:[%s13853_s1 + $0x20] sm:$0xff]  ;;  %v361_v9 = vld [vmem:[%s13853_s1 + $0x18] sm:$0xff]  ;;  %v360_v13 = vld [vmem:[%s13853_s1 + $0x10] sm:$0xff]  ;;  %s13801_s26 = scalar_lea.hbm %s13860_s8, %s7861_s22  ;;  %s9862_s17 = smov [#allocation3]  }
  0x17   : > { %8648 = vmatprep.subr.mxu1 %v364_v3  ;;  %8585 = vmatpush3.msra.mxu0 %v7153_v2  ;;  %s9734_s21 = smul.u32 432, %s300_s13  ;;  %v7148_v19 = vld [vmem:[%s13853_s1 + $0x48] sm:$0xff]  ;;  %v7147_v22 = vld [vmem:[%s13853_s1 + $0x40] sm:$0xff]  ;;  %v7226_v32 = vld [vmem:[%s13853_s1 + $0xb8] sm:$0xff]  ;;  %s296_s13 = sand.u32 1, %s9851_s28  }
  0x18   : > { %8649 = vmatpush3.msra.mxu1 %v364_v3  ;;  %8586 = vmatprep.subr.mxu0 %v7152_v4  ;;  %v359_v20 = vld [vmem:[%s13853_s1 + $0x8] sm:$0xff]  ;;  %v358_v23 = vld [vmem:[%s13853_s1] sm:$0xff]  ;;  %v7225_v39 = vld [vmem:[%s13853_s1 + $0xb0] sm:$0xff]  ;;  %s7145_s20 = sshll.u32 %s296_s13, 8  ;;  %s13812_s9 = scalar_lea.sflag [#allocation4], %s296_s13 }
  0x19   : > { %8650 = vmatprep.subr.mxu1 %v363_v5  ;;  %8587 = vmatpush3.msra.mxu0 %v7152_v4  ;;  %s9993_s12 = scalar_lea.vmem %s13852_s0, %s9734_s21  ;;  %v7224_v48 = vld [vmem:[%s13853_s1 + $0xa8] sm:$0xff]  ;;  %v7266_v49 = vld [vmem:[%s13853_s1 + $0xf8] sm:$0xff]  ;;  %v7265_v58 = vld [vmem:[%s13853_s1 + $0xf0] sm:$0xff]  ;;  %s13541_s21 = scalar_lea.vmem [#allocation3], %s7145_s20 }
  0x1a   : > { %8651 = vmatpush3.msra.mxu1 %v363_v5  ;;  %8588 = vmatprep.subr.mxu0 %v7151_v6  ;;  %v9996_v10 = vld [vmem:[%s9993_s12] sm:$0xff]  ;;  %v9999_v11 = vld [vmem:[%s9993_s12 + $0x8] sm:$0xff]  ;;  %v10008_v14 = vld [vmem:[%s9993_s12 + $0x10] sm:$0x3]  ;;  %s7079_s23 = sshll.u32 %s13541_s21, 4  ;;  %s9803_s18 = sshll.u32 %s9862_s17, 4  ;;  %s13803_s23 = int_to_ptr.vmem [resolvable:$true] %s7079_s23  ;;  %s9804_s18 = int_to_ptr.vmem [resolvable:$false] %s9803_s18 }
  0x1b   : > { %8652 = vmatprep.subr.mxu1 %v362_v7  ;;  %8589 = vmatpush3.msra.mxu0 %v7151_v6  ;;  %v415_v15 = vrot.slane %v9996_v10, 1  ;;  %v416_v16 = vrot.slane %v9999_v11, 1  ;;  %v10013_v17 = vld [vmem:[%s9993_s12 + $0x18] sm:$0xff]  ;;  %v10016_v18 = vld [vmem:[%s9993_s12 + $0x20] sm:$0xff]  ;;  %v418_v21 = vrot.slane %v10008_v14, 1  ;;  %v10038_v28 = vld [vmem:[%s9993_s12 + $0x30] sm:$0xff]  ;;  %p9806_p0 = scmp.lt.s32.totalorder %s13803_s23, %s9804_s18 }
  0x1c   : > { %8653 = vmatpush3.msra.mxu1 %v362_v7  ;;  %8590 = vmatprep.subr.mxu0 %v7150_v8  ;;  %v420_v24 = vrot.slane %v10013_v17, 1  ;;  %v421_v25 = vrot.slane %v10016_v18, 1  ;;  %v10034_v26 = vld [vmem:[%s9993_s12 + $0x28] sm:$0x3]  ;;  %v10041_v29 = vld [vmem:[%s9993_s12 + $0x38] sm:$0xff]  ;;  %v425_v34 = vrot.slane %v10038_v28, 1 }
  0x1d   : > { %8654 = vmatprep.subr.mxu1 %v361_v9  ;;  %8591 = vmatpush3.msra.mxu0 %v7150_v8  ;;  %v417_v27 = vsel %vm414_vm0, %v415_v15, %v416_v16  ;;  %v419_v30 = vsel %vm414_vm0, %v416_v16, %v418_v21  ;;  %v423_v31 = vrot.slane %v10034_v26, 1  ;;  %v426_v35 = vrot.slane %v10041_v29, 1  ;;  %v10055_v36 = vld [vmem:[%s9993_s12 + $0x40] sm:$0x3]  ;;  %v10060_v37 = vld [vmem:[%s9993_s12 + $0x48] sm:$0xff]  ;;  %v10063_v38 = vld [vmem:[%s9993_s12 + $0x50] sm:$0xff] }
  0x1e   : > { %8655 = vmatpush3.msra.mxu1 %v361_v9  ;;  %8592 = vmatprep.subr.mxu0 %v7149_v12  ;;  %v10050_v33 = vsel %vm414_vm0, %v420_v24, %v421_v25  ;;  %v428_v41 = vrot.slane %v10055_v36, 1  ;;  %v430_v43 = vrot.slane %v10060_v37, 1  ;;  %v431_v44 = vrot.slane %v10063_v38, 1  ;;  %v10085_v45 = vld [vmem:[%s9993_s12 + $0x58] sm:$0x3]  ;;  %v10088_v46 = vld [vmem:[%s9993_s12 + $0x60] sm:$0xff] }
  0x1f   : > { %8656 = vmatprep.subr.mxu1 %v360_v13  ;;  %8593 = vmatpush3.msra.mxu0 %v7149_v12  ;;  %13965 = vst [vmem:[#allocation6_spill] sm:$0xff] %v10050_v33  ;;  %v10074_v40 = vsel %vm414_vm0, %v421_v25, %v423_v31  ;;  %v10080_v42 = vsel %vm414_vm0, %v425_v34, %v426_v35  ;;  %v10091_v47 = vld [vmem:[%s9993_s12 + $0x68] sm:$0xff]  ;;  %v433_v51 = vrot.slane %v10085_v45, 1  ;;  %v435_v53 = vrot.slane %v10088_v46, 1  ;;  %v10117_v55 = vld [vmem:[%s9993_s12 + $0x70] sm:$0x3] }
  0x20   : > { %8657 = vmatpush3.msra.mxu1 %v360_v13  ;;  %8594 = vmatprep.subr.mxu0 %v7148_v19  ;;  %13966 = vst [vmem:[#allocation7_spill] sm:$0xff] %v10074_v40  ;;  %13967 = vst [vmem:[#allocation8_spill] sm:$0xff] %v10080_v42  ;;  %v10108_v50 = vsel %vm414_vm0, %v426_v35, %v428_v41  ;;  %v10112_v52 = vsel %vm414_vm0, %v430_v43, %v431_v44  ;;  %v436_v54 = vrot.slane %v10091_v47, 1  ;;  %v10120_v56 = vld [vmem:[%s9993_s12 + $0x78] sm:$0xff]  ;;  %v10123_v57 = vld [vmem:[%s9993_s12 + $0x80] sm:$0xff]  ;;  %s9799_s10 = scalar_lea.vmem %s13803_s23, 4096 }
  0x21   : > { %8658 = vmatprep.subr.mxu1 %v359_v20  ;;  %8595 = vmatpush3.msra.mxu0 %v7148_v19  ;;  %13968 = vst [vmem:[#allocation9_spill] sm:$0xff] %v10108_v50  ;;  %13969 = vst [vmem:[#allocation10_spill] sm:$0xff] %v10112_v52  ;;  %v7223_v59 = vld [vmem:[%s13853_s1 + $0xa0] sm:$0xff]  ;;  %v10140_v60 = vsel %vm414_vm0, %v431_v44, %v433_v51  ;;  %v438_v61 = vrot.slane %v10117_v55, 1  ;;  %v440_v63 = vrot.slane %v10120_v56, 1  ;;  %v441_v0 = vrot.slane %v10123_v57, 1  ;;  %p9800_p11 = scmp.ne.s32.totalorder %s13803_s23, %s9799_s10 }
  0x22   : > { %8659 = vmatpush3.msra.mxu1 %v359_v20  ;;  %8596 = vmatprep.subr.mxu0 %v7147_v22  ;;  %13970 = vst [vmem:[#allocation11_spill] sm:$0xff] %v10140_v60  ;;  %v10144_v62 = vsel %vm414_vm0, %v435_v53, %v436_v54  ;;  %v10149_v1 = vld [vmem:[%s9993_s12 + $0x88] sm:$0x3]  ;;  %v10152_v2 = vld [vmem:[%s9993_s12 + $0x90] sm:$0xff]  ;;  %v10155_v3 = vld [vmem:[%s9993_s12 + $0x98] sm:$0xff]  ;;  %s9805_s19 = scalar_lea.vmem %s9804_s18, 8192 }
  0x23   : > { %8660 = vmatprep.subr.mxu1 %v358_v23  ;;  %8597 = vmatpush3.msra.mxu0 %v7147_v22  ;;  %13971 = vst [vmem:[#allocation12_spill] sm:$0xff] %v10144_v62  ;;  %v7264_v4 = vld [vmem:[%s13853_s1 + $0xe8] sm:$0xff]  ;;  %v7222_v5 = vld [vmem:[%s13853_s1 + $0x98] sm:$0xff]  ;;  %v10172_v6 = vsel %vm414_vm0, %v436_v54, %v438_v61  ;;  %v443_v7 = vrot.slane %v10149_v1, 1  ;;  %v10176_v8 = vsel %vm414_vm0, %v440_v63, %v441_v0  ;;  %v445_v9 = vrot.slane %v10152_v2, 1  ;;  %v10187_v16 = vld [vmem:[%s9993_s12 + $0xb0] sm:$0xff]  ;;  %p9801_p12 = pnand %p9800_p11, %p9948_p5  ;;  %p9807_p1 = scmp.lt.s32.totalorder %s9805_s19, %s9799_s10 }
  0x24   : > { %8598 = vmatprep.mubr.msk.f32.mxu0 %vm504_vm1, %v417_v27  ;;  %8661 = vmatpush3.msra.mxu1 %v358_v23  ;;  %13972 = vst [vmem:[#allocation13_spill] sm:$0xff] %v10172_v6  ;;  %13973 = vst [vmem:[#allocation14_spill] sm:$0xff] %v10176_v8  ;;  %v446_v12 = vrot.slane %v10155_v3, 1  ;;  %v10181_v13 = vld [vmem:[%s9993_s12 + $0xa0] sm:$0x3]  ;;  %v10184_v15 = vld [vmem:[%s9993_s12 + $0xa8] sm:$0xff] }
  0x25   : > { %8662 = vmatprep.mubr.msk.f32.mxu1 %vm504_vm1, %v9996_v10  ;;  %8599 = vmatmul.mubr.msk.f32.vlgmr.msra.gmra.mxu0 %vm504_vm1, %v419_v30  ;;  %v7263_v19 = vld [vmem:[%s13853_s1 + $0xe0] sm:$0xff]  ;;  %v7221_v20 = vld [vmem:[%s13853_s1 + $0x90] sm:$0xff]  ;;  %v10204_v21 = vsel %vm414_vm0, %v441_v0, %v443_v7  ;;  %v448_v22 = vrot.slane %v10181_v13, 1  ;;  %v450_v24 = vrot.slane %v10184_v15, 1  ;;  %v451_v25 = vrot.slane %v10187_v16, 1  ;;  %v10219_v31 = vld [vmem:[%s9993_s12 + $0xc8] sm:$0xff]  ;;  %p9802_p13 = pneg %p9801_p12  ;;  %p9808_p2 = por %p9807_p1, %p9806_p0 }
  0x26   : > { %8663 = vmatmul.mubr.msk.f32.vlgmr.msra.gmra.mxu1 %vm504_vm1, %v9999_v11  ;;  %8710 = vmatprep.subr.mxu0 %v7226_v32  ;;  %13974 = vst [vmem:[#allocation15_spill] sm:$0xff] %v10204_v21  ;;  %v10208_v23 = vsel %vm414_vm0, %v445_v9, %v446_v12  ;;  %v10213_v27 = vld [vmem:[%s9993_s12 + $0xb8] sm:$0x3]  ;;  %v10216_v30 = vld [vmem:[%s9993_s12 + $0xc0] sm:$0xff]  ;;  %v7220_v34 = vld [vmem:[%s13853_s1 + $0x88] sm:$0xff]  ;;  %v456_v44 = vrot.slane %v10219_v31, 1 }
  0x27   : > { %8601 = vmatprep.mubr.msk.f32.mxu0 %vm504_vm1, %v10050_v33  ;;  %8711 = vmatpush3.msra.mxu0 %v7226_v32  ;;  %13975 = vst [vmem:[#allocation16_spill] sm:$0xff] %v10208_v23  ;;  %v7262_v32 = vld [vmem:[%s13853_s1 + $0xd8] sm:$0xff]  ;;  %v10236_v35 = vsel %vm414_vm0, %v446_v12, %v448_v22  ;;  %v10240_v41 = vsel %vm414_vm0, %v450_v24, %v451_v25  ;;  %v455_v43 = vrot.slane %v10216_v30, 1  ;;  %v10251_v51 = vld [vmem:[%s9993_s12 + $0xe0] sm:$0xff]  ;;  %v7261_v53 = vld [vmem:[%s13853_s1 + $0xd0] sm:$0xff]  ;;  %p9809_p3 = pnand %p9808_p2, %p9802_p13 }
  0x28   : > { %8665 = vmatprep.mubr.msk.f32.mxu1 %vm504_vm1, %v10013_v17  ;;  %8712 = vmatprep.subr.mxu0 %v7225_v39  ;;  %13976 = vst [vmem:[#allocation17_spill] sm:$0xff] %v10236_v35  ;;  %13977 = vst [vmem:[#allocation18_spill] sm:$0xff] %v10240_v41  ;;  %v7219_v54 = vld [vmem:[%s13853_s1 + $0x80] sm:$0xff]  ;;  %v461_v0 = vrot.slane %v10251_v51, 1  ;;  %v10283_v7 = vld [vmem:[%s9993_s12 + $0xf8] sm:$0xff] }
  0x29   : > { %8602 = vmatmul.mubr.msk.f32.gmra.mxu0 %vm504_vm1, %v10074_v40  ;;  %8774 = vmatprep.subr.mxu1 %v7266_v49  ;;  %v10272_v61 = vsel %vm414_vm0, %v455_v43, %v456_v44  ;;  %v7260_v9 = vld [vmem:[%s13853_s1 + $0xc8] sm:$0xff]  ;;  %v10295_v12 = vld [vmem:[%s13853_s1 + $0x138] sm:$0xff]  ;;  %v7259_v43 = vld [vmem:[%s13853_s1 + $0xc0] sm:$0xff] }
  0x2a   : > { %8666 = vmatmul.mubr.msk.f32.gmra.mxu1 %vm504_vm1, %v10016_v18  ;;  %8604 = vmatprep.mubr.msk.f32.mxu0 %vm504_vm1, %v10080_v42  ;;  %13979 = vst [vmem:[#allocation20_spill] sm:$0xff] %v10272_v61 }
  0x2b   : > { %8668 = vmatprep.mubr.msk.f32.mxu1 %vm504_vm1, %v10038_v28  ;;  %8713 = vmatpush3.msra.mxu0 %v7225_v39  ;;  %v453_v39 = vrot.slane %v10213_v27, 1 }
  0x2c   : > { %8714 = vmatprep.subr.mxu0 %v7224_v48  ;;  %8775 = vmatpush3.msra.mxu1 %v7266_v49  ;;  %v10248_v49 = vld [vmem:[%s9993_s12 + $0xd8] sm:$0xff] }
  0x2d   : > { %8605 = vmatmul.mubr.msk.f32.gmra.mxu0 %vm504_vm1, %v10108_v50  ;;  %8776 = vmatprep.subr.mxu1 %v7265_v58  ;;  %v460_v63 = vrot.slane %v10248_v49, 1 }
  0x2e   : > { %8669 = vmatmul.mubr.msk.f32.gmra.mxu1 %vm504_vm1, %v10041_v29  ;;  %8607 = vmatprep.mubr.msk.f32.mxu0 %vm504_vm1, %v10112_v52  ;;  %v10451_v52 = vld [vmem:[%s9993_s12 + $0x178] sm:$0x3] }
  0x2f   : > { %8671 = vmatprep.mubr.msk.f32.mxu1 %vm504_vm1, %v10060_v37  ;;  %8715 = vmatpush3.msra.mxu0 %v7224_v48  ;;  %v10245_v48 = vld [vmem:[%s9993_s12 + $0xd0] sm:$0x3]  ;;  %v10306_v22 = vsel %vm414_vm0, %v460_v63, %v461_v0 }
  0x30   : > { %8716 = vmatprep.subr.mxu0 %v7223_v59  ;;  %8777 = vmatpush3.msra.mxu1 %v7265_v58  ;;  %v10268_v58 = vsel %vm414_vm0, %v451_v25, %v453_v39  ;;  %13981 = vst [vmem:[#allocation22_spill] sm:$0xff] %v10306_v22  ;;  %v466_v25 = vrot.slane %v10283_v7, 1  ;;  %v10317_v39 = vld [vmem:[%s9993_s12 + $0x110] sm:$0xff] }
  0x31   : > { %8608 = vmatmul.mubr.msk.f32.gmra.mxu0 %vm504_vm1, %v10140_v60  ;;  %8778 = vmatprep.subr.mxu1 %v7264_v4  ;;  %13978 = vst [vmem:[#allocation19_spill] sm:$0xff] %v10268_v58  ;;  %v471_v63 = vrot.slane %v10317_v39, 1 }
  0x32   : > { %8672 = vmatmul.mubr.msk.f32.gmra.mxu1 %vm504_vm1, %v10063_v38  ;;  %8610 = vmatprep.mubr.msk.f32.mxu0 %vm504_vm1, %v10144_v62  ;;  %v10428_v62 = vld [vmem:[%s9993_s12 + $0x168] sm:$0xff] }
  0x33   : > { %8674 = vmatprep.mubr.msk.f32.mxu1 %vm504_vm1, %v10088_v46  ;;  %8717 = vmatpush3.msra.mxu0 %v7223_v59  ;;  %v458_v59 = vrot.slane %v10245_v48, 1  ;;  %v490_v60 = vrot.slane %v10428_v62, 1 }
  0x34   : > { %8718 = vmatprep.subr.mxu0 %v7222_v5  ;;  %8779 = vmatpush3.msra.mxu1 %v7264_v4  ;;  %v10277_v4 = vld [vmem:[%s9993_s12 + $0xe8] sm:$0x3] }
  0x35   : > { %8611 = vmatmul.mubr.msk.f32.gmra.mxu0 %vm504_vm1, %v10172_v6  ;;  %8780 = vmatprep.subr.mxu1 %v7263_v19  ;;  %v10425_v6 = vld [vmem:[%s9993_s12 + $0x160] sm:$0x3] }
  0x36   : > { %8675 = vmatmul.mubr.msk.f32.gmra.mxu1 %vm504_vm1, %v10091_v47  ;;  %8613 = vmatprep.mubr.msk.f32.mxu0 %vm504_vm1, %v10176_v8 }
  0x37   : > { %8677 = vmatprep.mubr.msk.f32.mxu1 %vm504_vm1, %v10120_v56  ;;  %8719 = vmatpush3.msra.mxu0 %v7222_v5  ;;  %v10280_v5 = vld [vmem:[%s9993_s12 + $0xf0] sm:$0xff] }
  0x38   : > { %8720 = vmatprep.subr.mxu0 %v7221_v20  ;;  %8781 = vmatpush3.msra.mxu1 %v7263_v19  ;;  %v10302_v19 = vsel %vm414_vm0, %v456_v44, %v458_v59  ;;  %v465_v24 = vrot.slane %v10280_v5, 1 }
  0x39   : > { %8614 = vmatmul.mubr.msk.f32.gmra.mxu0 %vm504_vm1, %v10204_v21  ;;  %8782 = vmatprep.subr.mxu1 %v7262_v32  ;;  %13980 = vst [vmem:[#allocation21_spill] sm:$0xff] %v10302_v19  ;;  %v10405_v21 = vld [vmem:[%s9993_s12 + $0x158] sm:$0xff] }
  0x3a   : > { %8678 = vmatmul.mubr.msk.f32.gmra.mxu1 %vm504_vm1, %v10123_v57  ;;  %8616 = vmatprep.mubr.msk.f32.mxu0 %vm504_vm1, %v10208_v23  ;;  %v10399_v23 = vld [vmem:[%s9993_s12 + $0x148] sm:$0x3]  ;;  %v486_v8 = vrot.slane %v10405_v21, 1 }
  0x3b   : > { %8680 = vmatprep.mubr.msk.f32.mxu1 %vm504_vm1, %v10152_v2  ;;  %8721 = vmatpush3.msra.mxu0 %v7221_v20  ;;  %v463_v20 = vrot.slane %v10277_v4, 1 }
  0x3c   : > { %8722 = vmatprep.subr.mxu0 %v7220_v34  ;;  %8783 = vmatpush3.msra.mxu1 %v7262_v32  ;;  %v10311_v32 = vld [vmem:[%s9993_s12 + $0x100] sm:$0x3] }
  0x3d   : > { %8617 = vmatmul.mubr.msk.f32.gmra.mxu0 %vm504_vm1, %v10236_v35  ;;  %8784 = vmatprep.subr.mxu1 %v7261_v53  ;;  %v10332_v44 = vsel %vm414_vm0, %v461_v0, %v463_v20  ;;  %v10352_v0 = vld [vmem:[%s13853_s1 + $0x178] sm:$0xff] }
  0x3e   : > { %8681 = vmatmul.mubr.msk.f32.gmra.mxu1 %vm504_vm1, %v10155_v3  ;;  %8619 = vmatprep.mubr.msk.f32.mxu0 %vm504_vm1, %v10240_v41  ;;  %13982 = vst [vmem:[#allocation23_spill] sm:$0xff] %v10332_v44 }
  0x3f   : > { %8683 = vmatprep.mubr.msk.f32.mxu1 %vm504_vm1, %v10184_v15  ;;  %8723 = vmatpush3.msra.mxu0 %v7220_v34  ;;  %v10314_v34 = vld [vmem:[%s9993_s12 + $0x108] sm:$0xff] }
  0x40   : > { %8724 = vmatprep.subr.mxu0 %v7219_v54  ;;  %8785 = vmatpush3.msra.mxu1 %v7261_v53  ;;  %v468_v53 = vrot.slane %v10311_v32, 1  ;;  %v470_v59 = vrot.slane %v10314_v34, 1 }
  0x41   : > { %8620 = vmatmul.mubr.msk.f32.gmra.mxu0 %vm504_vm1, %v10268_v58  ;;  %8786 = vmatprep.subr.mxu1 %v7260_v9  ;;  %v10372_v58 = vld [vmem:[%s9993_s12 + $0x130] sm:$0x3] }
  0x42   : > { %8684 = vmatmul.mubr.msk.f32.gmra.mxu1 %vm504_vm1, %v10187_v16  ;;  %8622 = vmatprep.mubr.msk.f32.mxu0 %vm504_vm1, %v10272_v61  ;;  %v10363_v20 = vsel %vm414_vm0, %v466_v25, %v468_v53 }
  0x43   : > { %8686 = vmatprep.mubr.msk.f32.mxu1 %vm504_vm1, %v10216_v30  ;;  %8725 = vmatpush3.msra.mxu0 %v7219_v54  ;;  %v10336_v54 = vsel %vm414_vm0, %v465_v24, %v466_v25  ;;  %13984 = vst [vmem:[#allocation25_spill] sm:$0xff] %v10363_v20  ;;  %v10379_v25 = vld [vmem:[%s9993_s12 + $0x140] sm:$0xff] }
  0x44   : > { %8787 = vmatpush3.msra.mxu1 %v7260_v9  ;;  %8838 = vmatprep.subr.mxu0 %v10295_v12  ;;  %13983 = vst [vmem:[#allocation24_spill] sm:$0xff] %v10336_v54  ;;  %v10341_v9 = vld [vmem:[%s9993_s12 + $0x118] sm:$0x3]  ;;  %v481_v35 = vrot.slane %v10379_v25, 1 }
  0x45   : > { %8623 = vmatmul.mubr.msk.f32.gmra.mxu0 %vm504_vm1, %v10302_v19  ;;  %8788 = vmatprep.subr.mxu1 %v7259_v43  ;;  %v10347_v19 = vld [vmem:[%s9993_s12 + $0x128] sm:$0xff]  ;;  %v473_v24 = vrot.slane %v10341_v9, 1 }
  0x46   : > { %8687 = vmatmul.mubr.msk.f32.gmra.mxu1 %vm504_vm1, %v10219_v31  ;;  %8625 = vmatprep.mubr.msk.f32.mxu0 %vm504_vm1, %v10306_v22  ;;  %v10344_v22 = vld [vmem:[%s9993_s12 + $0x120] sm:$0xff]  ;;  %v476_v61 = vrot.slane %v10347_v19, 1 }
  0x47   : > { %8689 = vmatprep.mubr.msk.f32.mxu1 %vm504_vm1, %v10248_v49  ;;  %8789 = vmatpush3.msra.mxu1 %v7259_v43  ;;  %v10367_v43 = vsel %vm414_vm0, %v470_v59, %v471_v63  ;;  %v10390_v53 = vsel %vm414_vm0, %v471_v63, %v473_v24  ;;  %v478_v59 = vrot.slane %v10372_v58, 1  ;;  %v483_v63 = vrot.slane %v10399_v23, 1 }
  0x48   : > { %13985 = vst [vmem:[#allocation26_spill] sm:$0xff] %v10367_v43  ;;  %8902 = vmatprep.subr.mxu1 %v10352_v0  ;;  %13986 = vst [vmem:[#allocation27_spill] sm:$0xff] %v10390_v53 }
  0x49   : > { %8626 = vmatmul.mubr.msk.f32.gmra.mxu0 %vm504_vm1, %v10332_v44  ;;  %v475_v44 = vrot.slane %v10344_v22, 1 }
  0x4a   : > { %8690 = vmatmul.mubr.msk.f32.gmra.mxu1 %vm504_vm1, %v10251_v51  ;;  %8628 = vmatprep.mubr.msk.f32.mxu0 %vm504_vm1, %v10336_v54  ;;  %v10376_v54 = vld [vmem:[%s9993_s12 + $0x138] sm:$0xff] }
  0x4b   : > { %8692 = vmatprep.mubr.msk.f32.mxu1 %vm504_vm1, %v10280_v5  ;;  %v10394_v41 = vsel %vm414_vm0, %v475_v44, %v476_v61  ;;  %v10416_v44 = vsel %vm414_vm0, %v476_v61, %v478_v59  ;;  %v10442_v61 = vsel %vm414_vm0, %v481_v35, %v483_v63 }
  0x4c   : > { %13987 = vst [vmem:[#allocation28_spill] sm:$0xff] %v10394_v41  ;;  %13988 = vst [vmem:[#allocation29_spill] sm:$0xff] %v10416_v44 }
  0x4d   : > { %8629 = vmatmul.mubr.msk.f32.gmra.mxu0 %vm504_vm1, %v10363_v20  ;;  %v480_v20 = vrot.slane %v10376_v54, 1  ;;  %13990 = vst [vmem:[#allocation31_spill] sm:$0xff] %v10442_v61 }
  0x4e   : > { %8693 = vmatmul.mubr.msk.f32.gmra.mxu1 %vm504_vm1, %v10283_v7  ;;  %8631 = vmatprep.mubr.msk.f32.mxu0 %vm504_vm1, %v10367_v43  ;;  %v10402_v43 = vld [vmem:[%s9993_s12 + $0x150] sm:$0xff] }
  0x4f   : > { %8695 = vmatprep.mubr.msk.f32.mxu1 %vm504_vm1, %v10314_v34  ;;  %v10420_v24 = vsel %vm414_vm0, %v480_v20, %v481_v35  ;;  %v488_v20 = vrot.slane %v10425_v6, 1 }
  0x50   : > { %13989 = vst [vmem:[#allocation30_spill] sm:$0xff] %v10420_v24 }
  0x51   : > { %8632 = vmatmul.mubr.msk.f32.gmra.mxu0 %vm504_vm1, %v10390_v53  ;;  %v485_v53 = vrot.slane %v10402_v43, 1  ;;  %v10462_v35 = vsel %vm414_vm0, %v486_v8, %v488_v20  ;;  %v1094_v20 = vrot.slane %v10038_v28, 2 }
  0x52   : > { %8696 = vmatmul.mubr.msk.f32.gmra.mxu1 %vm504_vm1, %v10317_v39  ;;  %8634 = vmatprep.mubr.msk.f32.mxu0 %vm504_vm1, %v10394_v41  ;;  %v10431_v41 = vld [vmem:[%s9993_s12 + $0x170] sm:$0xff]  ;;  %13992 = vst [vmem:[#allocation33_spill] sm:$0xff] %v10462_v35 }
  0x53   : > { %8698 = vmatprep.mubr.msk.f32.mxu1 %vm504_vm1, %v10344_v22  ;;  %v10446_v59 = vsel %vm414_vm0, %v485_v53, %v486_v8  ;;  %v493_v53 = vrot.slane %v10451_v52, 1  ;;  %v1090_v8 = vrot.slane %v10016_v18, 2 }
  0x54   : > { %13991 = vst [vmem:[#allocation32_spill] sm:$0xff] %v10446_v59 }
  0x55   : > { %8635 = vmatmul.mubr.msk.f32.gmra.mxu0 %vm504_vm1, %v10416_v44  ;;  %v491_v44 = vrot.slane %v10431_v41, 1 }
  0x56   : > { %8699 = vmatmul.mubr.msk.f32.gmra.mxu1 %vm504_vm1, %v10347_v19  ;;  %8637 = vmatprep.mubr.msk.f32.mxu0 %vm504_vm1, %v10420_v24  ;;  %v1084_v24 = vrot.slane %v9996_v10, 2 }
  0x57   : > { %8701 = vmatprep.mubr.msk.f32.mxu1 %vm504_vm1, %v10376_v54  ;;  %v10466_v63 = vsel %vm414_vm0, %v490_v60, %v491_v44  ;;  %v10480_v60 = vsel %vm414_vm0, %v491_v44, %v493_v53  ;;  %v1092_v44 = vrot.slane %v10034_v26, 2  ;;  %v1095_v53 = vrot.slane %v10041_v29, 2 }
  0x58   : > { %13993 = vst [vmem:[#allocation34_spill] sm:$0xff] %v10466_v63  ;;  %13994 = vst [vmem:[#allocation35_spill] sm:$0xff] %v10480_v60  ;;  %v1097_v26 = vrot.slane %v10055_v36, 2  ;;  %v7345_v36 = vld [vmem:[%s13853_s1 + $0x170] sm:$0xff] }
  0x59   : > { %8638 = vmatmul.mubr.msk.f32.gmra.mxu0 %vm504_vm1, %v10442_v61  ;;  %v1085_v61 = vrot.slane %v9999_v11, 2  ;;  %v1089_v11 = vrot.slane %v10013_v17, 2 }
  0x5a   : > { %8702 = vmatmul.mubr.msk.f32.gmra.mxu1 %vm504_vm1, %v10379_v25  ;;  %8640 = vmatprep.mubr.msk.f32.mxu0 %vm504_vm1, %v10446_v59  ;;  %v1087_v59 = vrot.slane %v10008_v14, 2 }
  0x5b   : > { %8704 = vmatprep.mubr.msk.f32.mxu1 %vm504_vm1, %v10402_v43  ;;  %v1086_v10 = vsel %vm1083_vm2, %v1084_v24, %v1085_v61  ;;  %v10495_v24 = vsel %vm1083_vm2, %v1089_v11, %v1090_v8  ;;  %v1105_v11 = vrot.slane %v10091_v47, 2 }
  0x5c   : > { %v1088_v14 = vsel %vm1083_vm2, %v1085_v61, %v1087_v59  ;;  %v10515_v61 = vsel %vm1083_vm2, %v1094_v20, %v1095_v53  ;;  %v1099_v59 = vrot.slane %v10060_v37, 2  ;;  %v1110_v20 = vrot.slane %v10123_v57, 2 }
  0x5d   : > { %8641 = vmatmul.mubr.msk.f32.gmra.mxu0 %vm504_vm1, %v10462_v35 }
  0x5e   : > { %8705 = vmatmul.mubr.msk.f32.gmra.mxu1 %vm504_vm1, %v10405_v21  ;;  %8643 = vmatprep.mubr.msk.f32.mxu0 %vm504_vm1, %v10466_v63 }
  0x5f   : > { %8707 = vmatprep.mubr.msk.f32.mxu1 %vm504_vm1, %v10428_v62 }
  0x61   : > { %8644 = vmatmul.mubr.msk.f32.gmra.mxu0 %vm504_vm1, %v10480_v60  ;;  %v7305_v60 = vld [vmem:[%s13853_s1 + $0x130] sm:$0xff] }
  0x62   : > { %8708 = vmatmul.mubr.msk.f32.gmra.mxu1 %vm504_vm1, %v10431_v41  ;;  %8726 = vmatprep.mubr.msk.f32.mxu0 %vm504_vm1, %v1086_v10  ;;  %v1104_v10 = vrot.slane %v10088_v46, 2 }
  0x63   : > { %8790 = vmatprep.mubr.msk.f32.mxu1 %vm504_vm1, %v10013_v17  ;;  %v10509_v17 = vsel %vm1083_vm2, %v1090_v8, %v1092_v44  ;;  %v1107_v8 = vrot.slane %v10117_v55, 2  ;;  %v1109_v44 = vrot.slane %v10120_v56, 2 }
  0x65   : > { %8727 = vmatmul.mubr.msk.f32.vlgmr.msra.gmra.mxu0 %vm504_vm1, %v1088_v14  ;;  %v10562_v14 = vsel %vm1083_vm2, %v1104_v10, %v1105_v11  ;;  %v10579_v55 = vsel %vm1083_vm2, %v1105_v11, %v1107_v8  ;;  %v1120_v10 = vrot.slane %v10187_v16, 2  ;;  %v1122_v11 = vrot.slane %v10213_v27, 2 }
  0x66   : > { %8791 = vmatmul.mubr.msk.f32.vlgmr.msra.gmra.mxu1 %vm504_vm1, %v10016_v18  ;;  %8839 = vmatpush3.msra.mxu0 %v10295_v12  ;;  %v1100_v18 = vrot.slane %v10063_v38, 2  ;;  %v7304_v12 = vld [vmem:[%s13853_s1 + $0x128] sm:$0xff]  ;;  %v1125_v8 = vrot.slane %v10219_v31, 2 }
  0x67   : > { %8729 = vmatprep.mubr.msk.f32.mxu0 %vm504_vm1, %v10495_v24  ;;  %8793 = vmatprep.mubr.msk.f32.mxu1 %vm504_vm1, %v10038_v28  ;;  %v10533_v28 = vsel %vm1083_vm2, %v1095_v53, %v1097_v26  ;;  %v1112_v53 = vrot.slane %v10149_v1, 2  ;;  %v10585_v26 = vsel %vm1083_vm2, %v1109_v44, %v1110_v20  ;;  %v10648_v27 = vsel %vm1083_vm2, %v1120_v10, %v1122_v11 }
  0x68   : > { %8840 = vmatprep.subr.mxu0 %v7305_v60  ;;  %8903 = vmatpush3.msra.mxu1 %v10352_v0  ;;  %v1102_v0 = vrot.slane %v10085_v45, 2  ;;  %13996 = vst [vmem:[#allocation37_spill] sm:$0xff] %v10648_v27  ;;  %v1127_v44 = vrot.slane %v10245_v48, 2  ;;  %v1150_v11 = vrot.slane %v10379_v25, 2 }
  0x69   : > { %8841 = vmatpush3.msra.mxu0 %v7305_v60  ;;  %v10539_v60 = vsel %vm1083_vm2, %v1099_v59, %v1100_v18  ;;  %8904 = vmatprep.subr.mxu1 %v7345_v36  ;;  %v1114_v59 = vrot.slane %v10152_v2, 2  ;;  %v10602_v1 = vsel %vm1083_vm2, %v1110_v20, %v1112_v53  ;;  %v1132_v53 = vrot.slane %v10277_v4, 2 }
  0x6a   : > { %8730 = vmatmul.mubr.msk.f32.gmra.mxu0 %vm504_vm1, %v10509_v17  ;;  %8794 = vmatmul.mubr.msk.f32.gmra.mxu1 %vm504_vm1, %v10041_v29  ;;  %v7303_v29 = vld [vmem:[%s13853_s1 + $0x120] sm:$0xff]  ;;  %v10556_v45 = vsel %vm1083_vm2, %v1100_v18, %v1102_v0  ;;  %v1115_v18 = vrot.slane %v10155_v3, 2  ;;  %v1119_v0 = vrot.slane %v10184_v15, 2  ;;  %v10673_v48 = vsel %vm1083_vm2, %v1125_v8, %v1127_v44 }
  0x6b   : > { %8732 = vmatprep.mubr.msk.f32.mxu0 %vm504_vm1, %v10515_v61  ;;  %8796 = vmatprep.mubr.msk.f32.mxu1 %vm504_vm1, %v10060_v37  ;;  %v7344_v37 = vld [vmem:[%s13853_s1 + $0x168] sm:$0xff]  ;;  %13998 = vst [vmem:[#allocation39_spill] sm:$0xff] %v10673_v48  ;;  %v1137_v4 = vrot.slane %v10311_v32, 2  ;;  %v1159_v44 = vrot.slane %v10428_v62, 2 }
  0x6c   : > { %8842 = vmatprep.subr.mxu0 %v7304_v12  ;;  %8905 = vmatpush3.msra.mxu1 %v7345_v36  ;;  %v10608_v36 = vsel %vm1083_vm2, %v1114_v59, %v1115_v18 }
  0x6d   : > { %8843 = vmatpush3.msra.mxu0 %v7304_v12  ;;  %8906 = vmatprep.subr.mxu1 %v7344_v37  ;;  %v1117_v12 = vrot.slane %v10181_v13, 2 }
  0x6e   : > { %8733 = vmatmul.mubr.msk.f32.gmra.mxu0 %vm504_vm1, %v10533_v28  ;;  %8797 = vmatmul.mubr.msk.f32.gmra.mxu1 %vm504_vm1, %v10063_v38  ;;  %v7302_v38 = vld [vmem:[%s13853_s1 + $0x118] sm:$0xff] }
  0x6f   : > { %8735 = vmatprep.mubr.msk.f32.mxu0 %vm504_vm1, %v10539_v60  ;;  %8799 = vmatprep.mubr.msk.f32.mxu1 %vm504_vm1, %v10088_v46  ;;  %v7343_v46 = vld [vmem:[%s13853_s1 + $0x160] sm:$0xff]  ;;  %v10625_v13 = vsel %vm1083_vm2, %v1115_v18, %v1117_v12  ;;  %v1134_v18 = vrot.slane %v10280_v5, 2  ;;  %v1139_v12 = vrot.slane %v10314_v34, 2 }
  0x70   : > { %8844 = vmatprep.subr.mxu0 %v7303_v29  ;;  %8907 = vmatpush3.msra.mxu1 %v7344_v37  ;;  %v1124_v37 = vrot.slane %v10216_v30, 2 }
  0x71   : > { %8845 = vmatpush3.msra.mxu0 %v7303_v29  ;;  %8908 = vmatprep.subr.mxu1 %v7343_v46  ;;  %v10631_v29 = vsel %vm1083_vm2, %v1119_v0, %v1120_v10  ;;  %v1140_v0 = vrot.slane %v10317_v39, 2  ;;  %v1144_v10 = vrot.slane %v10344_v22, 2 }
  0x72   : > { %8736 = vmatmul.mubr.msk.f32.gmra.mxu0 %vm504_vm1, %v10556_v45  ;;  %8800 = vmatmul.mubr.msk.f32.gmra.mxu1 %vm504_vm1, %v10091_v47  ;;  %v7301_v47 = vld [vmem:[%s13853_s1 + $0x110] sm:$0xff]  ;;  %13995 = vst [vmem:[#allocation36_spill] sm:$0xff] %v10631_v29  ;;  %v10654_v20 = vsel %vm1083_vm2, %v1124_v37, %v1125_v8  ;;  %v1154_v8 = vrot.slane %v10402_v43, 2 }
  0x73   : > { %8738 = vmatprep.mubr.msk.f32.mxu0 %vm504_vm1, %v10562_v14  ;;  %8802 = vmatprep.mubr.msk.f32.mxu1 %vm504_vm1, %v10120_v56  ;;  %v7342_v56 = vld [vmem:[%s13853_s1 + $0x158] sm:$0xff]  ;;  %13997 = vst [vmem:[#allocation38_spill] sm:$0xff] %v10654_v20  ;;  %v10720_v32 = vsel %vm1083_vm2, %v1139_v12, %v1140_v0 }
  0x74   : > { %8846 = vmatprep.subr.mxu0 %v7302_v38  ;;  %8909 = vmatpush3.msra.mxu1 %v7343_v46  ;;  %v1130_v46 = vrot.slane %v10251_v51, 2  ;;  %14003 = vst [vmem:[#allocation44_spill] sm:$0xff] %v10720_v32  ;;  %v14014_v12 = vld [vmem:[#allocation11_spill] sm:$0xff] }
  0x75   : > { %8847 = vmatpush3.msra.mxu0 %v7302_v38  ;;  %8910 = vmatprep.subr.mxu1 %v7342_v56  ;;  %v1129_v38 = vrot.slane %v10248_v49, 2 }
  0x76   : > { %8739 = vmatmul.mubr.msk.f32.gmra.mxu0 %vm504_vm1, %v10579_v55  ;;  %8803 = vmatmul.mubr.msk.f32.gmra.mxu1 %vm504_vm1, %v10123_v57  ;;  %v7300_v57 = vld [vmem:[%s13853_s1 + $0x108] sm:$0xff] }
  0x77   : > { %8741 = vmatprep.mubr.msk.f32.mxu0 %vm504_vm1, %v10585_v26  ;;  %8805 = vmatprep.mubr.msk.f32.mxu1 %vm504_vm1, %v10152_v2  ;;  %v7341_v2 = vld [vmem:[%s13853_s1 + $0x150] sm:$0xff]  ;;  %v10679_v59 = vsel %vm1083_vm2, %v1129_v38, %v1130_v46  ;;  %v1160_v38 = vrot.slane %v10431_v41, 2 }
  0x78   : > { %8848 = vmatprep.subr.mxu0 %v7301_v47  ;;  %8911 = vmatpush3.msra.mxu1 %v7342_v56  ;;  %13999 = vst [vmem:[#allocation40_spill] sm:$0xff] %v10679_v59 }
  0x79   : > { %8849 = vmatpush3.msra.mxu0 %v7301_v47  ;;  %8912 = vmatprep.subr.mxu1 %v7341_v2  ;;  %v1135_v47 = vrot.slane %v10283_v7, 2 }
  0x7a   : > { %8742 = vmatmul.mubr.msk.f32.gmra.mxu0 %vm504_vm1, %v10602_v1  ;;  %8806 = vmatmul.mubr.msk.f32.gmra.mxu1 %vm504_vm1, %v10155_v3  ;;  %v7299_v3 = vld [vmem:[%s13853_s1 + $0x100] sm:$0xff] }
  0x7b   : > { %8744 = vmatprep.mubr.msk.f32.mxu0 %vm504_vm1, %v10608_v36  ;;  %8808 = vmatprep.mubr.msk.f32.mxu1 %vm504_vm1, %v10184_v15  ;;  %v7340_v15 = vld [vmem:[%s13853_s1 + $0x148] sm:$0xff]  ;;  %v10702_v56 = vsel %vm1083_vm2, %v1134_v18, %v1135_v47 }
  0x7c   : > { %8850 = vmatprep.subr.mxu0 %v7300_v57  ;;  %8913 = vmatpush3.msra.mxu1 %v7341_v2  ;;  %14001 = vst [vmem:[#allocation42_spill] sm:$0xff] %v10702_v56  ;;  %v1149_v2 = vrot.slane %v10376_v54, 2 }
  0x7d   : > { %8851 = vmatpush3.msra.mxu0 %v7300_v57  ;;  %8914 = vmatprep.subr.mxu1 %v7340_v15  ;;  %v1145_v57 = vrot.slane %v10347_v19, 2 }
  0x7e   : > { %8745 = vmatmul.mubr.msk.f32.gmra.mxu0 %vm504_vm1, %v10625_v13  ;;  %8809 = vmatmul.mubr.msk.f32.gmra.mxu1 %vm504_vm1, %v10187_v16  ;;  %v7339_v16 = vld [vmem:[%s13853_s1 + $0x140] sm:$0xff]  ;;  %v10754_v37 = vsel %vm1083_vm2, %v1149_v2, %v1150_v11  ;;  %v7381_v2 = vld [vmem:[%s13853_s1 + $0x190] sm:$0xff] }
  0x7f   : > { %8747 = vmatprep.mubr.msk.f32.mxu0 %vm504_vm1, %v10631_v29  ;;  %8811 = vmatprep.mubr.msk.f32.mxu1 %vm504_vm1, %v10216_v30  ;;  %v10664_v30 = vld [vmem:[%s13853_s1 + $0x1b8] sm:$0xff]  ;;  %14007 = vst [vmem:[#allocation48_spill] sm:$0xff] %v10754_v37 }
  0x80   : > { %8852 = vmatprep.subr.mxu0 %v7299_v3  ;;  %8915 = vmatpush3.msra.mxu1 %v7340_v15 }
  0x81   : > { %8853 = vmatpush3.msra.mxu0 %v7299_v3  ;;  %8916 = vmatprep.subr.mxu1 %v7339_v16  ;;  %v1155_v3 = vrot.slane %v10405_v21, 2 }
  0x82   : > { %8748 = vmatmul.mubr.msk.f32.gmra.mxu0 %vm504_vm1, %v10648_v27  ;;  %8812 = vmatmul.mubr.msk.f32.gmra.mxu1 %vm504_vm1, %v10219_v31  ;;  %v10687_v31 = vld [vmem:[%s13853_s1 + $0x1f8] sm:$0xff] }
  0x83   : > { %8750 = vmatprep.mubr.msk.f32.mxu0 %vm504_vm1, %v10654_v20  ;;  %8814 = vmatprep.mubr.msk.f32.mxu1 %vm504_vm1, %v10248_v49  ;;  %v10696_v49 = vsel %vm1083_vm2, %v1130_v46, %v1132_v53  ;;  %v10771_v15 = vsel %vm1083_vm2, %v1154_v8, %v1155_v3  ;;  %v10791_v53 = vld [vmem:[%s9993_s12 + $0x180] sm:$0xff] }
  0x84   : > { %8966 = vmatprep.subr.mxu0 %v10664_v30  ;;  %8917 = vmatpush3.msra.mxu1 %v7339_v16  ;;  %14000 = vst [vmem:[#allocation41_spill] sm:$0xff] %v10696_v49  ;;  %14009 = vst [vmem:[#allocation50_spill] sm:$0xff] %v10771_v15  ;;  %v10788_v16 = vsel %vm1083_vm2, %v1159_v44, %v1160_v38  ;;  %v14019_v8 = vld [vmem:[#allocation16_spill] sm:$0xff]  ;;  %v14020_v44 = vld [vmem:[#allocation17_spill] sm:$0xff] }
  0x85   : > { %9030 = vmatprep.subr.mxu1 %v10687_v31  ;;  %14011 = vst [vmem:[#allocation52_spill] sm:$0xff] %v10788_v16 }
  0x86   : > { %8751 = vmatmul.mubr.msk.f32.gmra.mxu0 %vm504_vm1, %v10673_v48  ;;  %8815 = vmatmul.mubr.msk.f32.gmra.mxu1 %vm504_vm1, %v10251_v51  ;;  %v10714_v51 = vsel %vm1083_vm2, %v1135_v47, %v1137_v4  ;;  %v7385_v47 = vld [vmem:[%s13853_s1 + $0x1b0] sm:$0xff]  ;;  %v7424_v4 = vld [vmem:[%s13853_s1 + $0x1e8] sm:$0xff] }
  0x87   : > { %8753 = vmatprep.mubr.msk.f32.mxu0 %vm504_vm1, %v10679_v59  ;;  %8817 = vmatprep.mubr.msk.f32.mxu1 %vm504_vm1, %v10280_v5  ;;  %14002 = vst [vmem:[#allocation43_spill] sm:$0xff] %v10714_v51  ;;  %v1142_v5 = vrot.slane %v10341_v9, 2  ;;  %v10737_v9 = vsel %vm1083_vm2, %v1144_v10, %v1145_v57  ;;  %v7423_v10 = vld [vmem:[%s13853_s1 + $0x1e0] sm:$0xff] }
  0x88   : > { %14005 = vst [vmem:[#allocation46_spill] sm:$0xff] %v10737_v9 }
  0x8a   : > { %8754 = vmatmul.mubr.msk.f32.gmra.mxu0 %vm504_vm1, %v10696_v49  ;;  %8818 = vmatmul.mubr.msk.f32.gmra.mxu1 %vm504_vm1, %v10283_v7  ;;  %v10731_v7 = vsel %vm1083_vm2, %v1140_v0, %v1142_v5  ;;  %v14015_v0 = vld [vmem:[#allocation12_spill] sm:$0xff]  ;;  %v7382_v5 = vld [vmem:[%s13853_s1 + $0x198] sm:$0xff] }
  0x8b   : > { %8756 = vmatprep.mubr.msk.f32.mxu0 %vm504_vm1, %v10702_v56  ;;  %8820 = vmatprep.mubr.msk.f32.mxu1 %vm504_vm1, %v10314_v34  ;;  %14004 = vst [vmem:[#allocation45_spill] sm:$0xff] %v10731_v7  ;;  %v1147_v34 = vrot.slane %v10372_v58, 2  ;;  %v1152_v58 = vrot.slane %v10399_v23, 2  ;;  %v1157_v23 = vrot.slane %v10425_v6, 2  ;;  %v1162_v6 = vrot.slane %v10451_v52, 2  ;;  %v10805_v52 = vld [vmem:[%s9993_s12 + $0x188] sm:$0xff] }
  0x8d   : > { %v10782_v46 = vsel %vm1083_vm2, %v1155_v3, %v1157_v23  ;;  %v10800_v18 = vsel %vm1083_vm2, %v1160_v38, %v1162_v6  ;;  %v7380_v3 = vld [vmem:[%s13853_s1 + $0x188] sm:$0xff]  ;;  %v7421_v23 = vld [vmem:[%s13853_s1 + $0x1d0] sm:$0xff]  ;;  %v7379_v6 = vld [vmem:[%s13853_s1 + $0x180] sm:$0xff] }
  0x8e   : > { %8757 = vmatmul.mubr.msk.f32.gmra.mxu0 %vm504_vm1, %v10714_v51  ;;  %8821 = vmatmul.mubr.msk.f32.gmra.mxu1 %vm504_vm1, %v10317_v39  ;;  %v10748_v39 = vsel %vm1083_vm2, %v1145_v57, %v1147_v34  ;;  %14010 = vst [vmem:[#allocation51_spill] sm:$0xff] %v10782_v46  ;;  %14012 = vst [vmem:[#allocation53_spill] sm:$0xff] %v10800_v18  ;;  %v14016_v57 = vld [vmem:[#allocation13_spill] sm:$0xff]  ;;  %v14017_v34 = vld [vmem:[#allocation14_spill] sm:$0xff] }
  0x8f   : > { %8759 = vmatprep.mubr.msk.f32.mxu0 %vm504_vm1, %v10720_v32  ;;  %8823 = vmatprep.mubr.msk.f32.mxu1 %vm504_vm1, %v10344_v22  ;;  %14006 = vst [vmem:[#allocation47_spill] sm:$0xff] %v10748_v39  ;;  %v14021_v38 = vld [vmem:[#allocation18_spill] sm:$0xff] }
  0x92   : > { %8760 = vmatmul.mubr.msk.f32.gmra.mxu0 %vm504_vm1, %v10731_v7  ;;  %8824 = vmatmul.mubr.msk.f32.gmra.mxu1 %vm504_vm1, %v10347_v19  ;;  %v10765_v19 = vsel %vm1083_vm2, %v1150_v11, %v1152_v58  ;;  %v7422_v11 = vld [vmem:[%s13853_s1 + $0x1d8] sm:$0xff] }
  0x93   : > { %8762 = vmatprep.mubr.msk.f32.mxu0 %vm504_vm1, %v10737_v9  ;;  %8826 = vmatprep.mubr.msk.f32.mxu1 %vm504_vm1, %v10376_v54  ;;  %14008 = vst [vmem:[#allocation49_spill] sm:$0xff] %v10765_v19  ;;  %v14018_v58 = vld [vmem:[#allocation15_spill] sm:$0xff] }
  0x96   : > { %8763 = vmatmul.mubr.msk.f32.gmra.mxu0 %vm504_vm1, %v10748_v39  ;;  %8827 = vmatmul.mubr.msk.f32.gmra.mxu1 %vm504_vm1, %v10379_v25 }
  0x97   : > { %8765 = vmatprep.mubr.msk.f32.mxu0 %vm504_vm1, %v10754_v37  ;;  %8829 = vmatprep.mubr.msk.f32.mxu1 %vm504_vm1, %v10402_v43 }
  0x9a   : > { %8766 = vmatmul.mubr.msk.f32.gmra.mxu0 %vm504_vm1, %v10765_v19  ;;  %8830 = vmatmul.mubr.msk.f32.gmra.mxu1 %vm504_vm1, %v10405_v21 }
  0x9b   : > { %8768 = vmatprep.mubr.msk.f32.mxu0 %vm504_vm1, %v10771_v15  ;;  %8832 = vmatprep.mubr.msk.f32.mxu1 %vm504_vm1, %v10428_v62 }
  0x9e   : > { %8769 = vmatmul.mubr.msk.f32.gmra.mxu0 %vm504_vm1, %v10782_v46  ;;  %8833 = vmatmul.mubr.msk.f32.gmra.mxu1 %vm504_vm1, %v10431_v41 }
  0x9f   : > { %8771 = vmatprep.mubr.msk.f32.mxu0 %vm504_vm1, %v10788_v16  ;;  %8835 = vmatprep.mubr.msk.f32.mxu1 %vm504_vm1, %v10791_v53 }
  0xa2   : > { %8772 = vmatmul.mubr.msk.f32.gmra.mxu0 %vm504_vm1, %v10800_v18  ;;  %8836 = vmatmul.mubr.msk.f32.gmra.mxu1 %vm504_vm1, %v10805_v52 }
  0xa3   : > { %8854 = vmatprep.mubr.msk.f32.mxu0 %vm504_vm1, %v10050_v33  ;;  %8918 = vmatprep.mubr.msk.f32.mxu1 %vm504_vm1, %v10495_v24  ;;  %v7384_v24 = vld [vmem:[%s13853_s1 + $0x1a8] sm:$0xff]  ;;  %v14033_v33 = vld [vmem:[#allocation30_spill] sm:$0xff] }
  0xa6   : > { %8855 = vmatmul.mubr.msk.f32.vlgmr.msra.gmra.mxu0 %vm504_vm1, %v10074_v40  ;;  %8919 = vmatmul.mubr.msk.f32.vlgmr.msra.gmra.mxu1 %vm504_vm1, %v10509_v17  ;;  %v7425_v17 = vld [vmem:[%s13853_s1 + $0x1f0] sm:$0xff]  ;;  %v14034_v40 = vld [vmem:[#allocation31_spill] sm:$0xff] }
  0xa7   : > { %8967 = vmatpush3.msra.mxu0 %v10664_v30  ;;  %8857 = vmatprep.mubr.msk.f32.mxu0 %vm504_vm1, %v10080_v42  ;;  %v14013_v30 = vld [vmem:[#allocation10_spill] sm:$0xff] }
  0xa8   : > { %8921 = vmatprep.mubr.msk.f32.mxu1 %vm504_vm1, %v10515_v61  ;;  %8968 = vmatprep.subr.mxu0 %v7385_v47 }
  0xa9   : > { %8969 = vmatpush3.msra.mxu0 %v7385_v47  ;;  %9031 = vmatpush3.msra.mxu1 %v10687_v31  ;;  %v7383_v31 = vld [vmem:[%s13853_s1 + $0x1a0] sm:$0xff]  ;;  %v7420_v47 = vld [vmem:[%s13853_s1 + $0x1c8] sm:$0xff] }
  0xaa   : > { %8858 = vmatmul.mubr.msk.f32.gmra.mxu0 %vm504_vm1, %v10108_v50  ;;  %8922 = vmatmul.mubr.msk.f32.gmra.mxu1 %vm504_vm1, %v10533_v28 }
  0xab   : > { %8860 = vmatprep.mubr.msk.f32.mxu0 %vm504_vm1, %v14013_v30  ;;  %8924 = vmatprep.mubr.msk.f32.mxu1 %vm504_vm1, %v10539_v60 }
  0xac   : > { %8970 = vmatprep.subr.mxu0 %v7384_v24  ;;  %9032 = vmatprep.subr.mxu1 %v7425_v17 }
  0xad   : > { %8971 = vmatpush3.msra.mxu0 %v7384_v24  ;;  %9033 = vmatpush3.msra.mxu1 %v7425_v17  ;;  %v14022_v24 = vld [vmem:[#allocation19_spill] sm:$0xff]  ;;  %v14023_v17 = vld [vmem:[#allocation20_spill] sm:$0xff] }
  0xae   : > { %8861 = vmatmul.mubr.msk.f32.gmra.mxu0 %vm504_vm1, %v14014_v12  ;;  %8925 = vmatmul.mubr.msk.f32.gmra.mxu1 %vm504_vm1, %v10556_v45 }
  0xaf   : > { %8863 = vmatprep.mubr.msk.f32.mxu0 %vm504_vm1, %v14015_v0  ;;  %8927 = vmatprep.mubr.msk.f32.mxu1 %vm504_vm1, %v10562_v14 }
  0xb0   : > { %8972 = vmatprep.subr.mxu0 %v7383_v31  ;;  %9034 = vmatprep.subr.mxu1 %v7424_v4 }
  0xb1   : > { %8973 = vmatpush3.msra.mxu0 %v7383_v31  ;;  %9035 = vmatpush3.msra.mxu1 %v7424_v4  ;;  %v7419_v31 = vld [vmem:[%s13853_s1 + $0x1c0] sm:$0xff]  ;;  %v10918_v4 = vld [vmem:[%s13853_s1 + $0x238] sm:$0xff] }
  0xb2   : > { %8864 = vmatmul.mubr.msk.f32.gmra.mxu0 %vm504_vm1, %v14016_v57  ;;  %8928 = vmatmul.mubr.msk.f32.gmra.mxu1 %vm504_vm1, %v10579_v55 }
  0xb3   : > { %8866 = vmatprep.mubr.msk.f32.mxu0 %vm504_vm1, %v14017_v34  ;;  %8930 = vmatprep.mubr.msk.f32.mxu1 %vm504_vm1, %v10585_v26 }
  0xb4   : > { %8974 = vmatprep.subr.mxu0 %v7382_v5  ;;  %9036 = vmatprep.subr.mxu1 %v7423_v10 }
  0xb5   : > { %8975 = vmatpush3.msra.mxu0 %v7382_v5  ;;  %9037 = vmatpush3.msra.mxu1 %v7423_v10  ;;  %v14024_v5 = vld [vmem:[#allocation21_spill] sm:$0xff]  ;;  %v14025_v10 = vld [vmem:[#allocation22_spill] sm:$0xff] }
  0xb6   : > { %8867 = vmatmul.mubr.msk.f32.gmra.mxu0 %vm504_vm1, %v14018_v58  ;;  %8931 = vmatmul.mubr.msk.f32.gmra.mxu1 %vm504_vm1, %v10602_v1 }
  0xb7   : > { %8869 = vmatprep.mubr.msk.f32.mxu0 %vm504_vm1, %v14019_v8  ;;  %8933 = vmatprep.mubr.msk.f32.mxu1 %vm504_vm1, %v10608_v36 }
  0xb8   : > { %8976 = vmatprep.subr.mxu0 %v7381_v2  ;;  %9038 = vmatprep.subr.mxu1 %v7422_v11 }
  0xb9   : > { %8977 = vmatpush3.msra.mxu0 %v7381_v2  ;;  %9039 = vmatpush3.msra.mxu1 %v7422_v11  ;;  %v14026_v2 = vld [vmem:[#allocation23_spill] sm:$0xff]  ;;  %v14027_v11 = vld [vmem:[#allocation24_spill] sm:$0xff] }
  0xba   : > { %8870 = vmatmul.mubr.msk.f32.gmra.mxu0 %vm504_vm1, %v14020_v44  ;;  %8934 = vmatmul.mubr.msk.f32.gmra.mxu1 %vm504_vm1, %v10625_v13 }
  0xbb   : > { %8872 = vmatprep.mubr.msk.f32.mxu0 %vm504_vm1, %v14021_v38  ;;  %8936 = vmatprep.mubr.msk.f32.mxu1 %vm504_vm1, %v10631_v29 }
  0xbc   : > { %8978 = vmatprep.subr.mxu0 %v7380_v3  ;;  %9040 = vmatprep.subr.mxu1 %v7421_v23 }
  0xbd   : > { %8979 = vmatpush3.msra.mxu0 %v7380_v3  ;;  %9041 = vmatpush3.msra.mxu1 %v7421_v23  ;;  %v14028_v3 = vld [vmem:[#allocation25_spill] sm:$0xff]  ;;  %v14029_v23 = vld [vmem:[#allocation26_spill] sm:$0xff] }
  0xbe   : > { %8873 = vmatmul.mubr.msk.f32.gmra.mxu0 %vm504_vm1, %v14022_v24  ;;  %8937 = vmatmul.mubr.msk.f32.gmra.mxu1 %vm504_vm1, %v10648_v27 }
  0xbf   : > { %8875 = vmatprep.mubr.msk.f32.mxu0 %vm504_vm1, %v14023_v17  ;;  %8939 = vmatprep.mubr.msk.f32.mxu1 %vm504_vm1, %v10654_v20  ;;  %v14037_v20 = vld [vmem:[#allocation35_spill] sm:$0xff] }
  0xc0   : > { %8980 = vmatprep.subr.mxu0 %v7379_v6  ;;  %9042 = vmatprep.subr.mxu1 %v7420_v47 }
  0xc1   : > { %8981 = vmatpush3.msra.mxu0 %v7379_v6  ;;  %9043 = vmatpush3.msra.mxu1 %v7420_v47  ;;  %v14030_v6 = vld [vmem:[#allocation27_spill] sm:$0xff]  ;;  %v14031_v47 = vld [vmem:[#allocation28_spill] sm:$0xff] }
  0xc2   : > { %8876 = vmatmul.mubr.msk.f32.gmra.mxu0 %vm504_vm1, %v14024_v5  ;;  %8940 = vmatmul.mubr.msk.f32.gmra.mxu1 %vm504_vm1, %v10673_v48 }
  0xc3   : > { %8878 = vmatprep.mubr.msk.f32.mxu0 %vm504_vm1, %v14025_v10  ;;  %8942 = vmatprep.mubr.msk.f32.mxu1 %vm504_vm1, %v10679_v59 }
  0xc4   : > { %9044 = vmatprep.subr.mxu1 %v7419_v31  ;;  %9094 = vmatprep.subr.mxu0 %v10918_v4 }
  0xc5   : > { %9045 = vmatpush3.msra.mxu1 %v7419_v31  ;;  %v14032_v31 = vld [vmem:[#allocation29_spill] sm:$0xff] }
  0xc6   : > { %8879 = vmatmul.mubr.msk.f32.gmra.mxu0 %vm504_vm1, %v14026_v2  ;;  %8943 = vmatmul.mubr.msk.f32.gmra.mxu1 %vm504_vm1, %v10696_v49 }
  0xc7   : > { %8881 = vmatprep.mubr.msk.f32.mxu0 %vm504_vm1, %v14027_v11  ;;  %8945 = vmatprep.mubr.msk.f32.mxu1 %vm504_vm1, %v10702_v56  ;;  %v10983_v56 = vld [vmem:[%s9993_s12 + $0x198] sm:$0xff] }
  0xc8   : > { %v2897_v48 = vrot.slane %v10983_v56, 2 }
  0xca   : > { %8882 = vmatmul.mubr.msk.f32.gmra.mxu0 %vm504_vm1, %v14028_v3  ;;  %8946 = vmatmul.mubr.msk.f32.gmra.mxu1 %vm504_vm1, %v10714_v51  ;;  %v354_v51 = vld [vmem:[%s9993_s12 + $0x190] sm:$0x3] }
  0xcb   : > { %8884 = vmatprep.mubr.msk.f32.mxu0 %vm504_vm1, %v14029_v23  ;;  %8948 = vmatprep.mubr.msk.f32.mxu1 %vm504_vm1, %v10720_v32  ;;  %v2075_v32 = vrot.slane %v10805_v52, 2 }
  0xce   : > { %8885 = vmatmul.mubr.msk.f32.gmra.mxu0 %vm504_vm1, %v14030_v6  ;;  %8949 = vmatmul.mubr.msk.f32.gmra.mxu1 %vm504_vm1, %v10731_v7  ;;  %v2074_v7 = vrot.slane %v10791_v53, 2 }
  0xcf   : > { %8887 = vmatprep.mubr.msk.f32.mxu0 %vm504_vm1, %v14031_v47  ;;  %8951 = vmatprep.mubr.msk.f32.mxu1 %vm504_vm1, %v10737_v9  ;;  %v14035_v9 = vld [vmem:[#allocation32_spill] sm:$0xff] }
  0xd0   : > { %v10989_v59 = vsel %vm1083_vm2, %v2074_v7, %v2075_v32 }
  0xd2   : > { %8888 = vmatmul.mubr.msk.f32.gmra.mxu0 %vm504_vm1, %v14032_v31  ;;  %8952 = vmatmul.mubr.msk.f32.gmra.mxu1 %vm504_vm1, %v10748_v39  ;;  %v1767_v39 = vrot.slane %v10791_v53, 1 }
  0xd3   : > { %8890 = vmatprep.mubr.msk.f32.mxu0 %vm504_vm1, %v14033_v33  ;;  %8954 = vmatprep.mubr.msk.f32.mxu1 %vm504_vm1, %v10754_v37  ;;  %v1768_v37 = vrot.slane %v10805_v52, 1 }
  0xd5   : > { %v10986_v49 = vsel %vm414_vm0, %v1767_v39, %v1768_v37 }
  0xd6   : > { %8891 = vmatmul.mubr.msk.f32.gmra.mxu0 %vm504_vm1, %v14034_v40  ;;  %8955 = vmatmul.mubr.msk.f32.gmra.mxu1 %vm504_vm1, %v10765_v19  ;;  %v2077_v19 = vrot.slane %v354_v51, 2  ;;  %14036 = vst [vmem:[#allocation54_spill] sm:$0xff] %v10986_v49 }
  0xd7   : > { %8893 = vmatprep.mubr.msk.f32.mxu0 %vm504_vm1, %v14035_v9  ;;  %8957 = vmatprep.mubr.msk.f32.mxu1 %vm504_vm1, %v10771_v15  ;;  %v1770_v15 = vrot.slane %v354_v51, 1  ;;  %v11000_v51 = vld [vmem:[%s9993_s12 + $0x1a8] sm:$0x3] }
  0xd8   : > { %v11011_v39 = vsel %vm1083_vm2, %v2075_v32, %v2077_v19  ;;  %v2900_v27 = vrot.slane %v11000_v51, 2 }
  0xd9   : > { %v11006_v7 = vsel %vm414_vm0, %v1768_v37, %v1770_v15  ;;  %v9777_v37 = vld [vmem:[%s9993_s12 + $0x30] sm:$0xff] }
  0xda   : > { %8894 = vmatmul.mubr.msk.f32.gmra.mxu0 %vm504_vm1, %v10462_v35  ;;  %8958 = vmatmul.mubr.msk.f32.gmra.mxu1 %vm504_vm1, %v10782_v46  ;;  %v10993_v46 = vld [vmem:[%s9993_s12 + $0x1a0] sm:$0xff]  ;;  %14038 = vst [vmem:[#allocation55_spill] sm:$0xff] %v11006_v7 }
  0xdb   : > { %8896 = vmatprep.mubr.msk.f32.mxu0 %vm504_vm1, %v10466_v63  ;;  %8960 = vmatprep.mubr.msk.f32.mxu1 %vm504_vm1, %v10788_v16  ;;  %v2898_v16 = vrot.slane %v10993_v46, 2 }
  0xdd   : > { %v11018_v29 = vsel %vm1083_vm2, %v2898_v16, %v2900_v27  ;;  %v9778_v27 = vld [vmem:[%s9993_s12 + $0x38] sm:$0xff] }
  0xde   : > { %8897 = vmatmul.mubr.msk.f32.gmra.mxu0 %vm504_vm1, %v14037_v20  ;;  %8961 = vmatmul.mubr.msk.f32.gmra.mxu1 %vm504_vm1, %v10800_v18  ;;  %v11015_v18 = vsel %vm1083_vm2, %v2897_v48, %v2898_v16  ;;  %14040 = vst [vmem:[#allocation57_spill] sm:$0xff] %v11018_v29  ;;  %v7465_v48 = vld [vmem:[%s13853_s1 + $0x230] sm:$0xff]  ;;  %v9779_v16 = vld [vmem:[%s9993_s12 + $0x48] sm:$0xff] }
  0xdf   : > { %8899 = vmatprep.mubr.msk.f32.mxu0 %vm504_vm1, %v10986_v49  ;;  %8963 = vmatprep.mubr.msk.f32.mxu1 %vm504_vm1, %v10989_v59  ;;  %14039 = vst [vmem:[#allocation56_spill] sm:$0xff] %v11015_v18  ;;  %v9792_v18 = vld [vmem:[%s9993_s12 + $0xe0] sm:$0xff] }
  0xe2   : > { %8900 = vmatmul.mubr.msk.f32.gmra.mxu0 %vm504_vm1, %v11006_v7  ;;  %8964 = vmatmul.mubr.msk.f32.gmra.mxu1 %vm504_vm1, %v11011_v39 }
  0xe3   : > { %8982 = vmatprep.mubr.msk.f32.mxu0 %vm504_vm1, %v9777_v37  ;;  %9046 = vmatprep.mubr.msk.f32.mxu1 %vm504_vm1, %v10080_v42 }
  0xe5   : > { %v8600_v32 = vpop.f32.mrf.mxu0 }
  0xe6   : > { %v8664_v19 = vpop.f32.mrf.mxu1  ;;  %8983 = vmatmul.mubr.msk.f32.vlgmr.msra.gmra.mxu0 %vm504_vm1, %v9778_v27  ;;  %9047 = vmatmul.mubr.msk.f32.vlgmr.msra.gmra.mxu1 %vm504_vm1, %v10108_v50 }
  0xe7   : > { %v11035_v15 = vadd.f32 %v8664_v19, %v8600_v32  ;;  %9095 = vmatpush3.msra.mxu0 %v10918_v4  ;;  %8985 = vmatprep.mubr.msk.f32.mxu0 %vm504_vm1, %v9779_v16  ;;  %v635_v37 = vpop.f32.mrf.mxu0  ;;  %v7464_v32 = vld [vmem:[%s13853_s1 + $0x228] sm:$0xff]  ;;  %v9780_v4 = vld [vmem:[%s9993_s12 + $0x50] sm:$0xff] }
  0xe8   : > { %v924_v42 = vpop.f32.mrf.mxu1  ;;  %9049 = vmatprep.mubr.msk.f32.mxu1 %vm504_vm1, %v14013_v30  ;;  %9096 = vmatprep.subr.mxu0 %v7465_v48  ;;  %v9781_v30 = vld [vmem:[%s9993_s12 + $0x60] sm:$0xff] }
  0xe9   : > { %v11042_v29 = vadd.f32 %v924_v42, %v635_v37  ;;  %9097 = vmatpush3.msra.mxu0 %v7465_v48  ;;  %v8603_v19 = vpop.f32.mrf.mxu0 }
  0xea   : > { %v8667_v27 = vpop.f32.mrf.mxu1  ;;  %8986 = vmatmul.mubr.msk.f32.gmra.mxu0 %vm504_vm1, %v9780_v4  ;;  %9050 = vmatmul.mubr.msk.f32.gmra.mxu1 %vm504_vm1, %v14014_v12  ;;  %v7463_v4 = vld [vmem:[%s13853_s1 + $0x220] sm:$0xff] }
  0xeb   : > { %v11051_v16 = vadd.f32 %v8667_v27, %v8603_v19  ;;  %8988 = vmatprep.mubr.msk.f32.mxu0 %vm504_vm1, %v9781_v30  ;;  %9052 = vmatprep.mubr.msk.f32.mxu1 %vm504_vm1, %v14015_v0  ;;  %v645_v42 = vpop.f32.mrf.mxu0  ;;  %v9782_v27 = vld [vmem:[%s9993_s12 + $0x68] sm:$0xff]  ;;  %v9783_v0 = vld [vmem:[%s9993_s12 + $0x78] sm:$0xff] }
  0xec   : > { %v934_v48 = vpop.f32.mrf.mxu1  ;;  %9098 = vmatprep.subr.mxu0 %v7464_v32 }
  0xed   : > { %v11057_v37 = vadd.f32 %v934_v48, %v645_v42  ;;  %9099 = vmatpush3.msra.mxu0 %v7464_v32  ;;  %v8606_v12 = vpop.f32.mrf.mxu0 }
  0xee   : > { %v8670_v19 = vpop.f32.mrf.mxu1  ;;  %8989 = vmatmul.mubr.msk.f32.gmra.mxu0 %vm504_vm1, %v9782_v27  ;;  %9053 = vmatmul.mubr.msk.f32.gmra.mxu1 %vm504_vm1, %v14016_v57  ;;  %v7462_v27 = vld [vmem:[%s13853_s1 + $0x218] sm:$0xff] }
  0xef   : > { %v11066_v30 = vadd.f32 %v8670_v19, %v8606_v12  ;;  %8991 = vmatprep.mubr.msk.f32.mxu0 %vm504_vm1, %v9783_v0  ;;  %9055 = vmatprep.mubr.msk.f32.mxu1 %vm504_vm1, %v14017_v34  ;;  %v655_v32 = vpop.f32.mrf.mxu0  ;;  %v9784_v19 = vld [vmem:[%s9993_s12 + $0x80] sm:$0xff]  ;;  %v9785_v34 = vld [vmem:[%s9993_s12 + $0x90] sm:$0xff] }
  0xf0   : > { %v944_v42 = vpop.f32.mrf.mxu1  ;;  %9100 = vmatprep.subr.mxu0 %v7463_v4 }
  0xf1   : > { %v11072_v48 = vadd.f32 %v944_v42, %v655_v32  ;;  %9101 = vmatpush3.msra.mxu0 %v7463_v4  ;;  %v8609_v57 = vpop.f32.mrf.mxu0 }
  0xf2   : > { %v8673_v12 = vpop.f32.mrf.mxu1  ;;  %8992 = vmatmul.mubr.msk.f32.gmra.mxu0 %vm504_vm1, %v9784_v19  ;;  %9056 = vmatmul.mubr.msk.f32.gmra.mxu1 %vm504_vm1, %v14018_v58  ;;  %v7461_v19 = vld [vmem:[%s13853_s1 + $0x210] sm:$0xff] }
  0xf3   : > { %v11081_v0 = vadd.f32 %v8673_v12, %v8609_v57  ;;  %8994 = vmatprep.mubr.msk.f32.mxu0 %vm504_vm1, %v9785_v34  ;;  %9058 = vmatprep.mubr.msk.f32.mxu1 %vm504_vm1, %v14019_v8  ;;  %v665_v4 = vpop.f32.mrf.mxu0  ;;  %v9786_v12 = vld [vmem:[%s9993_s12 + $0x98] sm:$0xff]  ;;  %v9787_v8 = vld [vmem:[%s9993_s12 + $0xa8] sm:$0xff] }
  0xf4   : > { %v954_v32 = vpop.f32.mrf.mxu1  ;;  %9102 = vmatprep.subr.mxu0 %v7462_v27 }
  0xf5   : > { %v11087_v42 = vadd.f32 %v954_v32, %v665_v4  ;;  %9103 = vmatpush3.msra.mxu0 %v7462_v27  ;;  %v8612_v58 = vpop.f32.mrf.mxu0 }
  0xf6   : > { %v8676_v57 = vpop.f32.mrf.mxu1  ;;  %8995 = vmatmul.mubr.msk.f32.gmra.mxu0 %vm504_vm1, %v9786_v12  ;;  %9059 = vmatmul.mubr.msk.f32.gmra.mxu1 %vm504_vm1, %v14020_v44  ;;  %v7460_v12 = vld [vmem:[%s13853_s1 + $0x208] sm:$0xff] }
  0xf7   : > { %v11096_v34 = vadd.f32 %v8676_v57, %v8612_v58  ;;  %8997 = vmatprep.mubr.msk.f32.mxu0 %vm504_vm1, %v9787_v8  ;;  %9061 = vmatprep.mubr.msk.f32.mxu1 %vm504_vm1, %v14021_v38  ;;  %v675_v27 = vpop.f32.mrf.mxu0  ;;  %v9788_v57 = vld [vmem:[%s9993_s12 + $0xb0] sm:$0xff]  ;;  %v9789_v38 = vld [vmem:[%s9993_s12 + $0xc0] sm:$0xff] }
  0xf8   : > { %v964_v4 = vpop.f32.mrf.mxu1  ;;  %9104 = vmatprep.subr.mxu0 %v7461_v19 }
  0xf9   : > { %v11102_v32 = vadd.f32 %v964_v4, %v675_v27  ;;  %9105 = vmatpush3.msra.mxu0 %v7461_v19  ;;  %v8615_v44 = vpop.f32.mrf.mxu0 }
  0xfa   : > { %v8679_v58 = vpop.f32.mrf.mxu1  ;;  %8998 = vmatmul.mubr.msk.f32.gmra.mxu0 %vm504_vm1, %v9788_v57  ;;  %9062 = vmatmul.mubr.msk.f32.gmra.mxu1 %vm504_vm1, %v14022_v24  ;;  %v7459_v57 = vld [vmem:[%s13853_s1 + $0x200] sm:$0xff] }
  0xfb   : > { %v11111_v8 = vadd.f32 %v8679_v58, %v8615_v44  ;;  %9000 = vmatprep.mubr.msk.f32.mxu0 %vm504_vm1, %v9789_v38  ;;  %9064 = vmatprep.mubr.msk.f32.mxu1 %vm504_vm1, %v14023_v17  ;;  %v685_v19 = vpop.f32.mrf.mxu0  ;;  %v9790_v58 = vld [vmem:[%s9993_s12 + $0xc8] sm:$0xff]  ;;  %v9791_v17 = vld [vmem:[%s9993_s12 + $0xd8] sm:$0xff] }
  0xfc   : > { %v974_v27 = vpop.f32.mrf.mxu1  ;;  %9106 = vmatprep.subr.mxu0 %v7460_v12 }
  0xfd   : > { %v11117_v4 = vadd.f32 %v974_v27, %v685_v19  ;;  %9107 = vmatpush3.msra.mxu0 %v7460_v12  ;;  %v8618_v24 = vpop.f32.mrf.mxu0 }
  0xfe   : > { %v8682_v44 = vpop.f32.mrf.mxu1  ;;  %9001 = vmatmul.mubr.msk.f32.gmra.mxu0 %vm504_vm1, %v9790_v58  ;;  %9065 = vmatmul.mubr.msk.f32.gmra.mxu1 %vm504_vm1, %v14024_v5  ;;  %v9794_v5 = vld [vmem:[%s9993_s12 + $0xf8] sm:$0xff] }
  0xff   : > { %v11126_v38 = vadd.f32 %v8682_v44, %v8618_v24  ;;  %9003 = vmatprep.mubr.msk.f32.mxu0 %vm504_vm1, %v9791_v17  ;;  %9067 = vmatprep.mubr.msk.f32.mxu1 %vm504_vm1, %v14025_v10  ;;  %v695_v12 = vpop.f32.mrf.mxu0  ;;  %v9793_v17 = vld [vmem:[%s9993_s12 + $0xf0] sm:$0xff] }
 0x100   : > { %v984_v19 = vpop.f32.mrf.mxu1  ;;  %9108 = vmatprep.subr.mxu0 %v7459_v57 }
 0x101   : > { %v11132_v27 = vadd.f32 %v984_v19, %v695_v12  ;;  %9109 = vmatpush3.msra.mxu0 %v7459_v57  ;;  %v8621_v58 = vpop.f32.mrf.mxu0 }
 0x102   : > { %v8685_v50 = vpop.f32.mrf.mxu1  ;;  %9004 = vmatmul.mubr.msk.f32.gmra.mxu0 %vm504_vm1, %v9792_v18  ;;  %9068 = vmatmul.mubr.msk.f32.gmra.mxu1 %vm504_vm1, %v14026_v2  ;;  %v9795_v18 = vld [vmem:[%s9993_s12 + $0x108] sm:$0xff] }
 0x103   : > { %v11138_v24 = vadd.f32 %v8685_v50, %v8621_v58  ;;  %9006 = vmatprep.mubr.msk.f32.mxu0 %vm504_vm1, %v9793_v17  ;;  %9070 = vmatprep.mubr.msk.f32.mxu1 %vm504_vm1, %v14027_v11  ;;  %v705_v44 = vpop.f32.mrf.mxu0  ;;  %v9796_v11 = vld [vmem:[%s9993_s12 + $0x110] sm:$0xff] }
 0x104   : > { %v994_v57 = vpop.f32.mrf.mxu1 }
 0x105   : > { %v11144_v12 = vadd.f32 %v994_v57, %v705_v44  ;;  %v8624_v19 = vpop.f32.mrf.mxu0 }
 0x106   : > { %v8688_v10 = vpop.f32.mrf.mxu1  ;;  %9007 = vmatmul.mubr.msk.f32.gmra.mxu0 %vm504_vm1, %v9794_v5  ;;  %9071 = vmatmul.mubr.msk.f32.gmra.mxu1 %vm504_vm1, %v14028_v3  ;;  %v9797_v3 = vld [vmem:[%s9993_s12 + $0x128] sm:$0xff] }
 0x107   : > { %v11150_v50 = vadd.f32 %v8688_v10, %v8624_v19  ;;  %9009 = vmatprep.mubr.msk.f32.mxu0 %vm504_vm1, %v9795_v18  ;;  %9073 = vmatprep.mubr.msk.f32.mxu1 %vm504_vm1, %v14029_v23  ;;  %v11156_v58 = vpop.f32.mrf.mxu0 }
 0x108   : > { %v11158_v17 = vpop.f32.mrf.mxu1 }
 0x109   : > { %v8627_v44 = vpop.f32.mrf.mxu0 }
 0x10a   : > { %v8691_v57 = vpop.f32.mrf.mxu1  ;;  %9010 = vmatmul.mubr.msk.f32.gmra.mxu0 %vm504_vm1, %v9796_v11  ;;  %9074 = vmatmul.mubr.msk.f32.gmra.mxu1 %vm504_vm1, %v14030_v6 }
 0x10b   : > { %v11164_v5 = vadd.f32 %v8691_v57, %v8627_v44  ;;  %9012 = vmatprep.mubr.msk.f32.mxu0 %vm504_vm1, %v10344_v22  ;;  %9076 = vmatprep.mubr.msk.f32.mxu1 %vm504_vm1, %v14031_v47  ;;  %v11170_v10 = vpop.f32.mrf.mxu0 }
 0x10c   : > { %v11172_v19 = vpop.f32.mrf.mxu1 }
 0x10d   : > { %v8630_v18 = vpop.f32.mrf.mxu0 }
 0x10e   : > { %v8694_v23 = vpop.f32.mrf.mxu1  ;;  %9013 = vmatmul.mubr.msk.f32.gmra.mxu0 %vm504_vm1, %v9797_v3  ;;  %9077 = vmatmul.mubr.msk.f32.gmra.mxu1 %vm504_vm1, %v14032_v31 }
 0x10f   : > { %v11178_v11 = vadd.f32 %v8694_v23, %v8630_v18  ;;  %9015 = vmatprep.mubr.msk.f32.mxu0 %vm504_vm1, %v10376_v54  ;;  %9079 = vmatprep.mubr.msk.f32.mxu1 %vm504_vm1, %v14033_v33  ;;  %v11184_v22 = vpop.f32.mrf.mxu0 }
 0x110   : > { %v11186_v44 = vpop.f32.mrf.mxu1 }
 0x111   : > { %v8633_v57 = vpop.f32.mrf.mxu0 }
 0x112   : > { %v8697_v47 = vpop.f32.mrf.mxu1  ;;  %9016 = vmatmul.mubr.msk.f32.gmra.mxu0 %vm504_vm1, %v10379_v25  ;;  %9080 = vmatmul.mubr.msk.f32.gmra.mxu1 %vm504_vm1, %v14034_v40 }
 0x113   : > { %v11192_v3 = vadd.f32 %v8697_v47, %v8633_v57  ;;  %9018 = vmatprep.mubr.msk.f32.mxu0 %vm504_vm1, %v10402_v43  ;;  %9082 = vmatprep.mubr.msk.f32.mxu1 %vm504_vm1, %v14035_v9  ;;  %v11198_v54 = vpop.f32.mrf.mxu0  ;;  %v2622_v57 = vrot.slane %v10983_v56, 1  ;;  %v2623_v9 = vrot.slane %v10993_v46, 1 }
 0x114   : > { %v11200_v23 = vpop.f32.mrf.mxu1 }
 0x115   : > { %v8636_v18 = vpop.f32.mrf.mxu0 }
 0x116   : > { %v8700_v33 = vpop.f32.mrf.mxu1  ;;  %9019 = vmatmul.mubr.msk.f32.gmra.mxu0 %vm504_vm1, %v10405_v21  ;;  %9083 = vmatmul.mubr.msk.f32.gmra.mxu1 %vm504_vm1, %v10462_v35  ;;  %v2624_v35 = vsel %vm414_vm0, %v2622_v57, %v2623_v9 }
 0x117   : > { %v11206_v25 = vadd.f32 %v8700_v33, %v8636_v18  ;;  %9021 = vmatprep.mubr.msk.f32.mxu0 %vm504_vm1, %v10428_v62  ;;  %9085 = vmatprep.mubr.msk.f32.mxu1 %vm504_vm1, %v10466_v63  ;;  %v11212_v43 = vpop.f32.mrf.mxu0  ;;  %v2625_v62 = vrot.slane %v11000_v51, 1 }
 0x118   : > { %v11214_v47 = vpop.f32.mrf.mxu1 }
 0x119   : > { %v8639_v21 = vpop.f32.mrf.mxu0 }
 0x11a   : > { %v8703_v40 = vpop.f32.mrf.mxu1  ;;  %9022 = vmatmul.mubr.msk.f32.gmra.mxu0 %vm504_vm1, %v10431_v41  ;;  %9086 = vmatmul.mubr.msk.f32.gmra.mxu1 %vm504_vm1, %v14037_v20 }
 0x11b   : > { %v11222_v33 = vadd.f32 %v8703_v40, %v8639_v21  ;;  %9024 = vmatprep.mubr.msk.f32.mxu0 %vm504_vm1, %v10791_v53  ;;  %9088 = vmatprep.mubr.msk.f32.mxu1 %vm504_vm1, %v10986_v49  ;;  %v11229_v18 = vpop.f32.mrf.mxu0  ;;  %v2626_v53 = vsel %vm414_vm0, %v2623_v9, %v2625_v62 }
 0x11c   : > { %v11231_v63 = vpop.f32.mrf.mxu1 }
 0x11d   : > { %v8642_v41 = vpop.f32.mrf.mxu0 }
 0x11e   : > { %v8706_v31 = vpop.f32.mrf.mxu1  ;;  %9025 = vmatmul.mubr.msk.f32.gmra.mxu0 %vm504_vm1, %v10805_v52  ;;  %9089 = vmatmul.mubr.msk.f32.gmra.mxu1 %vm504_vm1, %v11006_v7 }
 0x11f   : > { %v11238_v40 = vadd.f32 %v8706_v31, %v8642_v41  ;;  %9027 = vmatprep.mubr.msk.f32.mxu0 %vm504_vm1, %v10983_v56  ;;  %9091 = vmatprep.mubr.msk.f32.mxu1 %vm504_vm1, %v2624_v35  ;;  %v11244_v51 = vpop.f32.mrf.mxu0 }
 0x120   : > { %v11246_v57 = vpop.f32.mrf.mxu1 }
 0x121   : > { %v8645_v21 = vpop.f32.mrf.mxu0 }
 0x122   : > { %v8709_v49 = vpop.f32.mrf.mxu1  ;;  %9028 = vmatmul.mubr.msk.f32.gmra.mxu0 %vm504_vm1, %v10993_v46  ;;  %9092 = vmatmul.mubr.msk.f32.gmra.mxu1 %vm504_vm1, %v2626_v53 }
 0x123   : > { %v11251_v52 = vadd.f32 %v8709_v49, %v8645_v21  ;;  %9110 = vmatprep.mubr.msk.f32.mxu0 %vm504_vm1, %v10515_v61  ;;  %v11255_v56 = vpop.f32.mrf.mxu0 }
 0x124   : > { %v11257_v35 = vpop.f32.mrf.mxu1 }
 0x125   : > { %v8728_v9 = vpop.f32.mrf.mxu0 }
 0x126   : > { %9111 = vmatmul.mubr.msk.f32.vlgmr.msra.gmra.mxu0 %vm504_vm1, %v10533_v28  ;;  %v8792_v31 = vpop.f32.mrf.mxu1  ;;  %v1463_v62 = vadd.f32 %v8728_v9, %v11035_v15 }
 0x127   : > { %9113 = vmatprep.mubr.msk.f32.mxu0 %vm504_vm1, %v10539_v60  ;;  %v1303_v46 = vpop.f32.mrf.mxu0 }
 0x128   : > { %v11264_v49 = vpop.f32.mrf.mxu1  ;;  %v11267_v41 = vadd.f32 %v1303_v46, %v11042_v29  ;;  %v11269_v61 = vadd.f32 %v8792_v31, %v1463_v62 }
 0x12a   : > { %v8731_v53 = vpop.f32.mrf.mxu0  ;;  %9114 = vmatmul.mubr.msk.f32.gmra.mxu0 %vm504_vm1, %v10556_v45  ;;  %v8795_v21 = vpop.f32.mrf.mxu1 }
 0x12b   : > { %v1465_v28 = vadd.f32 %v8731_v53, %v11051_v16  ;;  %9116 = vmatprep.mubr.msk.f32.mxu0 %vm504_vm1, %v10562_v14 }
 0x12c   : > { %v1313_v15 = vpop.f32.mrf.mxu0  ;;  %v11276_v60 = vpop.f32.mrf.mxu1 }
 0x12d   : > { %v11279_v9 = vadd.f32 %v1313_v15, %v11057_v37  ;;  %v11281_v29 = vadd.f32 %v8795_v21, %v1465_v28 }
 0x12e   : > { %v8734_v31 = vpop.f32.mrf.mxu0  ;;  %9117 = vmatmul.mubr.msk.f32.gmra.mxu0 %vm504_vm1, %v10579_v55  ;;  %v8798_v62 = vpop.f32.mrf.mxu1 }
 0x12f   : > { %v1467_v45 = vadd.f32 %v8734_v31, %v11066_v30  ;;  %9119 = vmatprep.mubr.msk.f32.mxu0 %vm504_vm1, %v10585_v26 }
 0x130   : > { %v1323_v16 = vpop.f32.mrf.mxu0  ;;  %v11288_v14 = vpop.f32.mrf.mxu1 }
 0x131   : > { %v11291_v46 = vadd.f32 %v1323_v16, %v11072_v48  ;;  %v11293_v37 = vadd.f32 %v8798_v62, %v1467_v45  ;;  %v14041_v62 = vld [vmem:[#allocation36_spill] sm:$0xff] }
 0x132   : > { %v8737_v53 = vpop.f32.mrf.mxu0  ;;  %9120 = vmatmul.mubr.msk.f32.gmra.mxu0 %vm504_vm1, %v10602_v1  ;;  %v8801_v21 = vpop.f32.mrf.mxu1 }
 0x133   : > { %v1469_v55 = vadd.f32 %v8737_v53, %v11081_v0  ;;  %9122 = vmatprep.mubr.msk.f32.mxu0 %vm504_vm1, %v10608_v36  ;;  %v7509_v36 = vld [vmem:[%s13854_s2 + $0x78] sm:$0xff]  ;;  %v14042_v53 = vld [vmem:[#allocation37_spill] sm:$0xff] }
 0x134   : > { %v1333_v30 = vpop.f32.mrf.mxu0  ;;  %v11300_v26 = vpop.f32.mrf.mxu1  ;;  %9158 = vmatprep.subr.mxu1 %v7509_v36 }
 0x135   : > { %v11303_v28 = vadd.f32 %v1333_v30, %v11087_v42  ;;  %v11305_v48 = vadd.f32 %v8801_v21, %v1469_v55  ;;  %9159 = vmatpush3.msra.mxu1 %v7509_v36  ;;  %v14043_v55 = vld [vmem:[#allocation38_spill] sm:$0xff] }
 0x136   : > { %v8740_v15 = vpop.f32.mrf.mxu0  ;;  %9123 = vmatmul.mubr.msk.f32.gmra.mxu0 %vm504_vm1, %v10625_v13  ;;  %v8804_v31 = vpop.f32.mrf.mxu1 }
 0x137   : > { %v1471_v1 = vadd.f32 %v8740_v15, %v11096_v34  ;;  %9125 = vmatprep.mubr.msk.f32.mxu0 %vm504_vm1, %v14041_v62 }
 0x138   : > { %v1343_v0 = vpop.f32.mrf.mxu0  ;;  %v11315_v45 = vpop.f32.mrf.mxu1 }
 0x139   : > { %v11318_v42 = vadd.f32 %v1343_v0, %v11102_v32  ;;  %v11320_v16 = vadd.f32 %v8804_v31, %v1471_v1  ;;  %v14044_v1 = vld [vmem:[#allocation39_spill] sm:$0xff] }
 0x13a   : > { %v8743_v13 = vpop.f32.mrf.mxu0  ;;  %9126 = vmatmul.mubr.msk.f32.gmra.mxu0 %vm504_vm1, %v14042_v53  ;;  %v8807_v34 = vpop.f32.mrf.mxu1  ;;  %v14045_v53 = vld [vmem:[#allocation40_spill] sm:$0xff] }
 0x13b   : > { %v1473_v21 = vadd.f32 %v8743_v13, %v11111_v8  ;;  %9128 = vmatprep.mubr.msk.f32.mxu0 %vm504_vm1, %v14043_v55  ;;  %v7508_v8 = vld [vmem:[%s13854_s2 + $0x70] sm:$0xff] }
 0x13c   : > { %v1353_v30 = vpop.f32.mrf.mxu0  ;;  %v11327_v15 = vpop.f32.mrf.mxu1  ;;  %9160 = vmatprep.subr.mxu1 %v7508_v8 }
 0x13d   : > { %v11330_v62 = vadd.f32 %v1353_v30, %v11117_v4  ;;  %v11332_v32 = vadd.f32 %v8807_v34, %v1473_v21  ;;  %9161 = vmatpush3.msra.mxu1 %v7508_v8  ;;  %v14046_v30 = vld [vmem:[#allocation41_spill] sm:$0xff] }
 0x13e   : > { %v8746_v31 = vpop.f32.mrf.mxu0  ;;  %9129 = vmatmul.mubr.msk.f32.gmra.mxu0 %vm504_vm1, %v14044_v1  ;;  %v8810_v36 = vpop.f32.mrf.mxu1  ;;  %v14047_v1 = vld [vmem:[#allocation42_spill] sm:$0xff] }
 0x13f   : > { %v1475_v0 = vadd.f32 %v8746_v31, %v11126_v38  ;;  %9131 = vmatprep.mubr.msk.f32.mxu0 %vm504_vm1, %v14045_v53 }
 0x140   : > { %v1363_v13 = vpop.f32.mrf.mxu0  ;;  %v11342_v55 = vpop.f32.mrf.mxu1 }
 0x141   : > { %v11345_v4 = vadd.f32 %v1363_v13, %v11132_v27  ;;  %v11347_v34 = vadd.f32 %v8810_v36, %v1475_v0  ;;  %v14048_v0 = vld [vmem:[#allocation43_spill] sm:$0xff]  ;;  %v1005_v13 = vadd.f32 %v11158_v17, %v11156_v58  ;;  %v14051_v58 = vld [vmem:[#allocation45_spill] sm:$0xff] }
 0x142   : > { %v8749_v21 = vpop.f32.mrf.mxu0  ;;  %9132 = vmatmul.mubr.msk.f32.gmra.mxu0 %vm504_vm1, %v14046_v30  ;;  %v8813_v38 = vpop.f32.mrf.mxu1 }
 0x143   : > { %v1477_v31 = vadd.f32 %v8749_v21, %v11138_v24  ;;  %9134 = vmatprep.mubr.msk.f32.mxu0 %vm504_vm1, %v14047_v1  ;;  %v14049_v21 = vld [vmem:[#allocation44_spill] sm:$0xff] }
 0x144   : > { %v1373_v53 = vpop.f32.mrf.mxu0  ;;  %v11354_v7 = vpop.f32.mrf.mxu1 }
 0x145   : > { %v11357_v20 = vadd.f32 %v1373_v53, %v11144_v12  ;;  %v11359_v27 = vadd.f32 %v8813_v38, %v1477_v31  ;;  %v7507_v12 = vld [vmem:[%s13854_s2 + $0x68] sm:$0xff] }
 0x146   : > { %v8752_v36 = vpop.f32.mrf.mxu0  ;;  %9135 = vmatmul.mubr.msk.f32.gmra.mxu0 %vm504_vm1, %v14048_v0  ;;  %v8816_v8 = vpop.f32.mrf.mxu1  ;;  %9162 = vmatprep.subr.mxu1 %v7507_v12 }
 0x147   : > { %v1479_v24 = vadd.f32 %v8752_v36, %v11150_v50  ;;  %9137 = vmatprep.mubr.msk.f32.mxu0 %vm504_vm1, %v14049_v21  ;;  %9163 = vmatpush3.msra.mxu1 %v7507_v12  ;;  %v14052_v36 = vld [vmem:[#allocation46_spill] sm:$0xff] }
 0x148   : > { %v1383_v30 = vpop.f32.mrf.mxu0  ;;  %v11371_v38 = vpop.f32.mrf.mxu1 }
 0x149   : > { %14050 = vst [vmem:[#allocation36_spill] sm:$0xff] %v11371_v38  ;;  %v11373_v31 = vadd.f32 %v1383_v30, %v1005_v13  ;;  %v11375_v1 = vadd.f32 %v8816_v8, %v1479_v24  ;;  %v14054_v8 = vld [vmem:[#allocation47_spill] sm:$0xff]  ;;  %v14055_v30 = vld [vmem:[#allocation48_spill] sm:$0xff] }
 0x14a   : > { %v8755_v53 = vpop.f32.mrf.mxu0  ;;  %9138 = vmatmul.mubr.msk.f32.gmra.mxu0 %vm504_vm1, %v14051_v58  ;;  %v8819_v50 = vpop.f32.mrf.mxu1 }
 0x14b   : > { %v1481_v17 = vadd.f32 %v8755_v53, %v11164_v5  ;;  %9140 = vmatprep.mubr.msk.f32.mxu0 %vm504_vm1, %v14052_v36  ;;  %v7506_v5 = vld [vmem:[%s13854_s2 + $0x60] sm:$0xff]  ;;  %v14057_v36 = vld [vmem:[#allocation49_spill] sm:$0xff] }
 0x14c   : > { %v11382_v0 = vpop.f32.mrf.mxu0  ;;  %v11384_v21 = vpop.f32.mrf.mxu1  ;;  %9164 = vmatprep.subr.mxu1 %v7506_v5 }
 0x14d   : > { %14053 = vst [vmem:[#allocation37_spill] sm:$0xff] %v11384_v21  ;;  %v11386_v6 = vadd.f32 %v8819_v50, %v1481_v17  ;;  %9165 = vmatpush3.msra.mxu1 %v7506_v5 }
 0x14e   : > { %v8758_v13 = vpop.f32.mrf.mxu0  ;;  %9141 = vmatmul.mubr.msk.f32.gmra.mxu0 %vm504_vm1, %v14054_v8  ;;  %v8822_v24 = vpop.f32.mrf.mxu1  ;;  %v14058_v8 = vld [vmem:[#allocation50_spill] sm:$0xff] }
 0x14f   : > { %v1483_v12 = vadd.f32 %v8758_v13, %v11178_v11  ;;  %9143 = vmatprep.mubr.msk.f32.mxu0 %vm504_vm1, %v14055_v30 }
 0x150   : > { %v11396_v53 = vpop.f32.mrf.mxu0  ;;  %v11398_v58 = vpop.f32.mrf.mxu1 }
 0x151   : > { %14056 = vst [vmem:[#allocation38_spill] sm:$0xff] %v11398_v58  ;;  %v11400_v50 = vadd.f32 %v8822_v24, %v1483_v12  ;;  %v14060_v24 = vld [vmem:[#allocation51_spill] sm:$0xff] }
 0x152   : > { %v8761_v17 = vpop.f32.mrf.mxu0  ;;  %9144 = vmatmul.mubr.msk.f32.gmra.mxu0 %vm504_vm1, %v14057_v36  ;;  %v8825_v11 = vpop.f32.mrf.mxu1  ;;  %v14061_v36 = vld [vmem:[#allocation52_spill] sm:$0xff] }
 0x153   : > { %v1485_v13 = vadd.f32 %v8761_v17, %v11192_v3  ;;  %9146 = vmatprep.mubr.msk.f32.mxu0 %vm504_vm1, %v14058_v8  ;;  %v7505_v3 = vld [vmem:[%s13854_s2 + $0x58] sm:$0xff] }
 0x154   : > { %v11407_v30 = vpop.f32.mrf.mxu0  ;;  %v11409_v2 = vpop.f32.mrf.mxu1  ;;  %9166 = vmatprep.subr.mxu1 %v7505_v3 }
 0x155   : > { %14059 = vst [vmem:[#allocation39_spill] sm:$0xff] %v11409_v2  ;;  %v11411_v21 = vadd.f32 %v8825_v11, %v1485_v13  ;;  %9167 = vmatpush3.msra.mxu1 %v7505_v3  ;;  %v14065_v3 = vld [vmem:[#allocation56_spill] sm:$0xff] }
 0x156   : > { %v8764_v58 = vpop.f32.mrf.mxu0  ;;  %9147 = vmatmul.mubr.msk.f32.gmra.mxu0 %vm504_vm1, %v14060_v24  ;;  %v8828_v12 = vpop.f32.mrf.mxu1  ;;  %v14063_v24 = vld [vmem:[#allocation53_spill] sm:$0xff] }
 0x157   : > { %v1487_v5 = vadd.f32 %v8764_v58, %v11206_v25  ;;  %9149 = vmatprep.mubr.msk.f32.mxu0 %vm504_vm1, %v14061_v36 }
 0x158   : > { %v11421_v17 = vpop.f32.mrf.mxu0  ;;  %v11423_v8 = vpop.f32.mrf.mxu1 }
 0x159   : > { %14062 = vst [vmem:[#allocation40_spill] sm:$0xff] %v11423_v8  ;;  %v11425_v11 = vadd.f32 %v8828_v12, %v1487_v5 }
 0x15a   : > { %v8767_v13 = vpop.f32.mrf.mxu0  ;;  %9150 = vmatmul.mubr.msk.f32.gmra.mxu0 %vm504_vm1, %v14063_v24  ;;  %v8831_v25 = vpop.f32.mrf.mxu1 }
 0x15b   : > { %v1489_v58 = vadd.f32 %v8767_v13, %v11222_v33  ;;  %9152 = vmatprep.mubr.msk.f32.mxu0 %vm504_vm1, %v10989_v59  ;;  %v7504_v59 = vld [vmem:[%s13854_s2 + $0x50] sm:$0xff] }
 0x15c   : > { %v11432_v36 = vpop.f32.mrf.mxu0  ;;  %v11434_v2 = vpop.f32.mrf.mxu1  ;;  %9168 = vmatprep.subr.mxu1 %v7504_v59 }
 0x15d   : > { %14064 = vst [vmem:[#allocation41_spill] sm:$0xff] %v11434_v2  ;;  %v11436_v38 = vadd.f32 %v8831_v25, %v1489_v58  ;;  %9169 = vmatpush3.msra.mxu1 %v7504_v59  ;;  %v3480_v2 = vld [vmem:[%s13854_s2 + $0x38] sm:$0xff]  ;;  %v3479_v59 = vld [vmem:[%s13854_s2 + $0x30] sm:$0xff] }
 0x15e   : > { %v8770_v8 = vpop.f32.mrf.mxu0  ;;  %9153 = vmatmul.mubr.msk.f32.gmra.mxu0 %vm504_vm1, %v11011_v39  ;;  %v8834_v12 = vpop.f32.mrf.mxu1  ;;  %v14067_v39 = vld [vmem:[#allocation57_spill] sm:$0xff]  ;;  %9222 = vmatprep.subr.mxu0 %v3480_v2 }
 0x15f   : > { %v1491_v5 = vadd.f32 %v8770_v8, %v11238_v40  ;;  %9155 = vmatprep.mubr.msk.f32.mxu0 %vm504_vm1, %v14065_v3  ;;  %9223 = vmatpush3.msra.mxu0 %v3480_v2 }
 0x160   : > { %v11446_v33 = vpop.f32.mrf.mxu0  ;;  %v11448_v13 = vpop.f32.mrf.mxu1  ;;  %9224 = vmatprep.subr.mxu0 %v3479_v59 }
 0x161   : > { %14066 = vst [vmem:[#allocation42_spill] sm:$0xff] %v11448_v13  ;;  %v11450_v24 = vadd.f32 %v8834_v12, %v1491_v5  ;;  %9225 = vmatpush3.msra.mxu0 %v3479_v59  ;;  %v9861_v59 = vmov 0.0  }
 0x162   : > { %v8773_v25 = vpop.f32.mrf.mxu0  ;;  %9156 = vmatmul.mubr.msk.f32.gmra.mxu0 %vm504_vm1, %v14067_v39  ;;  %v8837_v40 = vpop.f32.mrf.mxu1  ;;  %3358 = vst.msk [vmem:[#allocation2 + $0x20] sm:$0xff] %vm504_vm1, %v9861_v59  ;;  %3353 = vst.msk [vmem:[#allocation2] sm:$0xff] %vm504_vm1, %v9861_v59 }
 0x163   : > { %v1493_v8 = vadd.f32 %v8773_v25, %v11251_v52  ;;  %3354 = vst.msk [vmem:[#allocation2 + $0x8] sm:$0xff] %vm504_vm1, %v9861_v59  ;;  %3357 = vst.msk [vmem:[#allocation2 + $0x18] sm:$0xff] %vm504_vm1, %v9861_v59 }
 0x164   : > { %v11455_v58 = vpop.f32.mrf.mxu0  ;;  %v11457_v3 = vpop.f32.mrf.mxu1  ;;  %3360 = vst.msk [vmem:[#allocation2 + $0x30] sm:$0xff] %vm504_vm1, %v9861_v59  ;;  %3361 = vst.msk [vmem:[#allocation2 + $0x38] sm:$0xff] %vm504_vm1, %v9861_v59 }
 0x165   : > { %14068 = vst [vmem:[#allocation43_spill] sm:$0xff] %v11457_v3  ;;  %v11462_v13 = vadd.f32 %v8837_v40, %v1493_v8  ;;  %v3478_v40 = vld [vmem:[%s13854_s2 + $0x28] sm:$0xff]  ;;  %3363 = vst.msk [vmem:[#allocation2 + $0x48] sm:$0xff] %vm504_vm1, %v9861_v59 }
 0x166   : > { %v8856_v12 = vpop.f32.mrf.mxu0  ;;  %v11464_v5 = vpop.f32.mrf.mxu1  ;;  %9226 = vmatprep.subr.mxu0 %v3478_v40  ;;  %3364 = vst.msk [vmem:[#allocation2 + $0x50] sm:$0xff] %vm504_vm1, %v9861_v59  ;;  %3366 = vst.msk [vmem:[#allocation2 + $0x60] sm:$0xff] %vm504_vm1, %v9861_v59 }
 0x167   : > { %14069 = vst [vmem:[#allocation44_spill] sm:$0xff] %v11464_v5  ;;  %v11470_v52 = vadd.f32 %v8856_v12, %v11269_v61  ;;  %9227 = vmatpush3.msra.mxu0 %v3478_v40  ;;  %v3477_v61 = vld [vmem:[%s13854_s2 + $0x20] sm:$0xff]  ;;  %3367 = vst.msk [vmem:[#allocation2 + $0x68] sm:$0xff] %vm504_vm1, %v9861_v59 }
 0x168   : > { %v11472_v25 = vpop.f32.mrf.mxu0  ;;  %v11474_v39 = vpop.f32.mrf.mxu1  ;;  %3369 = vst.msk [vmem:[#allocation2 + $0x78] sm:$0xff] %vm504_vm1, %v9861_v59  ;;  %3370 = vst.msk [vmem:[#allocation2 + $0x80] sm:$0xff] %vm504_vm1, %v9861_v59  ;;  %9228 = vmatprep.subr.mxu0 %v3477_v61 }
 0x169   : > { %14070 = vst [vmem:[#allocation45_spill] sm:$0xff] %v11470_v52  ;;  %14071 = vst [vmem:[#allocation46_spill] sm:$0xff] %v11474_v39  ;;  %9229 = vmatpush3.msra.mxu0 %v3477_v61  ;;  %v7503_v61 = vld [vmem:[%s13854_s2 + $0x48] sm:$0xff] }
 0x16a   : > { %v8859_v8 = vpop.f32.mrf.mxu0  ;;  %v11479_v2 = vpop.f32.mrf.mxu1  ;;  %3372 = vst.msk [vmem:[#allocation2 + $0x90] sm:$0xff] %vm504_vm1, %v9861_v59  ;;  %3373 = vst.msk [vmem:[#allocation2 + $0x98] sm:$0xff] %vm504_vm1, %v9861_v59  ;;  %9170 = vmatprep.subr.mxu1 %v7503_v61 }
 0x16b   : > { %14072 = vst [vmem:[#allocation47_spill] sm:$0xff] %v11479_v2  ;;  %v11482_v5 = vadd.f32 %v8859_v8, %v11281_v29  ;;  %3375 = vst.msk [vmem:[#allocation2 + $0xa8] sm:$0xff] %vm504_vm1, %v9861_v59  ;;  %v3476_v29 = vld [vmem:[%s13854_s2 + $0x18] sm:$0xff]  ;;  %v3475_v2 = vld [vmem:[%s13854_s2 + $0x10] sm:$0xff]  ;;  %9171 = vmatpush3.msra.mxu1 %v7503_v61 }
 0x16c   : > { %v11487_v12 = vpop.f32.mrf.mxu0  ;;  %v11489_v39 = vpop.f32.mrf.mxu1  ;;  %3376 = vst.msk [vmem:[#allocation2 + $0xb0] sm:$0xff] %vm504_vm1, %v9861_v59  ;;  %3378 = vst.msk [vmem:[#allocation2 + $0xc0] sm:$0xff] %vm504_vm1, %v9861_v59  ;;  %9230 = vmatprep.subr.mxu0 %v3476_v29  ;;  %v3481_v61 = vld [vmem:[#allocation2 + $0x1] sm:$0xff] }
 0x16d   : > { %14073 = vst [vmem:[#allocation48_spill] sm:$0xff] %v11482_v5  ;;  %14074 = vst [vmem:[#allocation49_spill] sm:$0xff] %v11489_v39  ;;  %9231 = vmatpush3.msra.mxu0 %v3476_v29  ;;  %9174 = vmatprep.mubr.msk.f32.mxu1 %vm504_vm1, %v3481_v61 }
 0x16e   : > { %3379 = vst.msk [vmem:[#allocation2 + $0xc8] sm:$0xff] %vm504_vm1, %v9861_v59  ;;  %3381 = vst.msk [vmem:[#allocation2 + $0xd8] sm:$0xff] %vm504_vm1, %v9861_v59  ;;  %v8862_v40 = vpop.f32.mrf.mxu0  ;;  %v11548_v8 = vpop.f32.mrf.mxu1  ;;  %9232 = vmatprep.subr.mxu0 %v3475_v2 }
 0x16f   : > { %3382 = vst.msk [vmem:[#allocation2 + $0xe0] sm:$0xff] %vm504_vm1, %v9861_v59  ;;  %3384 = vst.msk [vmem:[#allocation2 + $0xf0] sm:$0xff] %vm504_vm1, %v9861_v59  ;;  %v11551_v39 = vadd.f32 %v8862_v40, %v11293_v37  ;;  %9233 = vmatpush3.msra.mxu0 %v3475_v2  ;;  %v3474_v37 = vld [vmem:[%s13854_s2 + $0x8] sm:$0xff]  ;;  %v3473_v2 = vld [vmem:[%s13854_s2] sm:$0xff] }
 0x170   : > { %3385 = vst.msk [vmem:[#allocation2 + $0xf8] sm:$0xff] %vm504_vm1, %v9861_v59  ;;  %3387 = vst.msk [vmem:[#allocation2 + $0x108] sm:$0xff] %vm504_vm1, %v9861_v59  ;;  %v11556_v5 = vpop.f32.mrf.mxu0  ;;  %9234 = vmatprep.subr.mxu0 %v3474_v37 }
 0x171   : > { %3388 = vst.msk [vmem:[#allocation2 + $0x110] sm:$0xff] %vm504_vm1, %v9861_v59  ;;  %3390 = vst.msk [vmem:[#allocation2 + $0x120] sm:$0xff] %vm504_vm1, %v9861_v59  ;;  %9235 = vmatpush3.msra.mxu0 %v3474_v37 }
 0x172   : > { %3391 = vst.msk [vmem:[#allocation2 + $0x128] sm:$0xff] %vm504_vm1, %v9861_v59  ;;  %3393 = vst.msk [vmem:[#allocation2 + $0x138] sm:$0xff] %vm504_vm1, %v9861_v59  ;;  %v8865_v29 = vpop.f32.mrf.mxu0  ;;  %9236 = vmatprep.subr.mxu0 %v3473_v2 }
 0x173   : > { %3394 = vst.msk [vmem:[#allocation2 + $0x140] sm:$0xff] %vm504_vm1, %v9861_v59  ;;  %3396 = vst.msk [vmem:[#allocation2 + $0x150] sm:$0xff] %vm504_vm1, %v9861_v59  ;;  %9237 = vmatpush3.msra.mxu0 %v3473_v2 }
 0x174   : > { %3397 = vst.msk [vmem:[#allocation2 + $0x158] sm:$0xff] %vm504_vm1, %v9861_v59  ;;  %3399 = vst.msk [vmem:[#allocation2 + $0x168] sm:$0xff] %vm504_vm1, %v9861_v59 }
 0x175   : > { %3400 = vst.msk [vmem:[#allocation2 + $0x170] sm:$0xff] %vm504_vm1, %v9861_v59  ;;  %3402 = vst.msk [vmem:[#allocation2 + $0x180] sm:$0xff] %vm504_vm1, %v9861_v59 }
 0x176   : > { %3403 = vst.msk [vmem:[#allocation2 + $0x188] sm:$0xff] %vm504_vm1, %v9861_v59  ;;  %3405 = vst.msk [vmem:[#allocation2 + $0x198] sm:$0xff] %vm504_vm1, %v9861_v59 }
 0x177   : > { %3406 = vst.msk [vmem:[#allocation2 + $0x1a0] sm:$0xff] %vm504_vm1, %v9861_v59  ;;  %14075 = vst [vmem:[#allocation50_spill] sm:$0xff] %v11548_v8  ;;  %v11569_v8 = vadd.f32 %v8865_v29, %v11305_v48  ;;  %v3442_v29 = vld [vmem:[#allocation2 + $0x8] sm:$0xff] }
 0x178   : > { %3359 = vst.msk [vmem:[#allocation2 + $0x28] sm:$0x3] %vm3355_vm3, %v9861_v59  ;;  %3356 = vst.msk [vmem:[#allocation2 + $0x10] sm:$0x3] %vm3355_vm3, %v9861_v59 }
 0x179   : > { %3362 = vst.msk [vmem:[#allocation2 + $0x40] sm:$0x3] %vm3355_vm3, %v9861_v59  ;;  %3365 = vst.msk [vmem:[#allocation2 + $0x58] sm:$0x3] %vm3355_vm3, %v9861_v59 }
 0x17a   : > { %3368 = vst.msk [vmem:[#allocation2 + $0x70] sm:$0x3] %vm3355_vm3, %v9861_v59  ;;  %3371 = vst.msk [vmem:[#allocation2 + $0x88] sm:$0x3] %vm3355_vm3, %v9861_v59 }
 0x17b   : > { %3374 = vst.msk [vmem:[#allocation2 + $0xa0] sm:$0x3] %vm3355_vm3, %v9861_v59  ;;  %3377 = vst.msk [vmem:[#allocation2 + $0xb8] sm:$0x3] %vm3355_vm3, %v9861_v59 }
 0x17c   : > { %3380 = vst.msk [vmem:[#allocation2 + $0xd0] sm:$0x3] %vm3355_vm3, %v9861_v59  ;;  %3383 = vst.msk [vmem:[#allocation2 + $0xe8] sm:$0x3] %vm3355_vm3, %v9861_v59 }
 0x17d   : > { %3386 = vst.msk [vmem:[#allocation2 + $0x100] sm:$0x3] %vm3355_vm3, %v9861_v59  ;;  %3389 = vst.msk [vmem:[#allocation2 + $0x118] sm:$0x3] %vm3355_vm3, %v9861_v59 }
 0x17e   : > { %3392 = vst.msk [vmem:[#allocation2 + $0x130] sm:$0x3] %vm3355_vm3, %v9861_v59  ;;  %3395 = vst.msk [vmem:[#allocation2 + $0x148] sm:$0x3] %vm3355_vm3, %v9861_v59 }
 0x17f   : > { %3398 = vst.msk [vmem:[#allocation2 + $0x160] sm:$0x3] %vm3355_vm3, %v9861_v59  ;;  %3401 = vst.msk [vmem:[#allocation2 + $0x178] sm:$0x3] %vm3355_vm3, %v9861_v59  ;;  %v3482_v48 = vld [vmem:[#allocation2 + $0x9] sm:$0xff] }
 0x180   : > { %3404 = vst.msk [vmem:[#allocation2 + $0x190] sm:$0x3] %vm3355_vm3, %v9861_v59  ;;  %3407 = vst.msk [vmem:[#allocation2 + $0x1a8] sm:$0x3] %vm3355_vm3, %v9861_v59  ;;  %v11558_v59 = vpop.f32.mrf.mxu1 }
 0x181   : > { %14076 = vst [vmem:[#allocation51_spill] sm:$0xff] %v11551_v39  ;;  %14077 = vst [vmem:[#allocation52_spill] sm:$0xff] %v11556_v5  ;;  %v11577_v39 = vpop.f32.mrf.mxu0 }
 0x182   : > { %14078 = vst [vmem:[#allocation53_spill] sm:$0xff] %v11558_v59  ;;  %v11566_v40 = vpop.f32.mrf.mxu1  ;;  %14080 = vst [vmem:[#allocation57_spill] sm:$0xff] %v11569_v8  ;;  %v7502_v59 = vld [vmem:[%s13854_s2 + $0x40] sm:$0xff] }
 0x183   : > { %14079 = vst [vmem:[#allocation56_spill] sm:$0xff] %v11566_v40  ;;  %14081 = vst [vmem:[#allocation58_spill] sm:$0xff] %v11577_v39  ;;  %9172 = vmatprep.subr.mxu1 %v7502_v59  ;;  %v3441_v40 = vld [vmem:[#allocation2] sm:$0xff]  ;;  %v8868_v8 = vpop.f32.mrf.mxu0 }
 0x184   : > { %v11579_v52 = vpop.f32.mrf.mxu1  ;;  %9173 = vmatpush3.msra.mxu1 %v7502_v59  ;;  %9238 = vmatprep.mubr.msk.f32.mxu0 %vm504_vm1, %v3441_v40  ;;  %v11586_v37 = vadd.f32 %v8868_v8, %v11320_v16 }
 0x185   : > { %14082 = vst [vmem:[#allocation59_spill] sm:$0xff] %v11579_v52  ;;  %9175 = vmatmul.mubr.msk.f32.vlgmr.msra.gmra.mxu1 %vm504_vm1, %v3482_v48  ;;  %9239 = vmatmul.mubr.msk.f32.vlgmr.msra.gmra.mxu0 %vm504_vm1, %v3442_v29  ;;  %v11590_v52 = vpop.f32.mrf.mxu0 }
 0x186   : > { %v11582_v3 = vpop.f32.mrf.mxu1 }
 0x187   : > { %14083 = vst [vmem:[#allocation60_spill] sm:$0xff] %v11582_v3  ;;  %v8871_v61 = vpop.f32.mrf.mxu0 }
 0x188   : > { %v11592_v59 = vpop.f32.mrf.mxu1  ;;  %v11597_v5 = vadd.f32 %v8871_v61, %v11332_v32 }
 0x189   : > { %14084 = vst [vmem:[#allocation61_spill] sm:$0xff] %v11592_v59  ;;  %v11599_v2 = vpop.f32.mrf.mxu0 }
 0x18a   : > { %v11594_v39 = vpop.f32.mrf.mxu1  ;;  %14086 = vst [vmem:[#allocation63_spill] sm:$0xff] %v11597_v5 }
 0x18b   : > { %14085 = vst [vmem:[#allocation62_spill] sm:$0xff] %v11594_v39  ;;  %v8874_v16 = vpop.f32.mrf.mxu0  ;;  %v7581_v39 = vld [vmem:[%s13854_s2 + $0xb8] sm:$0xff] }
 0x18c   : > { %v11601_v40 = vpop.f32.mrf.mxu1  ;;  %v11606_v48 = vadd.f32 %v8874_v16, %v11347_v34  ;;  %9286 = vmatprep.subr.mxu1 %v7581_v39 }
 0x18d   : > { %14087 = vst [vmem:[#allocation64_spill] sm:$0xff] %v11601_v40  ;;  %v11608_v29 = vpop.f32.mrf.mxu0  ;;  %9287 = vmatpush3.msra.mxu1 %v7581_v39 }
 0x18e   : > { %v11603_v8 = vpop.f32.mrf.mxu1  ;;  %14089 = vst [vmem:[#allocation66_spill] sm:$0xff] %v11606_v48 }
 0x18f   : > { %14088 = vst [vmem:[#allocation65_spill] sm:$0xff] %v11603_v8  ;;  %v8877_v32 = vpop.f32.mrf.mxu0 }
 0x190   : > { %v11610_v3 = vpop.f32.mrf.mxu1  ;;  %v11618_v40 = vadd.f32 %v8877_v32, %v11359_v27  ;;  %v7580_v27 = vld [vmem:[%s13854_s2 + $0xb0] sm:$0xff] }
 0x191   : > { %14090 = vst [vmem:[#allocation67_spill] sm:$0xff] %v11610_v3  ;;  %v11620_v8 = vpop.f32.mrf.mxu0  ;;  %9288 = vmatprep.subr.mxu1 %v7580_v27 }
 0x192   : > { %v11615_v61 = vpop.f32.mrf.mxu1  ;;  %14092 = vst [vmem:[#allocation69_spill] sm:$0xff] %v11618_v40  ;;  %9289 = vmatpush3.msra.mxu1 %v7580_v27  ;;  %v7579_v27 = vld [vmem:[%s13854_s2 + $0xa8] sm:$0xff] }
 0x193   : > { %14091 = vst [vmem:[#allocation68_spill] sm:$0xff] %v11615_v61  ;;  %v8880_v16 = vpop.f32.mrf.mxu0  ;;  %9290 = vmatprep.subr.mxu1 %v7579_v27 }
 0x194   : > { %v11622_v34 = vpop.f32.mrf.mxu1  ;;  %v11627_v3 = vadd.f32 %v8880_v16, %v11375_v1  ;;  %9291 = vmatpush3.msra.mxu1 %v7579_v27  ;;  %v7578_v27 = vld [vmem:[%s13854_s2 + $0xa0] sm:$0xff] }
 0x195   : > { %14093 = vst [vmem:[#allocation70_spill] sm:$0xff] %v11622_v34  ;;  %v11629_v5 = vpop.f32.mrf.mxu0  ;;  %9292 = vmatprep.subr.mxu1 %v7578_v27 }
 0x196   : > { %v11624_v48 = vpop.f32.mrf.mxu1  ;;  %14095 = vst [vmem:[#allocation72_spill] sm:$0xff] %v11627_v3  ;;  %9293 = vmatpush3.msra.mxu1 %v7578_v27  ;;  %v7577_v27 = vld [vmem:[%s13854_s2 + $0x98] sm:$0xff] }
 0x197   : > { %14094 = vst [vmem:[#allocation71_spill] sm:$0xff] %v11624_v48  ;;  %v8883_v39 = vpop.f32.mrf.mxu0  ;;  %9294 = vmatprep.subr.mxu1 %v7577_v27 }
 0x198   : > { %v11631_v59 = vpop.f32.mrf.mxu1  ;;  %v11639_v34 = vadd.f32 %v8883_v39, %v11386_v6  ;;  %9295 = vmatpush3.msra.mxu1 %v7577_v27  ;;  %v7620_v27 = vld [vmem:[%s13854_s2 + $0xf0] sm:$0xff] }
 0x199   : > { %14096 = vst [vmem:[#allocation73_spill] sm:$0xff] %v11631_v59  ;;  %v11641_v48 = vpop.f32.mrf.mxu0 }
 0x19a   : > { %v11636_v32 = vpop.f32.mrf.mxu1  ;;  %14098 = vst [vmem:[#allocation75_spill] sm:$0xff] %v11639_v34 }
 0x19b   : > { %14097 = vst [vmem:[#allocation74_spill] sm:$0xff] %v11636_v32  ;;  %v8886_v16 = vpop.f32.mrf.mxu0 }
 0x19c   : > { %v11643_v1 = vpop.f32.mrf.mxu1  ;;  %v11648_v59 = vadd.f32 %v8886_v16, %v11400_v50 }
 0x19d   : > { %14099 = vst [vmem:[#allocation76_spill] sm:$0xff] %v11643_v1  ;;  %v11650_v61 = vpop.f32.mrf.mxu0 }
 0x19e   : > { %v11645_v3 = vpop.f32.mrf.mxu1  ;;  %14101 = vst [vmem:[#allocation78_spill] sm:$0xff] %v11648_v59 }
 0x19f   : > { %14100 = vst [vmem:[#allocation77_spill] sm:$0xff] %v11645_v3  ;;  %v8889_v6 = vpop.f32.mrf.mxu0 }
 0x1a0   : > { %v11652_v40 = vpop.f32.mrf.mxu1  ;;  %v11660_v1 = vadd.f32 %v8889_v6, %v11411_v21 }
 0x1a1   : > { %14102 = vst [vmem:[#allocation79_spill] sm:$0xff] %v11652_v40  ;;  %v11662_v3 = vpop.f32.mrf.mxu0 }
 0x1a2   : > { %v11657_v39 = vpop.f32.mrf.mxu1  ;;  %14104 = vst [vmem:[#allocation81_spill] sm:$0xff] %v11660_v1 }
 0x1a3   : > { %14103 = vst [vmem:[#allocation80_spill] sm:$0xff] %v11657_v39  ;;  %v8892_v16 = vpop.f32.mrf.mxu0 }
 0x1a4   : > { %v11664_v50 = vpop.f32.mrf.mxu1  ;;  %v11669_v40 = vadd.f32 %v8892_v16, %v11425_v11 }
 0x1a5   : > { %14105 = vst [vmem:[#allocation82_spill] sm:$0xff] %v11664_v50  ;;  %v11671_v32 = vpop.f32.mrf.mxu0 }
 0x1a6   : > { %v11666_v59 = vpop.f32.mrf.mxu1  ;;  %14107 = vst [vmem:[#allocation84_spill] sm:$0xff] %v11669_v40 }
 0x1a7   : > { %14106 = vst [vmem:[#allocation83_spill] sm:$0xff] %v11666_v59  ;;  %v8895_v21 = vpop.f32.mrf.mxu0 }
 0x1a8   : > { %v11673_v34 = vpop.f32.mrf.mxu1  ;;  %v11681_v50 = vadd.f32 %v8895_v21, %v11436_v38 }
 0x1a9   : > { %14108 = vst [vmem:[#allocation85_spill] sm:$0xff] %v11673_v34  ;;  %v11683_v59 = vpop.f32.mrf.mxu0 }
 0x1aa   : > { %v11678_v6 = vpop.f32.mrf.mxu1  ;;  %14110 = vst [vmem:[#allocation87_spill] sm:$0xff] %v11681_v50 }
 0x1ab   : > { %14109 = vst [vmem:[#allocation86_spill] sm:$0xff] %v11678_v6  ;;  %v8898_v16 = vpop.f32.mrf.mxu0 }
 0x1ac   : > { %v11685_v11 = vpop.f32.mrf.mxu1  ;;  %v11690_v34 = vadd.f32 %v8898_v16, %v11450_v24 }
 0x1ad   : > { %14111 = vst [vmem:[#allocation88_spill] sm:$0xff] %v11685_v11  ;;  %v11692_v39 = vpop.f32.mrf.mxu0 }
 0x1ae   : > { %v11687_v40 = vpop.f32.mrf.mxu1  ;;  %14113 = vst [vmem:[#allocation90_spill] sm:$0xff] %v11690_v34 }
 0x1af   : > { %14112 = vst [vmem:[#allocation89_spill] sm:$0xff] %v11687_v40  ;;  %v8901_v38 = vpop.f32.mrf.mxu0 }
 0x1b0   : > { %v11694_v1 = vpop.f32.mrf.mxu1  ;;  %v11702_v11 = vadd.f32 %v8901_v38, %v11462_v13  ;;  %v7576_v13 = vld [vmem:[%s13854_s2 + $0x90] sm:$0xff] }
 0x1b1   : > { %14114 = vst [vmem:[#allocation91_spill] sm:$0xff] %v11694_v1  ;;  %v11704_v40 = vpop.f32.mrf.mxu0  ;;  %v7621_v1 = vld [vmem:[%s13854_s2 + $0xf8] sm:$0xff]  ;;  %9296 = vmatprep.subr.mxu1 %v7576_v13 }
 0x1b2   : > { %v11699_v21 = vpop.f32.mrf.mxu1  ;;  %14116 = vst [vmem:[#allocation93_spill] sm:$0xff] %v11702_v11  ;;  %14117 = vst [vmem:[#allocation94_spill] sm:$0xff] %v11704_v40  ;;  %9350 = vmatprep.subr.mxu0 %v7621_v1  ;;  %9297 = vmatpush3.msra.mxu1 %v7576_v13  ;;  %v7619_v11 = vld [vmem:[%s13854_s2 + $0xe8] sm:$0xff] }
 0x1b3   : > { %14115 = vst [vmem:[#allocation92_spill] sm:$0xff] %v11699_v21  ;;  %v11708_v16 = vpop.f32.mrf.mxu0  ;;  %9351 = vmatpush3.msra.mxu0 %v7621_v1  ;;  %v7618_v1 = vld [vmem:[%s13854_s2 + $0xe0] sm:$0xff] }
 0x1b4   : > { %v11706_v24 = vpop.f32.mrf.mxu1  ;;  %9352 = vmatprep.subr.mxu0 %v7620_v27 }
 0x1b5   : > { %14118 = vst [vmem:[#allocation95_spill] sm:$0xff] %v11706_v24  ;;  %v11715_v6 = vpop.f32.mrf.mxu0  ;;  %9353 = vmatpush3.msra.mxu0 %v7620_v27  ;;  %v7617_v27 = vld [vmem:[%s13854_s2 + $0xd8] sm:$0xff] }
 0x1b6   : > { %v11710_v34 = vpop.f32.mrf.mxu1  ;;  %14120 = vst [vmem:[#allocation97_spill] sm:$0xff] %v11715_v6  ;;  %9354 = vmatprep.subr.mxu0 %v7619_v11 }
 0x1b7   : > { %14119 = vst [vmem:[#allocation96_spill] sm:$0xff] %v11710_v34  ;;  %v11725_v38 = vpop.f32.mrf.mxu0  ;;  %9355 = vmatpush3.msra.mxu0 %v7619_v11 }
 0x1b8   : > { %v11717_v21 = vpop.f32.mrf.mxu1  ;;  %14122 = vst [vmem:[#allocation99_spill] sm:$0xff] %v11725_v38  ;;  %9356 = vmatprep.subr.mxu0 %v7618_v1  ;;  %v7614_v38 = vld [vmem:[%s13854_s2 + $0xc0] sm:$0xff] }
 0x1b9   : > { %14121 = vst [vmem:[#allocation98_spill] sm:$0xff] %v11717_v21  ;;  %v11732_v21 = vpop.f32.mrf.mxu0  ;;  %9357 = vmatpush3.msra.mxu0 %v7618_v1 }
 0x1ba   : > { %v11727_v24 = vpop.f32.mrf.mxu1  ;;  %14124 = vst [vmem:[#allocation101_spill] sm:$0xff] %v11732_v21  ;;  %9358 = vmatprep.subr.mxu0 %v7617_v27  ;;  %v7616_v21 = vld [vmem:[%s13854_s2 + $0xd0] sm:$0xff] }
 0x1bb   : > { %14123 = vst [vmem:[#allocation100_spill] sm:$0xff] %v11727_v24  ;;  %v11737_v34 = vpop.f32.mrf.mxu0  ;;  %v7575_v24 = vld [vmem:[%s13854_s2 + $0x88] sm:$0xff]  ;;  %9359 = vmatpush3.msra.mxu0 %v7617_v27 }
 0x1bc   : > { %14125 = vst [vmem:[#allocation102_spill] sm:$0xff] %v11737_v34  ;;  %v11742_v13 = vpop.f32.mrf.mxu1  ;;  %9298 = vmatprep.subr.mxu1 %v7575_v24  ;;  %v7574_v34 = vld [vmem:[%s13854_s2 + $0x80] sm:$0xff]  ;;  %9360 = vmatprep.subr.mxu0 %v7616_v21 }
 0x1bd   : > { %14126 = vst [vmem:[#allocation103_spill] sm:$0xff] %v11742_v13  ;;  %v11747_v11 = vpop.f32.mrf.mxu0  ;;  %9299 = vmatpush3.msra.mxu1 %v7575_v24  ;;  %9361 = vmatpush3.msra.mxu0 %v7616_v21  ;;  %v7615_v24 = vld [vmem:[%s13854_s2 + $0xc8] sm:$0xff]  ;;  %v7661_v21 = vld [vmem:[%s13854_s2 + $0x138] sm:$0xff] }
 0x1be   : > { %14127 = vst [vmem:[#allocation104_spill] sm:$0xff] %v11747_v11  ;;  %9300 = vmatprep.subr.mxu1 %v7574_v34  ;;  %v11757_v1 = vpop.f32.mrf.mxu1  ;;  %9362 = vmatprep.subr.mxu0 %v7615_v24 }
 0x1bf   : > { %v11755_v13 = vpop.f32.mrf.mxu0  ;;  %9301 = vmatpush3.msra.mxu1 %v7574_v34  ;;  %14129 = vst [vmem:[#allocation106_spill] sm:$0xff] %v11757_v1  ;;  %9363 = vmatpush3.msra.mxu0 %v7615_v24 }
 0x1c0   : > { %14128 = vst [vmem:[#allocation105_spill] sm:$0xff] %v11755_v13  ;;  %9364 = vmatprep.subr.mxu0 %v7614_v38  ;;  %v11769_v34 = vpop.f32.mrf.mxu1  ;;  %9414 = vmatprep.subr.mxu1 %v7661_v21 }
 0x1c1   : > { %v11762_v11 = vpop.f32.mrf.mxu0  ;;  %14132 = vst [vmem:[#allocation109_spill] sm:$0xff] %v11769_v34  ;;  %9365 = vmatpush3.msra.mxu0 %v7614_v38 }
 0x1c2   : > { %14130 = vst [vmem:[#allocation107_spill] sm:$0xff] %v11762_v11  ;;  %v11778_v24 = vpop.f32.mrf.mxu1 }
 0x1c3   : > { %v11767_v27 = vpop.f32.mrf.mxu0  ;;  %14135 = vst [vmem:[#allocation112_spill] sm:$0xff] %v11778_v24 }
 0x1c4   : > { %14131 = vst [vmem:[#allocation108_spill] sm:$0xff] %v11767_v27  ;;  %v11784_v27 = vpop.f32.mrf.mxu1 }
 0x1c5   : > { %v11771_v1 = vpop.f32.mrf.mxu0  ;;  %14138 = vst [vmem:[#allocation115_spill] sm:$0xff] %v11784_v27 }
 0x1c6   : > { %14133 = vst [vmem:[#allocation110_spill] sm:$0xff] %v11771_v1  ;;  %v11790_v34 = vpop.f32.mrf.mxu1 }
 0x1c7   : > { %v11776_v11 = vpop.f32.mrf.mxu0 }
 0x1c8   : > { %14134 = vst [vmem:[#allocation111_spill] sm:$0xff] %v11776_v11  ;;  %v11796_v21 = vpop.f32.mrf.mxu1 }
 0x1c9   : > { %v11780_v13 = vpop.f32.mrf.mxu0 }
 0x1ca   : > { %14136 = vst [vmem:[#allocation113_spill] sm:$0xff] %v11780_v13  ;;  %v11802_v13 = vpop.f32.mrf.mxu1 }
 0x1cb   : > { %v11782_v40 = vpop.f32.mrf.mxu0 }
 0x1cc   : > { %14137 = vst [vmem:[#allocation114_spill] sm:$0xff] %v11782_v40 }
 0x1cd   : > { %v11786_v50 = vpop.f32.mrf.mxu0 }
 0x1ce   : > { %14139 = vst [vmem:[#allocation116_spill] sm:$0xff] %v11786_v50  ;;  %v11808_v50 = vpop.f32.mrf.mxu1 }
 0x1cf   : > { %v11788_v38 = vpop.f32.mrf.mxu0 }
 0x1d0   : > { %14140 = vst [vmem:[#allocation117_spill] sm:$0xff] %v11788_v38 }
 0x1d1   : > { %v11792_v1 = vpop.f32.mrf.mxu0 }
 0x1d2   : > { %14141 = vst [vmem:[#allocation118_spill] sm:$0xff] %v11792_v1  ;;  %v1015_v1 = vadd.f32 %v11172_v19, %v11170_v10  ;;  %v1075_v10 = vadd.f32 %v11257_v35, %v11255_v56  ;;  %v11828_v19 = vpop.f32.mrf.mxu1 }
 0x1d3   : > { %v11794_v6 = vpop.f32.mrf.mxu0 }
 0x1d4   : > { %14142 = vst [vmem:[#allocation119_spill] sm:$0xff] %v11794_v6  ;;  %v1025_v6 = vadd.f32 %v11186_v44, %v11184_v22  ;;  %v1734_v22 = vadd.f32 %v11264_v49, %v11267_v41  ;;  %v1736_v44 = vadd.f32 %v11276_v60, %v11279_v9  ;;  %v1492_v49 = vadd.f32 %v11455_v58, %v1075_v10  ;;  %v14159_v10 = vld [vmem:[#allocation44_spill] sm:$0xff] }
 0x1d5   : > { %v11798_v11 = vpop.f32.mrf.mxu0  ;;  %v1744_v60 = vadd.f32 %v11327_v15, %v11330_v62  ;;  %v1746_v9 = vadd.f32 %v11342_v55, %v11345_v4  ;;  %v14151_v62 = vld [vmem:[#allocation38_spill] sm:$0xff]  ;;  %v14152_v4 = vld [vmem:[#allocation39_spill] sm:$0xff] }
 0x1d6   : > { %14143 = vst [vmem:[#allocation120_spill] sm:$0xff] %v11798_v11  ;;  %v1035_v11 = vadd.f32 %v11200_v23, %v11198_v54  ;;  %v1738_v54 = vadd.f32 %v11288_v14, %v11291_v46  ;;  %v1480_v23 = vadd.f32 %v11382_v0, %v1015_v1  ;;  %v1748_v14 = vadd.f32 %v11354_v7, %v11357_v20  ;;  %v14153_v20 = vld [vmem:[#allocation40_spill] sm:$0xff] }
 0x1d7   : > { %v11800_v24 = vpop.f32.mrf.mxu0  ;;  %v2042_v46 = vadd.f32 %v11472_v25, %v1734_v22  ;;  %v14155_v25 = vld [vmem:[#allocation41_spill] sm:$0xff] }
 0x1d8   : > { %14144 = vst [vmem:[#allocation121_spill] sm:$0xff] %v11800_v24 }
 0x1d9   : > { %v11804_v40 = vpop.f32.mrf.mxu0 }
 0x1da   : > { %14145 = vst [vmem:[#allocation122_spill] sm:$0xff] %v11804_v40  ;;  %v1045_v40 = vadd.f32 %v11214_v47, %v11212_v43  ;;  %v1740_v43 = vadd.f32 %v11300_v26, %v11303_v28  ;;  %v1482_v47 = vadd.f32 %v11396_v53, %v1025_v6  ;;  %v11858_v26 = vpop.f32.mrf.mxu1  ;;  %v14148_v28 = vld [vmem:[#allocation36_spill] sm:$0xff]  ;;  %v2044_v53 = vadd.f32 %v11487_v12, %v1736_v44  ;;  %v14156_v6 = vld [vmem:[#allocation42_spill] sm:$0xff] }
 0x1db   : > { %v11806_v27 = vpop.f32.mrf.mxu0  ;;  %v14160_v44 = vld [vmem:[#allocation46_spill] sm:$0xff] }
 0x1dc   : > { %14146 = vst [vmem:[#allocation123_spill] sm:$0xff] %v11806_v27  ;;  %v1055_v27 = vadd.f32 %v11231_v63, %v11229_v18  ;;  %v1484_v18 = vadd.f32 %v11407_v30, %v1035_v11  ;;  %v14150_v30 = vld [vmem:[#allocation52_spill] sm:$0xff]  ;;  %v1754_v55 = vadd.f32 %v14151_v62, %v1482_v47  ;;  %v14157_v11 = vld [vmem:[#allocation43_spill] sm:$0xff] }
 0x1dd   : > { %v11810_v38 = vpop.f32.mrf.mxu0  ;;  %v1764_v1 = vadd.f32 %v14157_v11, %v1492_v49  ;;  %v14162_v47 = vld [vmem:[#allocation47_spill] sm:$0xff]  ;;  %v14165_v49 = vld [vmem:[#allocation50_spill] sm:$0xff]  ;;  %v14171_v11 = vld [vmem:[#allocation61_spill] sm:$0xff] }
 0x1de   : > { %14147 = vst [vmem:[#allocation124_spill] sm:$0xff] %v11810_v38  ;;  %v1065_v38 = vadd.f32 %v11246_v57, %v11244_v51  ;;  %v1486_v51 = vadd.f32 %v11421_v17, %v1045_v40  ;;  %v1742_v57 = vadd.f32 %v11315_v45, %v11318_v42  ;;  %v1488_v56 = vadd.f32 %v11432_v36, %v1055_v27  ;;  %v14149_v42 = vld [vmem:[#allocation37_spill] sm:$0xff] }
 0x1df   : > { %v11818_v24 = vpop.f32.mrf.mxu0  ;;  %v1750_v45 = vadd.f32 %v14148_v28, %v11373_v31  ;;  %v1752_v0 = vadd.f32 %v14149_v42, %v1480_v23  ;;  %v2046_v17 = vadd.f32 %v14150_v30, %v1738_v54  ;;  %v1756_v36 = vadd.f32 %v14152_v4, %v1484_v18  ;;  %v14161_v23 = vld [vmem:[#allocation48_spill] sm:$0xff]  ;;  %v14164_v28 = vld [vmem:[#allocation51_spill] sm:$0xff]  ;;  %v14167_v4 = vld [vmem:[#allocation57_spill] sm:$0xff] }
 0x1e0   : > { %v1490_v35 = vadd.f32 %v11446_v33, %v1065_v38  ;;  %v1758_v7 = vadd.f32 %v14153_v20, %v1486_v51  ;;  %v14154_v33 = vld [vmem:[#allocation58_spill] sm:$0xff]  ;;  %v1760_v40 = vadd.f32 %v14155_v25, %v1488_v56  ;;  %v2050_v12 = vadd.f32 %v11590_v52, %v1742_v57  ;;  %v14158_v38 = vld [vmem:[#allocation45_spill] sm:$0xff]  ;;  %v11883_v51 = vpop.f32.mrf.mxu1 }
 0x1e1   : > { %v11837_v63 = vpop.f32.mrf.mxu0  ;;  %v2048_v58 = vadd.f32 %v14154_v33, %v1740_v43  ;;  %v2318_v22 = vadd.f32 %v14159_v10, %v14158_v38  ;;  %v2317_v54 = vadd.f32 %v14160_v44, %v2042_v46  ;;  %v2320_v18 = vadd.f32 %v14162_v47, %v14161_v23  ;;  %v14163_v56 = vld [vmem:[#allocation49_spill] sm:$0xff]  ;;  %v14168_v46 = vld [vmem:[#allocation56_spill] sm:$0xff]  ;;  %v14169_v33 = vld [vmem:[#allocation59_spill] sm:$0xff] }
 0x1e2   : > { %v1762_v31 = vadd.f32 %v14156_v6, %v1490_v35  ;;  %v2052_v43 = vadd.f32 %v11599_v2, %v1744_v60  ;;  %v2319_v35 = vadd.f32 %v14163_v56, %v2044_v53  ;;  %v2322_v42 = vadd.f32 %v14165_v49, %v14164_v28  ;;  %v14166_v52 = vld [vmem:[#allocation53_spill] sm:$0xff]  ;;  %v14170_v53 = vld [vmem:[#allocation60_spill] sm:$0xff]  ;;  %v14173_v10 = vld [vmem:[#allocation63_spill] sm:$0xff] }
 0x1e3   : > { %v11849_v41 = vpop.f32.mrf.mxu0  ;;  %v2321_v57 = vadd.f32 %v14166_v52, %v2046_v17  ;;  %v2054_v30 = vadd.f32 %v11608_v29, %v1746_v9  ;;  %v2324_v20 = vadd.f32 %v14168_v46, %v14167_v4  ;;  %v2323_v25 = vadd.f32 %v14169_v33, %v2048_v58  ;;  %v14174_v44 = vld [vmem:[#allocation62_spill] sm:$0xff]  ;;  %v14175_v47 = vld [vmem:[#allocation64_spill] sm:$0xff]  ;;  %v14185_v46 = vld [vmem:[#allocation73_spill] sm:$0xff] }
 0x1e4   : > { %v2056_v2 = vadd.f32 %v11620_v8, %v1748_v14  ;;  %v2058_v60 = vadd.f32 %v11629_v5, %v1750_v45  ;;  %v2326_v6 = vadd.f32 %v14170_v53, %v11586_v37  ;;  %v2325_v38 = vadd.f32 %v14171_v11, %v2050_v12  ;;  %v14176_v8 = vld [vmem:[#allocation66_spill] sm:$0xff]  ;;  %v14177_v14 = vld [vmem:[#allocation65_spill] sm:$0xff]  ;;  %v11914_v45 = vpop.f32.mrf.mxu1  ;;  %v14178_v12 = vld [vmem:[#allocation67_spill] sm:$0xff] }
 0x1e5   : > { %v11865_v15 = vpop.f32.mrf.mxu0  ;;  %v2060_v17 = vadd.f32 %v11641_v48, %v1752_v0  ;;  %v2062_v29 = vadd.f32 %v11650_v61, %v1754_v55  ;;  %v2328_v23 = vadd.f32 %v14174_v44, %v14173_v10  ;;  %v11907_v58 = vadd.f32 %v14175_v47, %v2052_v43  ;;  %v14179_v61 = vld [vmem:[#allocation69_spill] sm:$0xff]  ;;  %v14180_v0 = vld [vmem:[#allocation68_spill] sm:$0xff]  ;;  %v14182_v49 = vld [vmem:[#allocation70_spill] sm:$0xff] }
 0x1e6   : > { %v11911_v5 = vadd.f32 %v14177_v14, %v14176_v8  ;;  %v2064_v37 = vadd.f32 %v11662_v3, %v1756_v36  ;;  %v11917_v48 = vadd.f32 %v14178_v12, %v2054_v30  ;;  %v11921_v55 = vadd.f32 %v14180_v0, %v14179_v61  ;;  %v14183_v4 = vld [vmem:[#allocation72_spill] sm:$0xff]  ;;  %v14184_v3 = vld [vmem:[#allocation71_spill] sm:$0xff]  ;;  %v14187_v11 = vld [vmem:[#allocation74_spill] sm:$0xff] }
 0x1e7   : > { %v11875_v27 = vpop.f32.mrf.mxu0  ;;  %v2066_v56 = vadd.f32 %v11671_v32, %v1758_v7  ;;  %v2068_v43 = vadd.f32 %v11683_v59, %v1760_v40  ;;  %v11928_v52 = vadd.f32 %v14182_v49, %v2056_v2  ;;  %v11932_v36 = vadd.f32 %v14184_v3, %v14183_v4  ;;  %v14186_v53 = vld [vmem:[#allocation75_spill] sm:$0xff]  ;;  %v14188_v32 = vld [vmem:[#allocation76_spill] sm:$0xff]  ;;  %v14189_v7 = vld [vmem:[#allocation78_spill] sm:$0xff]  ;;  %v11963_v49 = vpop.f32.mrf.mxu1 }
 0x1e8   : > { %v11935_v30 = vadd.f32 %v14185_v46, %v2058_v60  ;;  %v2590_v33 = vadd.f32 %v11708_v16, %v2318_v22  ;;  %v11940_v10 = vadd.f32 %v14187_v11, %v14186_v53  ;;  %v11943_v59 = vadd.f32 %v14188_v32, %v2060_v17  ;;  %v14190_v40 = vld [vmem:[#allocation77_spill] sm:$0xff]  ;;  %v14191_v44 = vld [vmem:[#allocation79_spill] sm:$0xff]  ;;  %v14194_v14 = vld [vmem:[#allocation80_spill] sm:$0xff] }
 0x1e9   : > { %v11890_v62 = vpop.f32.mrf.mxu0  ;;  %v11947_v2 = vadd.f32 %v14190_v40, %v14189_v7  ;;  %v11950_v47 = vadd.f32 %v14191_v44, %v2062_v29  ;;  %v14193_v60 = vld [vmem:[#allocation81_spill] sm:$0xff]  ;;  %v14195_v16 = vld [vmem:[#allocation82_spill] sm:$0xff]  ;;  %v2070_v61 = vadd.f32 %v11692_v39, %v1762_v31  ;;  %v14197_v4 = vld [vmem:[#allocation84_spill] sm:$0xff] }
 0x1ea   : > { %v11956_v12 = vadd.f32 %v14194_v14, %v14193_v60  ;;  %v11959_v22 = vadd.f32 %v14195_v16, %v2064_v37  ;;  %v14196_v17 = vld [vmem:[#allocation97_spill] sm:$0xff]  ;;  %v14198_v3 = vld [vmem:[#allocation83_spill] sm:$0xff]  ;;  %v14201_v32 = vld [vmem:[#allocation86_spill] sm:$0xff] }
 0x1eb   : > { %v11902_v9 = vpop.f32.mrf.mxu0  ;;  %v2589_v0 = vadd.f32 %v14196_v17, %v2317_v54  ;;  %v11967_v46 = vadd.f32 %v14198_v3, %v14197_v4  ;;  %v14199_v29 = vld [vmem:[#allocation85_spill] sm:$0xff]  ;;  %v14200_v11 = vld [vmem:[#allocation87_spill] sm:$0xff]  ;;  %v14202_v40 = vld [vmem:[#allocation88_spill] sm:$0xff] }
 0x1ec   : > { %14172 = vst [vmem:[#allocation36_spill] sm:$0xff] %v11902_v9  ;;  %v11970_v53 = vadd.f32 %v14199_v29, %v2066_v56  ;;  %v11974_v7 = vadd.f32 %v14201_v32, %v14200_v11  ;;  %v11977_v37 = vadd.f32 %v14202_v40, %v2068_v43  ;;  %v14204_v39 = vld [vmem:[#allocation90_spill] sm:$0xff]  ;;  %v14205_v31 = vld [vmem:[#allocation89_spill] sm:$0xff]  ;;  %v14208_v16 = vld [vmem:[#allocation96_spill] sm:$0xff] }
 0x1ed   : > { %v11925_v28 = vpop.f32.mrf.mxu0  ;;  %v11983_v54 = vadd.f32 %v14205_v31, %v14204_v39  ;;  %v14207_v60 = vld [vmem:[#allocation94_spill] sm:$0xff]  ;;  %v2866_v17 = vadd.f32 %v14208_v16, %v2590_v33  ;;  %v14209_v4 = vld [vmem:[#allocation99_spill] sm:$0xff]  ;;  %v14210_v3 = vld [vmem:[#allocation101_spill] sm:$0xff] }
 0x1ee   : > { %14181 = vst [vmem:[#allocation37_spill] sm:$0xff] %v11925_v28  ;;  %v2072_v14 = vadd.f32 %v14207_v60, %v1764_v1  ;;  %v2592_v56 = vadd.f32 %v14209_v4, %v2320_v18  ;;  %v2591_v29 = vadd.f32 %v14210_v3, %v2319_v35  ;;  %v14212_v32 = vld [vmem:[#allocation104_spill] sm:$0xff]  ;;  %v14213_v43 = vld [vmem:[#allocation105_spill] sm:$0xff]  ;;  %v14214_v31 = vld [vmem:[#allocation91_spill] sm:$0xff]  ;;  %v12002_v35 = vpop.f32.mrf.mxu1 }
 0x1ef   : > { %v11952_v8 = vpop.f32.mrf.mxu0  ;;  %14206 = vst [vmem:[#allocation39_spill] sm:$0xff] %v11983_v54  ;;  %v2593_v28 = vadd.f32 %v14212_v32, %v2321_v57  ;;  %v2596_v40 = vadd.f32 %v14213_v43, %v2324_v20  ;;  %v11995_v39 = vld [vmem:[%s13855_s3] ss:$0 sm:$0xff]  ;;  %v11998_v1 = vadd.f32 %v14214_v31, %v2070_v61  ;;  %v14215_v33 = vld [vmem:[#allocation98_spill] sm:$0xff]  ;;  %v14216_v18 = vld [vmem:[#allocation107_spill] sm:$0xff] }
 0x1f0   : > { %14192 = vst [vmem:[#allocation52_spill] sm:$0xff] %v11952_v8  ;;  %v14211_v8 = vld [vmem:[#allocation102_spill] sm:$0xff]  ;;  %v2865_v60 = vadd.f32 %v14215_v33, %v2589_v0  ;;  %v2595_v16 = vadd.f32 %v14216_v18, %v2323_v25  ;;  %v14218_v57 = vld [vmem:[#allocation92_spill] sm:$0xff]  ;;  %v12019_v25 = vld [vmem:[%s13854_s2 + $0x178] sm:$0xff] }
 0x1f1   : > { %v11979_v44 = vpop.f32.mrf.mxu0  ;;  %v2594_v11 = vadd.f32 %v14211_v8, %v2322_v42  ;;  %v14217_v8 = vld [vmem:[#allocation93_spill] sm:$0xff]  ;;  %v14220_v20 = vld [vmem:[#allocation108_spill] sm:$0xff]  ;;  %v14221_v32 = vld [vmem:[#allocation110_spill] sm:$0xff]  ;;  %9478 = vmatprep.subr.mxu0 %v12019_v25 }
 0x1f2   : > { %14203 = vst [vmem:[#allocation38_spill] sm:$0xff] %v11979_v44  ;;  %v12006_v4 = vadd.f32 %v14218_v57, %v14217_v8  ;;  %v2598_v3 = vadd.f32 %v14220_v20, %v2326_v6  ;;  %v2597_v43 = vadd.f32 %v14221_v32, %v2325_v38  ;;  %v14222_v44 = vld [vmem:[#allocation111_spill] sm:$0xff]  ;;  %v12014_v61 = vld [vmem:[%s13856_s4] ss:$0 sm:$0xff]  ;;  %v14226_v18 = vld [vmem:[#allocation106_spill] sm:$0xff] }
 0x1f3   : > { %v9112_v9 = vpop.f32.mrf.mxu0  ;;  %v2600_v54 = vadd.f32 %v14222_v44, %v2328_v23  ;;  %v14224_v31 = vld [vmem:[#allocation100_spill] sm:$0xff]  ;;  %v14225_v23 = vld [vmem:[#allocation103_spill] sm:$0xff]  ;;  %v2870_v8 = vadd.f32 %v14226_v18, %v2594_v11  ;;  %v14227_v57 = vld [vmem:[#allocation109_spill] sm:$0xff] }
 0x1f4   : > { %v3141_v42 = vadd.f32 %v9112_v9, %v2866_v17  ;;  %14219 = vst [vmem:[#allocation40_spill] sm:$0xff] %v12006_v4  ;;  %v14223_v9 = vld [vmem:[#allocation95_spill] sm:$0xff]  ;;  %v2868_v6 = vadd.f32 %v14224_v31, %v2592_v56  ;;  %v2867_v44 = vadd.f32 %v14225_v23, %v2591_v29  ;;  %v2869_v20 = vadd.f32 %v14227_v57, %v2593_v28  ;;  %v14228_v32 = vld [vmem:[#allocation112_spill] sm:$0xff] }
 0x1f5   : > { %v2981_v0 = vpop.f32.mrf.mxu0  ;;  %v12022_v17 = vadd.f32 %v14223_v9, %v2072_v14  ;;  %v2872_v4 = vadd.f32 %v14228_v32, %v2596_v40  ;;  %v12034_v14 = vld [vmem:[%s13857_s5] ss:$0 sm:$0xff]  ;;  %v14229_v56 = vld [vmem:[#allocation115_spill] sm:$0xff]  ;;  %v12042_v11 = vadd.f32 %v11790_v34, %v2598_v3  ;;  %v12045_v28 = vadd.f32 %v11796_v21, %v2597_v43  ;;  %v14230_v40 = vld [vmem:[#allocation113_spill] sm:$0xff] }
 0x1f6   : > { %v3180_v38 = vmul.f32 %v11995_v39, %v3141_v42  ;;  %v3140_v33 = vadd.f32 %v2981_v0, %v2865_v60  ;;  %v2871_v31 = vadd.f32 %v14229_v56, %v2595_v16  ;;  %v12037_v42 = vpop.f32.mrf.mxu1  ;;  %v2599_v23 = vadd.f32 %v14230_v40, %v11907_v58  ;;  %v14231_v34 = vld [vmem:[#allocation114_spill] sm:$0xff]  ;;  %v14232_v21 = vld [vmem:[#allocation116_spill] sm:$0xff] }
 0x1f7   : > { %v9115_v9 = vpop.f32.mrf.mxu0  ;;  %v12050_v18 = vadd.f32 %v11802_v13, %v2600_v54  ;;  %v2602_v3 = vadd.f32 %v14231_v34, %v11911_v5  ;;  %v2601_v43 = vadd.f32 %v14232_v21, %v11917_v48  ;;  %v14234_v5 = vld [vmem:[#allocation118_spill] sm:$0xff] }
 0x1f8   : > { %v3219_v60 = vadd.f32 %v12014_v61, %v3180_v38  ;;  %v3179_v29 = vmul.f32 %v11995_v39, %v3140_v33  ;;  %v3143_v0 = vadd.f32 %v9115_v9, %v2868_v6  ;;  %v14233_v33 = vld [vmem:[#allocation117_spill] sm:$0xff]  ;;  %v12061_v54 = vpop.f32.mrf.mxu1  ;;  %v2603_v40 = vadd.f32 %v14234_v5, %v11928_v52 }
 0x1f9   : > { %v2991_v16 = vpop.f32.mrf.mxu0  ;;  %v2604_v58 = vadd.f32 %v14233_v33, %v11921_v55  ;;  %v12074_v34 = vadd.f32 %v11828_v19, %v2602_v3  ;;  %v14235_v3 = vld [vmem:[#allocation119_spill] sm:$0xff] }
 0x1fa   : > { %vm3251_vm4 = vcmp.gt.f32.partialorder %v3219_v60, 0.0  ;;  %v3290_v57 = vmul.f32 %v12034_v14, %v3219_v60  ;;  %v3218_v38 = vadd.f32 %v12014_v61, %v3179_v29  ;;  %v3182_v6 = vmul.f32 %v11995_v39, %v3143_v0 }
 0x1fb   : > { %v3142_v32 = vadd.f32 %v2991_v16, %v2867_v44  ;;  %v9118_v13 = vpop.f32.mrf.mxu0  ;;  %v12066_v0 = vadd.f32 %v11808_v50, %v2599_v23  ;;  %v12077_v50 = vadd.f32 %v11858_v26, %v2601_v43  ;;  %v2606_v26 = vadd.f32 %v14235_v3, %v11932_v36 }
 0x1fc   : > { %v3322_v9 = vsel %vm3251_vm4, %v3219_v60, %v3290_v57  ;;  %vm3250_vm5 = vcmp.gt.f32.partialorder %v3218_v38, 0.0  ;;  %v3289_v56 = vmul.f32 %v12034_v14, %v3218_v38  ;;  %v3221_v29 = vadd.f32 %v12014_v61, %v3182_v6 }
 0x1fd   : > { %3410 = vst.msk [vmem:[#allocation2 + $0x21] sm:$0xff] %vm504_vm1, %v3322_v9  ;;  %v3181_v48 = vmul.f32 %v11995_v39, %v3142_v32  ;;  %v3145_v55 = vadd.f32 %v9118_v13, %v2870_v8  ;;  %v3001_v44 = vpop.f32.mrf.mxu0  ;;  %v12083_v8 = vadd.f32 %v11883_v51, %v2604_v58  ;;  %v12094_v51 = vadd.f32 %v11914_v45, %v2603_v40 }
 0x1fe   : > { %v3321_v16 = vsel %vm3250_vm5, %v3218_v38, %v3289_v56  ;;  %vm3253_vm6 = vcmp.gt.f32.partialorder %v3221_v29, 0.0  ;;  %v3292_v60 = vmul.f32 %v12034_v14, %v3221_v29  ;;  %v3144_v57 = vadd.f32 %v3001_v44, %v2869_v20  ;;  %v12085_v38 = vpop.f32.mrf.mxu1 }
 0x1ff   : > { %3409 = vst.msk [vmem:[#allocation2 + $0x19] sm:$0xff] %vm504_vm1, %v3321_v16  ;;  %v3220_v52 = vadd.f32 %v12014_v61, %v3181_v48  ;;  %v3184_v23 = vmul.f32 %v11995_v39, %v3145_v55  ;;  %v9121_v6 = vpop.f32.mrf.mxu0 }
 0x200   : > { %v3324_v21 = vsel %vm3253_vm6, %v3221_v29, %v3292_v60  ;;  %v3183_v20 = vmul.f32 %v11995_v39, %v3144_v57  ;;  %v3147_v19 = vadd.f32 %v9121_v6, %v2872_v4  ;;  %v14236_v4 = vld [vmem:[#allocation120_spill] sm:$0xff]  ;;  %v12101_v48 = vpop.f32.mrf.mxu1 }
 0x201   : > { %3412 = vst.msk [vmem:[#allocation2 + $0x39] sm:$0xff] %vm504_vm1, %v3324_v21  ;;  %vm3252_vm7 = vcmp.gt.f32.partialorder %v3220_v52, 0.0  ;;  %v3291_v43 = vmul.f32 %v12034_v14, %v3220_v52  ;;  %v3223_v33 = vadd.f32 %v12014_v61, %v3184_v23  ;;  %v3011_v32 = vpop.f32.mrf.mxu0  ;;  %v2605_v56 = vadd.f32 %v14236_v4, %v11935_v30  ;;  %v14237_v30 = vld [vmem:[#allocation121_spill] sm:$0xff] }
 0x202   : > { %v3222_v58 = vadd.f32 %v12014_v61, %v3183_v20  ;;  %v3186_v13 = vmul.f32 %v11995_v39, %v3147_v19  ;;  %v3146_v9 = vadd.f32 %v3011_v32, %v2871_v31  ;;  %v12108_v31 = vadd.f32 %v11963_v49, %v2606_v26 }
 0x203   : > { %v3323_v36 = vsel %vm3252_vm7, %v3220_v52, %v3291_v43  ;;  %vm3255_vm8 = vcmp.gt.f32.partialorder %v3223_v33, 0.0  ;;  %v3294_v29 = vmul.f32 %v12034_v14, %v3223_v33  ;;  %v9124_v5 = vpop.f32.mrf.mxu0  ;;  %v2608_v44 = vadd.f32 %v14237_v30, %v11940_v10  ;;  %v14238_v10 = vld [vmem:[#allocation122_spill] sm:$0xff] }
 0x204   : > { %3411 = vst.msk [vmem:[#allocation2 + $0x31] sm:$0xff] %vm504_vm1, %v3323_v36  ;;  %vm3254_vm9 = vcmp.gt.f32.partialorder %v3222_v58, 0.0  ;;  %v3293_v45 = vmul.f32 %v12034_v14, %v3222_v58  ;;  %v3225_v40 = vadd.f32 %v12014_v61, %v3186_v13  ;;  %v3185_v55 = vmul.f32 %v11995_v39, %v3146_v9  ;;  %v12131_v43 = vld [vmem:[#allocation2 + $0x21] sm:$0xff] }
 0x205   : > { %v3326_v16 = vsel %vm3255_vm8, %v3223_v33, %v3294_v29  ;;  %v3149_v60 = vadd.f32 %v9124_v5, %v12042_v11  ;;  %v3021_v57 = vpop.f32.mrf.mxu0  ;;  %v2607_v19 = vadd.f32 %v14238_v10, %v11943_v59  ;;  %v12133_v33 = vpop.f32.mrf.mxu1  ;;  %v12145_v13 = vadd.f32 %v12037_v42, %v2608_v44 }
 0x206   : > { %3414 = vst.msk [vmem:[#allocation2 + $0x51] sm:$0xff] %vm504_vm1, %v3326_v16  ;;  %v3325_v52 = vsel %vm3254_vm9, %v3222_v58, %v3293_v45  ;;  %vm3257_vm10 = vcmp.gt.f32.partialorder %v3225_v40, 0.0  ;;  %v3296_v23 = vmul.f32 %v12034_v14, %v3225_v40  ;;  %v3224_v6 = vadd.f32 %v12014_v61, %v3185_v55  ;;  %v12116_v21 = vld [vmem:[#allocation2 + $0x19] sm:$0xff] }
 0x207   : > { %v12118_v20 = vld [vmem:[#allocation2 + $0x18] sm:$0xff]  ;;  %v12120_v49 = vld [vmem:[#allocation2 + $0x20] sm:$0xff]  ;;  %3413 = vst.msk [vmem:[#allocation2 + $0x49] sm:$0xff] %vm504_vm1, %v3325_v52  ;;  %v3188_v11 = vmul.f32 %v11995_v39, %v3149_v60  ;;  %v3148_v3 = vadd.f32 %v3021_v57, %v12045_v28  ;;  %v9127_v26 = vpop.f32.mrf.mxu0  ;;  %9177 = vmatprep.mubr.msk.f32.mxu1 %vm504_vm1, %v12116_v21  ;;  %v12142_v28 = vadd.f32 %v12002_v35, %v2605_v56  ;;  %v12166_v16 = vpop.f32.mrf.mxu1 }
 0x208   : > { %9241 = vmatprep.mubr.msk.f32.mxu0 %vm504_vm1, %v12118_v20  ;;  %v3328_v32 = vsel %vm3257_vm10, %v3225_v40, %v3296_v23  ;;  %vm3256_vm11 = vcmp.gt.f32.partialorder %v3224_v6, 0.0  ;;  %v3295_v59 = vmul.f32 %v12034_v14, %v3224_v6  ;;  %v3151_v58 = vadd.f32 %v9127_v26, %v12050_v18  ;;  %9178 = vmatmul.mubr.msk.f32.gmra.mxu1 %vm504_vm1, %v12131_v43  ;;  %v14239_v18 = vld [vmem:[#allocation123_spill] sm:$0xff]  ;;  %v14240_v52 = vld [vmem:[#allocation124_spill] sm:$0xff] }
 0x209   : > { %9242 = vmatmul.mubr.msk.f32.gmra.mxu0 %vm504_vm1, %v12120_v49  ;;  %3416 = vst.msk [vmem:[#allocation2 + $0x69] sm:$0xff] %vm504_vm1, %v3328_v32  ;;  %v3227_v9 = vadd.f32 %v12014_v61, %v3188_v11  ;;  %v3187_v4 = vmul.f32 %v11995_v39, %v3148_v3  ;;  %v3031_v36 = vpop.f32.mrf.mxu0  ;;  %v2610_v29 = vadd.f32 %v14239_v18, %v11947_v2  ;;  %v12175_v57 = vld [vmem:[#allocation2 + $0x39] sm:$0xff] }
 0x20a   : > { %v3327_v5 = vsel %vm3256_vm11, %v3224_v6, %v3295_v59  ;;  %v3190_v45 = vmul.f32 %v11995_v39, %v3151_v58  ;;  %v3150_v40 = vadd.f32 %v3031_v36, %v12066_v0  ;;  %v12155_v35 = vadd.f32 %v12061_v54, %v2607_v19  ;;  %v12202_v36 = vpop.f32.mrf.mxu1 }
 0x20b   : > { %3415 = vst.msk [vmem:[#allocation2 + $0x61] sm:$0xff] %vm504_vm1, %v3327_v5  ;;  %vm3259_vm12 = vcmp.gt.f32.partialorder %v3227_v9, 0.0  ;;  %v3298_v42 = vmul.f32 %v12034_v14, %v3227_v9  ;;  %v3226_v56 = vadd.f32 %v12014_v61, %v3187_v4  ;;  %v9130_v55 = vpop.f32.mrf.mxu0  ;;  %v12160_v30 = vld [vmem:[#allocation2 + $0x31] sm:$0xff]  ;;  %v2609_v23 = vadd.f32 %v14240_v52, %v11950_v47 }
 0x20c   : > { %v12162_v44 = vld [vmem:[#allocation2 + $0x30] sm:$0xff]  ;;  %v12164_v2 = vld [vmem:[#allocation2 + $0x38] sm:$0xff]  ;;  %v3229_v0 = vadd.f32 %v12014_v61, %v3190_v45  ;;  %v3189_v54 = vmul.f32 %v11995_v39, %v3150_v40  ;;  %v3153_v60 = vadd.f32 %v9130_v55, %v12074_v34  ;;  %9180 = vmatprep.mubr.msk.f32.mxu1 %vm504_vm1, %v12160_v30  ;;  %v12195_v59 = vadd.f32 %v12085_v38, %v2610_v29 }
 0x20d   : > { %9244 = vmatprep.mubr.msk.f32.mxu0 %vm504_vm1, %v12162_v44  ;;  %v3330_v6 = vsel %vm3259_vm12, %v3227_v9, %v3298_v42  ;;  %vm3258_vm13 = vcmp.gt.f32.partialorder %v3226_v56, 0.0  ;;  %v3297_v10 = vmul.f32 %v12034_v14, %v3226_v56  ;;  %9181 = vmatmul.mubr.msk.f32.gmra.mxu1 %vm504_vm1, %v12175_v57  ;;  %v3041_v34 = vpop.f32.mrf.mxu0  ;;  %v12207_v29 = vld [vmem:[#allocation2 + $0x51] sm:$0xff] }
 0x20e   : > { %9245 = vmatmul.mubr.msk.f32.gmra.mxu0 %vm504_vm1, %v12164_v2  ;;  %3418 = vst.msk [vmem:[#allocation2 + $0x81] sm:$0xff] %vm504_vm1, %v3330_v6  ;;  %vm3261_vm14 = vcmp.gt.f32.partialorder %v3229_v0, 0.0  ;;  %v3300_v19 = vmul.f32 %v12034_v14, %v3229_v0  ;;  %v3228_v11 = vadd.f32 %v12014_v61, %v3189_v54  ;;  %v3192_v47 = vmul.f32 %v11995_v39, %v3153_v60  ;;  %v12188_v3 = vld [vmem:[#allocation2 + $0x49] sm:$0xff] }
 0x20f   : > { %v12190_v26 = vld [vmem:[#allocation2 + $0x48] sm:$0xff]  ;;  %v12192_v32 = vld [vmem:[#allocation2 + $0x50] sm:$0xff]  ;;  %v3329_v58 = vsel %vm3258_vm13, %v3226_v56, %v3297_v10  ;;  %v3152_v9 = vadd.f32 %v3041_v34, %v12077_v50  ;;  %v9133_v4 = vpop.f32.mrf.mxu0  ;;  %9183 = vmatprep.mubr.msk.f32.mxu1 %vm504_vm1, %v12188_v3  ;;  %v2612_v50 = vadd.f32 %v11818_v24, %v11956_v12  ;;  %v12238_v10 = vpop.f32.mrf.mxu1 }
 0x210   : > { %9247 = vmatprep.mubr.msk.f32.mxu0 %vm504_vm1, %v12190_v26  ;;  %3417 = vst.msk [vmem:[#allocation2 + $0x79] sm:$0xff] %vm504_vm1, %v3329_v58  ;;  %v3332_v18 = vsel %vm3261_vm14, %v3229_v0, %v3300_v19  ;;  %vm3260_vm15 = vcmp.gt.f32.partialorder %v3228_v11, 0.0  ;;  %v3299_v5 = vmul.f32 %v12034_v14, %v3228_v11  ;;  %v3231_v38 = vadd.f32 %v12014_v61, %v3192_v47  ;;  %v12242_v19 = vld [vmem:[#allocation2 + $0x69] sm:$0xff] }
 0x211   : > { %3420 = vst.msk [vmem:[#allocation2 + $0x99] sm:$0xff] %vm504_vm1, %v3332_v18  ;;  %v3191_v45 = vmul.f32 %v11995_v39, %v3152_v9  ;;  %v3155_v40 = vadd.f32 %v9133_v4, %v12083_v8  ;;  %9184 = vmatmul.mubr.msk.f32.gmra.mxu1 %vm504_vm1, %v12207_v29  ;;  %v3051_v42 = vpop.f32.mrf.mxu0  ;;  %v2611_v8 = vadd.f32 %v11837_v63, %v11959_v22 }
 0x212   : > { %9248 = vmatmul.mubr.msk.f32.gmra.mxu0 %vm504_vm1, %v12192_v32  ;;  %v3331_v56 = vsel %vm3260_vm15, %v3228_v11, %v3299_v5  ;;  %vm3263_vm0 = vcmp.gt.f32.partialorder %v3231_v38, 0.0  ;;  %v3302_v55 = vmul.f32 %v12034_v14, %v3231_v38  ;;  %v3154_v0 = vadd.f32 %v3051_v42, %v12094_v51  ;;  %v12220_v24 = vld [vmem:[#allocation2 + $0x61] sm:$0xff] }
 0x213   : > { %v12222_v12 = vld [vmem:[#allocation2 + $0x60] sm:$0xff]  ;;  %v12224_v54 = vld [vmem:[#allocation2 + $0x68] sm:$0xff]  ;;  %3419 = vst.msk [vmem:[#allocation2 + $0x91] sm:$0xff] %vm504_vm1, %v3331_v56  ;;  %v3230_v60 = vadd.f32 %v12014_v61, %v3191_v45  ;;  %v3194_v52 = vmul.f32 %v11995_v39, %v3155_v40  ;;  %v9136_v6 = vpop.f32.mrf.mxu0  ;;  %9186 = vmatprep.mubr.msk.f32.mxu1 %vm504_vm1, %v12220_v24  ;;  %v12236_v51 = vadd.f32 %v12101_v48, %v2609_v23 }
 0x214   : > { %9250 = vmatprep.mubr.msk.f32.mxu0 %vm504_vm1, %v12222_v12  ;;  %v3334_v34 = vsel %vm3263_vm0, %v3231_v38, %v3302_v55  ;;  %v3193_v63 = vmul.f32 %v11995_v39, %v3154_v0  ;;  %v3157_v22 = vadd.f32 %v9136_v6, %v12108_v31  ;;  %v12245_v11 = vadd.f32 %v12133_v33, %v2612_v50 }
 0x215   : > { %3422 = vst.msk [vmem:[#allocation2 + $0xb1] sm:$0xff] %vm504_vm1, %v3334_v34  ;;  %vm3262_vm2 = vcmp.gt.f32.partialorder %v3230_v60, 0.0  ;;  %v3301_v47 = vmul.f32 %v12034_v14, %v3230_v60  ;;  %v3233_v48 = vadd.f32 %v12014_v61, %v3194_v52  ;;  %9187 = vmatmul.mubr.msk.f32.gmra.mxu1 %vm504_vm1, %v12242_v19  ;;  %v3061_v23 = vpop.f32.mrf.mxu0  ;;  %v2614_v31 = vadd.f32 %v11849_v41, %v11967_v46  ;;  %v12269_v41 = vpop.f32.mrf.mxu1  ;;  %v12279_v42 = vld [vmem:[#allocation2 + $0x81] sm:$0xff] }
 0x216   : > { %9251 = vmatmul.mubr.msk.f32.gmra.mxu0 %vm504_vm1, %v12224_v54  ;;  %v3232_v33 = vadd.f32 %v12014_v61, %v3193_v63  ;;  %v3196_v58 = vmul.f32 %v11995_v39, %v3157_v22  ;;  %v3156_v9 = vadd.f32 %v3061_v23, %v12142_v28  ;;  %v12260_v4 = vadd.f32 %v12166_v16, %v2611_v8 }
 0x217   : > { %v3333_v18 = vsel %vm3262_vm2, %v3230_v60, %v3301_v47  ;;  %vm3265_vm3 = vcmp.gt.f32.partialorder %v3233_v48, 0.0  ;;  %v3304_v5 = vmul.f32 %v12034_v14, %v3233_v48  ;;  %v9139_v38 = vpop.f32.mrf.mxu0  ;;  %v12263_v50 = vld [vmem:[#allocation2 + $0x79] sm:$0xff]  ;;  %v2613_v56 = vadd.f32 %v11865_v15, %v11970_v53 }
 0x218   : > { %v12265_v45 = vld [vmem:[#allocation2 + $0x78] sm:$0xff]  ;;  %v12267_v40 = vld [vmem:[#allocation2 + $0x80] sm:$0xff]  ;;  %3421 = vst.msk [vmem:[#allocation2 + $0xa9] sm:$0xff] %vm504_vm1, %v3333_v18  ;;  %vm3264_vm4 = vcmp.gt.f32.partialorder %v3232_v33, 0.0  ;;  %v3303_v46 = vmul.f32 %v12034_v14, %v3232_v33  ;;  %v3235_v28 = vadd.f32 %v12014_v61, %v3196_v58  ;;  %v3195_v16 = vmul.f32 %v11995_v39, %v3156_v9  ;;  %9189 = vmatprep.mubr.msk.f32.mxu1 %vm504_vm1, %v12263_v50 }
 0x219   : > { %9253 = vmatprep.mubr.msk.f32.mxu0 %vm504_vm1, %v12265_v45  ;;  %v3336_v55 = vsel %vm3265_vm3, %v3233_v48, %v3304_v5  ;;  %v3159_v0 = vadd.f32 %v9139_v38, %v12145_v13  ;;  %9190 = vmatmul.mubr.msk.f32.gmra.mxu1 %vm504_vm1, %v12279_v42  ;;  %v3071_v8 = vpop.f32.mrf.mxu0  ;;  %v12299_v34 = vadd.f32 %v12202_v36, %v2614_v31  ;;  %v12308_v48 = vpop.f32.mrf.mxu1 }
 0x21a   : > { %9254 = vmatmul.mubr.msk.f32.gmra.mxu0 %vm504_vm1, %v12267_v40  ;;  %3424 = vst.msk [vmem:[#allocation2 + $0xc9] sm:$0xff] %vm504_vm1, %v3336_v55  ;;  %v3335_v60 = vsel %vm3264_vm4, %v3232_v33, %v3303_v46  ;;  %vm3267_vm5 = vcmp.gt.f32.partialorder %v3235_v28, 0.0  ;;  %v3306_v52 = vmul.f32 %v12034_v14, %v3235_v28  ;;  %v3234_v6 = vadd.f32 %v12014_v61, %v3195_v16  ;;  %v12292_v15 = vld [vmem:[#allocation2 + $0x91] sm:$0xff]  ;;  %v12312_v33 = vld [vmem:[#allocation2 + $0x99] sm:$0xff] }
 0x21b   : > { %v12294_v53 = vld [vmem:[#allocation2 + $0x90] sm:$0xff]  ;;  %v12296_v13 = vld [vmem:[#allocation2 + $0x98] sm:$0xff]  ;;  %3423 = vst.msk [vmem:[#allocation2 + $0xc1] sm:$0xff] %vm504_vm1, %v3335_v60  ;;  %v3198_v63 = vmul.f32 %v11995_v39, %v3159_v0  ;;  %v3158_v22 = vadd.f32 %v3071_v8, %v12155_v35  ;;  %v9142_v47 = vpop.f32.mrf.mxu0  ;;  %9192 = vmatprep.mubr.msk.f32.mxu1 %vm504_vm1, %v12292_v15  ;;  %v2616_v35 = vadd.f32 %v11875_v27, %v11974_v7 }
 0x21c   : > { %9256 = vmatprep.mubr.msk.f32.mxu0 %vm504_vm1, %v12294_v53  ;;  %v3338_v23 = vsel %vm3267_vm5, %v3235_v28, %v3306_v52  ;;  %vm3266_vm6 = vcmp.gt.f32.partialorder %v3234_v6, 0.0  ;;  %v3305_v36 = vmul.f32 %v12034_v14, %v3234_v6  ;;  %v3161_v31 = vadd.f32 %v9142_v47, %v12195_v59 }
 0x21d   : > { %3426 = vst.msk [vmem:[#allocation2 + $0xe1] sm:$0xff] %vm504_vm1, %v3338_v23  ;;  %v3237_v58 = vadd.f32 %v12014_v61, %v3198_v63  ;;  %v3197_v9 = vmul.f32 %v11995_v39, %v3158_v22  ;;  %9193 = vmatmul.mubr.msk.f32.gmra.mxu1 %vm504_vm1, %v12312_v33  ;;  %v3081_v18 = vpop.f32.mrf.mxu0  ;;  %v2889_v59 = vadd.f32 %v12238_v10, %v2613_v56  ;;  %v9090_v56 = vpop.f32.mrf.mxu1 }
 0x21e   : > { %9257 = vmatmul.mubr.msk.f32.gmra.mxu0 %vm504_vm1, %v12296_v13  ;;  %v3337_v5 = vsel %vm3266_vm6, %v3234_v6, %v3305_v36  ;;  %v3200_v38 = vmul.f32 %v11995_v39, %v3161_v31  ;;  %v3160_v27 = vadd.f32 %v3081_v18, %v12236_v51  ;;  %v2615_v7 = vadd.f32 %v11890_v62, %v11977_v37  ;;  %v12344_v37 = vld [vmem:[#allocation2 + $0xb1] sm:$0xff] }
 0x21f   : > { %3425 = vst.msk [vmem:[#allocation2 + $0xd9] sm:$0xff] %vm504_vm1, %v3337_v5  ;;  %vm3269_vm7 = vcmp.gt.f32.partialorder %v3237_v58, 0.0  ;;  %v3308_v46 = vmul.f32 %v12034_v14, %v3237_v58  ;;  %v3236_v28 = vadd.f32 %v12014_v61, %v3197_v9  ;;  %v9145_v16 = vpop.f32.mrf.mxu0  ;;  %v12331_v55 = vld [vmem:[#allocation2 + $0xa9] sm:$0xff]  ;;  %v2892_v60 = vadd.f32 %v12269_v41, %v2616_v35  ;;  %v14241_v31 = vld [vmem:[#allocation39_spill] sm:$0xff]  ;;  %v14242_v35 = vld [vmem:[#allocation36_spill] sm:$0xff] }
 0x220   : > { %v12333_v0 = vld [vmem:[#allocation2 + $0xa8] sm:$0xff]  ;;  %v12335_v10 = vld [vmem:[#allocation2 + $0xb0] sm:$0xff]  ;;  %v3239_v51 = vadd.f32 %v12014_v61, %v3200_v38  ;;  %v3199_v8 = vmul.f32 %v11995_v39, %v3160_v27  ;;  %v3163_v62 = vadd.f32 %v9145_v16, %v12245_v11  ;;  %9195 = vmatprep.mubr.msk.f32.mxu1 %vm504_vm1, %v12331_v55  ;;  %v2846_v38 = vpop.f32.mrf.mxu1 }
 0x221   : > { %9259 = vmatprep.mubr.msk.f32.mxu0 %vm504_vm1, %v12333_v0  ;;  %v3340_v52 = vsel %vm3269_vm7, %v3237_v58, %v3308_v46  ;;  %vm3268_vm8 = vcmp.gt.f32.partialorder %v3236_v28, 0.0  ;;  %v3307_v6 = vmul.f32 %v12034_v14, %v3236_v28  ;;  %9196 = vmatmul.mubr.msk.f32.gmra.mxu1 %vm504_vm1, %v12344_v37  ;;  %v3091_v11 = vpop.f32.mrf.mxu0  ;;  %v2618_v58 = vadd.f32 %v14242_v35, %v14241_v31 }
 0x222   : > { %9260 = vmatmul.mubr.msk.f32.gmra.mxu0 %vm504_vm1, %v12335_v10  ;;  %3428 = vst.msk [vmem:[#allocation2 + $0xf9] sm:$0xff] %vm504_vm1, %v3340_v52  ;;  %vm3271_vm9 = vcmp.gt.f32.partialorder %v3239_v51, 0.0  ;;  %v3310_v63 = vmul.f32 %v12034_v14, %v3239_v51  ;;  %v3238_v22 = vadd.f32 %v12014_v61, %v3199_v8  ;;  %v3202_v41 = vmul.f32 %v11995_v39, %v3163_v62  ;;  %v12356_v47 = vld [vmem:[#allocation2 + $0xc1] sm:$0xff]  ;;  %v12372_v8 = vld [vmem:[#allocation2 + $0xc9] sm:$0xff] }
 0x223   : > { %v12358_v23 = vld [vmem:[#allocation2 + $0xc0] sm:$0xff]  ;;  %v12360_v36 = vld [vmem:[#allocation2 + $0xc8] sm:$0xff]  ;;  %v3339_v9 = vsel %vm3268_vm8, %v3236_v28, %v3307_v6  ;;  %v3162_v18 = vadd.f32 %v3091_v11, %v12260_v4  ;;  %v9148_v5 = vpop.f32.mrf.mxu0  ;;  %9198 = vmatprep.mubr.msk.f32.mxu1 %vm504_vm1, %v12356_v47 }
 0x224   : > { %9262 = vmatprep.mubr.msk.f32.mxu0 %vm504_vm1, %v12358_v23  ;;  %3427 = vst.msk [vmem:[#allocation2 + $0xf1] sm:$0xff] %vm504_vm1, %v3339_v9  ;;  %v3342_v27 = vsel %vm3271_vm9, %v3239_v51, %v3310_v63  ;;  %vm3270_vm10 = vcmp.gt.f32.partialorder %v3238_v22, 0.0  ;;  %v3309_v46 = vmul.f32 %v12034_v14, %v3238_v22  ;;  %v3241_v16 = vadd.f32 %v12014_v61, %v3202_v41  ;;  %v14243_v4 = vld [vmem:[#allocation37_spill] sm:$0xff] }
 0x225   : > { %v2617_v28 = vadd.f32 %v14243_v4, %v11998_v1  ;;  %3430 = vst.msk [vmem:[#allocation2 + $0x111] sm:$0xff] %vm504_vm1, %v3342_v27  ;;  %v3201_v62 = vmul.f32 %v11995_v39, %v3162_v18  ;;  %v3165_v52 = vadd.f32 %v9148_v5, %v12299_v34  ;;  %9199 = vmatmul.mubr.msk.f32.gmra.mxu1 %vm504_vm1, %v12372_v8  ;;  %v3101_v51 = vpop.f32.mrf.mxu0  ;;  %v14246_v4 = vld [vmem:[#allocation52_spill] sm:$0xff] }
 0x226   : > { %9263 = vmatmul.mubr.msk.f32.gmra.mxu0 %vm504_vm1, %v12360_v36  ;;  %v3341_v6 = vsel %vm3270_vm10, %v3238_v22, %v3309_v46  ;;  %vm3273_vm11 = vcmp.gt.f32.partialorder %v3241_v16, 0.0  ;;  %v3312_v11 = vmul.f32 %v12034_v14, %v3241_v16  ;;  %v3164_v63 = vadd.f32 %v3101_v51, %v2889_v59  ;;  %v12384_v41 = vld [vmem:[#allocation2 + $0xd9] sm:$0xff]  ;;  %v9093_v22 = vpop.f32.mrf.mxu1 }
 0x227   : > { %v12386_v1 = vld [vmem:[#allocation2 + $0xd8] sm:$0xff]  ;;  %v12388_v31 = vld [vmem:[#allocation2 + $0xe0] sm:$0xff]  ;;  %v2891_v34 = vadd.f32 %v12308_v48, %v2615_v7  ;;  %3429 = vst.msk [vmem:[#allocation2 + $0x109] sm:$0xff] %vm504_vm1, %v3341_v6  ;;  %v3240_v35 = vadd.f32 %v12014_v61, %v3201_v62  ;;  %v3204_v9 = vmul.f32 %v11995_v39, %v3165_v52  ;;  %v9151_v18 = vpop.f32.mrf.mxu0  ;;  %9201 = vmatprep.mubr.msk.f32.mxu1 %vm504_vm1, %v12384_v41 }
 0x228   : > { %9265 = vmatprep.mubr.msk.f32.mxu0 %vm504_vm1, %v12386_v1  ;;  %v2894_v59 = vadd.f32 %v9090_v56, %v2618_v58  ;;  %v3344_v5 = vsel %vm3273_vm11, %v3241_v16, %v3312_v11  ;;  %v3203_v27 = vmul.f32 %v11995_v39, %v3164_v63  ;;  %v3167_v46 = vadd.f32 %v9151_v18, %v2892_v60  ;;  %v12399_v48 = vld [vmem:[#allocation2 + $0xe1] sm:$0xff]  ;;  %v14247_v11 = vld [vmem:[#allocation38_spill] sm:$0xff] }
 0x229   : > { %14244 = vst [vmem:[#allocation58_spill] sm:$0xff] %v12399_v48  ;;  %v14245_v7 = vld [vmem:[#allocation40_spill] sm:$0xff]  ;;  %3432 = vst.msk [vmem:[#allocation2 + $0x129] sm:$0xff] %vm504_vm1, %v3344_v5  ;;  %vm3272_vm12 = vcmp.gt.f32.partialorder %v3240_v35, 0.0  ;;  %v3311_v52 = vmul.f32 %v12034_v14, %v3240_v35  ;;  %v3243_v51 = vadd.f32 %v12014_v61, %v3204_v9  ;;  %9202 = vmatmul.mubr.msk.f32.gmra.mxu1 %vm504_vm1, %v12399_v48  ;;  %v3111_v56 = vpop.f32.mrf.mxu0 }
 0x22a   : > { %v2620_v62 = vadd.f32 %v14246_v4, %v14245_v7  ;;  %9266 = vmatmul.mubr.msk.f32.gmra.mxu0 %vm504_vm1, %v12388_v31  ;;  %v2893_v60 = vadd.f32 %v2846_v38, %v2617_v28  ;;  %v3242_v58 = vadd.f32 %v12014_v61, %v3203_v27  ;;  %v3206_v16 = vmul.f32 %v11995_v39, %v3167_v46  ;;  %v2856_v38 = vpop.f32.mrf.mxu1 }
 0x22b   : > { %v3166_v6 = vadd.f32 %v3111_v56, %v2891_v34  ;;  %v2619_v63 = vadd.f32 %v14247_v11, %v12022_v17  ;;  %v3343_v18 = vsel %vm3272_vm12, %v3240_v35, %v3311_v52  ;;  %vm3275_vm13 = vcmp.gt.f32.partialorder %v3243_v51, 0.0  ;;  %v9154_v5 = vpop.f32.mrf.mxu0  ;;  %v12415_v7 = vld [vmem:[#allocation2 + $0xf1] sm:$0xff]  ;;  %v12429_v35 = vld [vmem:[#allocation2 + $0xf9] sm:$0xff] }
 0x22c   : > { %v3314_v9 = vmul.f32 %v12034_v14, %v3243_v51  ;;  %v12417_v4 = vld [vmem:[#allocation2 + $0xf0] sm:$0xff]  ;;  %v12419_v48 = vld [vmem:[#allocation2 + $0xf8] sm:$0xff]  ;;  %3431 = vst.msk [vmem:[#allocation2 + $0x121] sm:$0xff] %vm504_vm1, %v3343_v18  ;;  %vm3274_vm14 = vcmp.gt.f32.partialorder %v3242_v58, 0.0  ;;  %v3313_v28 = vmul.f32 %v12034_v14, %v3242_v58  ;;  %v3245_v34 = vadd.f32 %v12014_v61, %v3206_v16  ;;  %9204 = vmatprep.mubr.msk.f32.mxu1 %vm504_vm1, %v12415_v7 }
 0x22d   : > { %v3205_v17 = vmul.f32 %v11995_v39, %v3166_v6  ;;  %9268 = vmatprep.mubr.msk.f32.mxu0 %vm504_vm1, %v12417_v4  ;;  %v2896_v27 = vadd.f32 %v9093_v22, %v2620_v62  ;;  %v3169_v52 = vadd.f32 %v9154_v5, %v2894_v59  ;;  %9205 = vmatmul.mubr.msk.f32.gmra.mxu1 %vm504_vm1, %v12429_v35  ;;  %v3121_v56 = vpop.f32.mrf.mxu0 }
 0x22e   : > { %v3346_v46 = vsel %vm3275_vm13, %v3243_v51, %v3314_v9  ;;  %9269 = vmatmul.mubr.msk.f32.gmra.mxu0 %vm504_vm1, %v12419_v48  ;;  %v3345_v16 = vsel %vm3274_vm14, %v3242_v58, %v3313_v28  ;;  %vm3277_vm15 = vcmp.gt.f32.partialorder %v3245_v34, 0.0  ;;  %v3316_v6 = vmul.f32 %v12034_v14, %v3245_v34  ;;  %v12439_v18 = vld [vmem:[#allocation2 + $0x109] sm:$0xff] }
 0x22f   : > { %3434 = vst.msk [vmem:[#allocation2 + $0x141] sm:$0xff] %vm504_vm1, %v3346_v46  ;;  %v3244_v11 = vadd.f32 %v12014_v61, %v3205_v17  ;;  %v12441_v22 = vld [vmem:[#allocation2 + $0x108] sm:$0xff]  ;;  %v12443_v59 = vld [vmem:[#allocation2 + $0x110] sm:$0xff]  ;;  %v2895_v62 = vadd.f32 %v2856_v38, %v2619_v63  ;;  %3433 = vst.msk [vmem:[#allocation2 + $0x139] sm:$0xff] %vm504_vm1, %v3345_v16  ;;  %v3208_v51 = vmul.f32 %v11995_v39, %v3169_v52  ;;  %v9157_v5 = vpop.f32.mrf.mxu0  ;;  %9207 = vmatprep.mubr.msk.f32.mxu1 %vm504_vm1, %v12439_v18 }
 0x230   : > { %v3168_v9 = vadd.f32 %v3121_v56, %v2893_v60  ;;  %9271 = vmatprep.mubr.msk.f32.mxu0 %vm504_vm1, %v12441_v22  ;;  %v3348_v58 = vsel %vm3277_vm15, %v3245_v34, %v3316_v6  ;;  %v3171_v17 = vadd.f32 %v9157_v5, %v2896_v27  ;;  %v12452_v46 = vld [vmem:[#allocation2 + $0x111] sm:$0xff] }
 0x231   : > { %vm3276_vm0 = vcmp.gt.f32.partialorder %v3244_v11, 0.0  ;;  %v3315_v28 = vmul.f32 %v12034_v14, %v3244_v11  ;;  %3436 = vst.msk [vmem:[#allocation2 + $0x159] sm:$0xff] %vm504_vm1, %v3348_v58  ;;  %v3247_v63 = vadd.f32 %v12014_v61, %v3208_v51  ;;  %9208 = vmatmul.mubr.msk.f32.gmra.mxu1 %vm504_vm1, %v12452_v46  ;;  %v3131_v38 = vpop.f32.mrf.mxu0 }
 0x232   : > { %v3207_v60 = vmul.f32 %v11995_v39, %v3168_v9  ;;  %9272 = vmatmul.mubr.msk.f32.gmra.mxu0 %vm504_vm1, %v12443_v59  ;;  %v3210_v52 = vmul.f32 %v11995_v39, %v3171_v17  ;;  %v3170_v56 = vadd.f32 %v3131_v38, %v2895_v62  ;;  %v12477_v62 = vld [vmem:[#allocation2 + $0x129] sm:$0xff] }
 0x233   : > { %v3347_v34 = vsel %vm3276_vm0, %v3244_v11, %v3315_v28  ;;  %vm3279_vm2 = vcmp.gt.f32.partialorder %v3247_v63, 0.0  ;;  %v3318_v27 = vmul.f32 %v12034_v14, %v3247_v63  ;;  %v12465_v6 = vld [vmem:[#allocation2 + $0x121] sm:$0xff] }
 0x234   : > { %3435 = vst.msk [vmem:[#allocation2 + $0x151] sm:$0xff] %vm504_vm1, %v3347_v34  ;;  %v3246_v16 = vadd.f32 %v12014_v61, %v3207_v60  ;;  %v12467_v51 = vld [vmem:[#allocation2 + $0x120] sm:$0xff]  ;;  %v12469_v9 = vld [vmem:[#allocation2 + $0x128] sm:$0xff]  ;;  %v3249_v5 = vadd.f32 %v12014_v61, %v3210_v52  ;;  %v3209_v11 = vmul.f32 %v11995_v39, %v3170_v56  ;;  %9210 = vmatprep.mubr.msk.f32.mxu1 %vm504_vm1, %v12465_v6 }
 0x235   : > { %9274 = vmatprep.mubr.msk.f32.mxu0 %vm504_vm1, %v12467_v51  ;;  %v3350_v58 = vsel %vm3279_vm2, %v3247_v63, %v3318_v27  ;;  %9211 = vmatmul.mubr.msk.f32.gmra.mxu1 %vm504_vm1, %v12477_v62 }
 0x236   : > { %vm3278_vm3 = vcmp.gt.f32.partialorder %v3246_v16, 0.0  ;;  %v3317_v28 = vmul.f32 %v12034_v14, %v3246_v16  ;;  %9275 = vmatmul.mubr.msk.f32.gmra.mxu0 %vm504_vm1, %v12469_v9  ;;  %3438 = vst.msk [vmem:[#allocation2 + $0x171] sm:$0xff] %vm504_vm1, %v3350_v58  ;;  %vm3281_vm4 = vcmp.gt.f32.partialorder %v3249_v5, 0.0  ;;  %v3320_v39 = vmul.f32 %v12034_v14, %v3249_v5  ;;  %v12487_v60 = vld [vmem:[#allocation2 + $0x139] sm:$0xff] }
 0x237   : > { %v3248_v17 = vadd.f32 %v12014_v61, %v3209_v11  ;;  %v12489_v38 = vld [vmem:[#allocation2 + $0x138] sm:$0xff]  ;;  %v12491_v63 = vld [vmem:[#allocation2 + $0x140] sm:$0xff]  ;;  %9213 = vmatprep.mubr.msk.f32.mxu1 %vm504_vm1, %v12487_v60 }
 0x238   : > { %v3349_v34 = vsel %vm3278_vm3, %v3246_v16, %v3317_v28  ;;  %9277 = vmatprep.mubr.msk.f32.mxu0 %vm504_vm1, %v12489_v38  ;;  %v3352_v52 = vsel %vm3281_vm4, %v3249_v5, %v3320_v39  ;;  %v12499_v61 = vld [vmem:[#allocation2 + $0x141] sm:$0xff] }
 0x239   : > { %3437 = vst.msk [vmem:[#allocation2 + $0x169] sm:$0xff] %vm504_vm1, %v3349_v34  ;;  %vm3280_vm5 = vcmp.gt.f32.partialorder %v3248_v17, 0.0  ;;  %v3319_v56 = vmul.f32 %v12034_v14, %v3248_v17  ;;  %3440 = vst.msk [vmem:[#allocation2 + $0x189] sm:$0xff] %vm504_vm1, %v3352_v52  ;;  %9214 = vmatmul.mubr.msk.f32.gmra.mxu1 %vm504_vm1, %v12499_v61  ;;  %v12517_v14 = vld [vmem:[#allocation2 + $0x159] sm:$0xff]  ;;  %v4164_v5 = vld [vmem:[#allocation2 + $0x2] sm:$0xff] }
 0x23a   : > { %9278 = vmatmul.mubr.msk.f32.gmra.mxu0 %vm504_vm1, %v12491_v63  ;;  %14248 = vst [vmem:[#allocation41_spill] sm:$0xff] %v12517_v14  ;;  %v4165_v52 = vld [vmem:[#allocation2 + $0xa] sm:$0xff] }
 0x23b   : > { %v3351_v27 = vsel %vm3280_vm5, %v3248_v17, %v3319_v56  ;;  %v12506_v16 = vld [vmem:[#allocation2 + $0x151] sm:$0xff] }
 0x23c   : > { %v12508_v11 = vld [vmem:[#allocation2 + $0x150] sm:$0xff]  ;;  %v12510_v58 = vld [vmem:[#allocation2 + $0x158] sm:$0xff]  ;;  %3439 = vst.msk [vmem:[#allocation2 + $0x181] sm:$0xff] %vm504_vm1, %v3351_v27  ;;  %9216 = vmatprep.mubr.msk.f32.mxu1 %vm504_vm1, %v12506_v16 }
 0x23d   : > { %9280 = vmatprep.mubr.msk.f32.mxu0 %vm504_vm1, %v12508_v11  ;;  %9217 = vmatmul.mubr.msk.f32.gmra.mxu1 %vm504_vm1, %v12517_v14  ;;  %v12533_v34 = vld [vmem:[#allocation2 + $0x171] sm:$0xff] }
 0x23e   : > { %9281 = vmatmul.mubr.msk.f32.gmra.mxu0 %vm504_vm1, %v12510_v58  ;;  %14250 = vst [vmem:[#allocation43_spill] sm:$0xff] %v12533_v34 }
 0x240   : > { %v12523_v28 = vld [vmem:[#allocation2 + $0x169] sm:$0xff] }
 0x241   : > { %14249 = vst [vmem:[#allocation42_spill] sm:$0xff] %v12523_v28  ;;  %v12525_v39 = vld [vmem:[#allocation2 + $0x168] sm:$0xff]  ;;  %v12527_v17 = vld [vmem:[#allocation2 + $0x170] sm:$0xff]  ;;  %9219 = vmatprep.mubr.msk.f32.mxu1 %vm504_vm1, %v12523_v28  ;;  %v12545_v28 = vld [vmem:[#allocation2 + $0x1a] sm:$0xff] }
 0x242   : > { %9283 = vmatprep.mubr.msk.f32.mxu0 %vm504_vm1, %v12525_v39  ;;  %9220 = vmatmul.mubr.msk.f32.gmra.mxu1 %vm504_vm1, %v12533_v34  ;;  %v7660_v34 = vld [vmem:[%s13854_s2 + $0x130] sm:$0xff] }
 0x243   : > { %9284 = vmatmul.mubr.msk.f32.gmra.mxu0 %vm504_vm1, %v12527_v17  ;;  %9302 = vmatprep.mubr.msk.f32.mxu1 %vm504_vm1, %v4164_v5  ;;  %v12563_v5 = vld [vmem:[#allocation2 + $0x22] sm:$0xff] }
 0x244   : > { %9366 = vmatprep.mubr.msk.f32.mxu0 %vm504_vm1, %v12118_v20  ;;  %v7700_v20 = vld [vmem:[%s13854_s2 + $0x170] sm:$0xff] }
 0x245   : > { %v9176_v56 = vpop.f32.mrf.mxu1  ;;  %v9240_v27 = vpop.f32.mrf.mxu0 }
 0x246   : > { %9303 = vmatmul.mubr.msk.f32.vlgmr.msra.gmra.mxu1 %vm504_vm1, %v4165_v52  ;;  %v12553_v14 = vadd.f32 %v9240_v27, %v9176_v56  ;;  %v12569_v52 = vld [vmem:[#allocation2 + $0x32] sm:$0xff]  ;;  %v12581_v56 = vld [vmem:[#allocation2 + $0x3a] sm:$0xff] }
 0x247   : > { %9367 = vmatmul.mubr.msk.f32.vlgmr.msra.gmra.mxu0 %vm504_vm1, %v12120_v49  ;;  %9305 = vmatprep.mubr.msk.f32.mxu1 %vm504_vm1, %v12545_v28  ;;  %v9798_v49 = vld [vmem:[%s13854_s2 + $0x138] sm:$0xff]  ;;  %v7658_v27 = vld [vmem:[%s13854_s2 + $0x120] sm:$0xff] }
 0x248   : > { %9369 = vmatprep.mubr.msk.f32.mxu0 %vm504_vm1, %v12162_v44  ;;  %9415 = vmatpush3.msra.mxu1 %v9798_v49  ;;  %v7659_v44 = vld [vmem:[%s13854_s2 + $0x128] sm:$0xff] }
 0x249   : > { %9479 = vmatpush3.msra.mxu0 %v12019_v25  ;;  %9416 = vmatprep.subr.mxu1 %v7660_v34  ;;  %v7699_v25 = vld [vmem:[%s13854_s2 + $0x168] sm:$0xff] }
 0x24a   : > { %9480 = vmatprep.subr.mxu0 %v7700_v20  ;;  %9306 = vmatmul.mubr.msk.f32.gmra.mxu1 %vm504_vm1, %v12563_v5  ;;  %v12617_v49 = vld [vmem:[#allocation2 + $0x6a] sm:$0xff] }
 0x24b   : > { %9370 = vmatmul.mubr.msk.f32.gmra.mxu0 %vm504_vm1, %v12164_v2  ;;  %9308 = vmatprep.mubr.msk.f32.mxu1 %vm504_vm1, %v12569_v52  ;;  %v12587_v2 = vld [vmem:[#allocation2 + $0x4a] sm:$0xff] }
 0x24c   : > { %9372 = vmatprep.mubr.msk.f32.mxu0 %vm504_vm1, %v12190_v26  ;;  %9417 = vmatpush3.msra.mxu1 %v7660_v34  ;;  %v7698_v26 = vld [vmem:[%s13854_s2 + $0x160] sm:$0xff]  ;;  %v12599_v34 = vld [vmem:[#allocation2 + $0x52] sm:$0xff] }
 0x24d   : > { %9481 = vmatpush3.msra.mxu0 %v7700_v20  ;;  %9418 = vmatprep.subr.mxu1 %v7659_v44  ;;  %v7657_v20 = vld [vmem:[%s13854_s2 + $0x118] sm:$0xff] }
 0x24e   : > { %9482 = vmatprep.subr.mxu0 %v7699_v25  ;;  %9309 = vmatmul.mubr.msk.f32.gmra.mxu1 %vm504_vm1, %v12581_v56 }
 0x24f   : > { %9373 = vmatmul.mubr.msk.f32.gmra.mxu0 %vm504_vm1, %v12192_v32  ;;  %9311 = vmatprep.mubr.msk.f32.mxu1 %vm504_vm1, %v12587_v2  ;;  %v12605_v32 = vld [vmem:[#allocation2 + $0x62] sm:$0xff] }
 0x250   : > { %9375 = vmatprep.mubr.msk.f32.mxu0 %vm504_vm1, %v12222_v12  ;;  %9419 = vmatpush3.msra.mxu1 %v7659_v44  ;;  %v7697_v12 = vld [vmem:[%s13854_s2 + $0x158] sm:$0xff]  ;;  %v7656_v44 = vld [vmem:[%s13854_s2 + $0x110] sm:$0xff] }
 0x251   : > { %9483 = vmatpush3.msra.mxu0 %v7699_v25  ;;  %9420 = vmatprep.subr.mxu1 %v7658_v27  ;;  %v12635_v25 = vld [vmem:[#allocation2 + $0x82] sm:$0xff] }
 0x252   : > { %9484 = vmatprep.subr.mxu0 %v7698_v26  ;;  %9312 = vmatmul.mubr.msk.f32.gmra.mxu1 %vm504_vm1, %v12599_v34 }
 0x253   : > { %9376 = vmatmul.mubr.msk.f32.gmra.mxu0 %vm504_vm1, %v12224_v54  ;;  %9314 = vmatprep.mubr.msk.f32.mxu1 %vm504_vm1, %v12605_v32  ;;  %v12623_v54 = vld [vmem:[#allocation2 + $0x7a] sm:$0xff] }
 0x254   : > { %9378 = vmatprep.mubr.msk.f32.mxu0 %vm504_vm1, %v12265_v45  ;;  %9421 = vmatpush3.msra.mxu1 %v7658_v27  ;;  %v7696_v45 = vld [vmem:[%s13854_s2 + $0x150] sm:$0xff]  ;;  %v7655_v27 = vld [vmem:[%s13854_s2 + $0x108] sm:$0xff] }
 0x255   : > { %9485 = vmatpush3.msra.mxu0 %v7698_v26  ;;  %9422 = vmatprep.subr.mxu1 %v7657_v20  ;;  %v12653_v26 = vld [vmem:[#allocation2 + $0x9a] sm:$0xff] }
 0x256   : > { %9486 = vmatprep.subr.mxu0 %v7697_v12  ;;  %9315 = vmatmul.mubr.msk.f32.gmra.mxu1 %vm504_vm1, %v12617_v49 }
 0x257   : > { %9379 = vmatmul.mubr.msk.f32.gmra.mxu0 %vm504_vm1, %v12267_v40  ;;  %9317 = vmatprep.mubr.msk.f32.mxu1 %vm504_vm1, %v12623_v54  ;;  %v12641_v40 = vld [vmem:[#allocation2 + $0x92] sm:$0xff] }
 0x258   : > { %9381 = vmatprep.mubr.msk.f32.mxu0 %vm504_vm1, %v12294_v53  ;;  %9423 = vmatpush3.msra.mxu1 %v7657_v20  ;;  %v7695_v53 = vld [vmem:[%s13854_s2 + $0x148] sm:$0xff]  ;;  %v7654_v20 = vld [vmem:[%s13854_s2 + $0x100] sm:$0xff] }
 0x259   : > { %9487 = vmatpush3.msra.mxu0 %v7697_v12  ;;  %9424 = vmatprep.subr.mxu1 %v7656_v44  ;;  %v12671_v12 = vld [vmem:[#allocation2 + $0xb2] sm:$0xff] }
 0x25a   : > { %9488 = vmatprep.subr.mxu0 %v7696_v45  ;;  %9318 = vmatmul.mubr.msk.f32.gmra.mxu1 %vm504_vm1, %v12635_v25 }
 0x25b   : > { %9382 = vmatmul.mubr.msk.f32.gmra.mxu0 %vm504_vm1, %v12296_v13  ;;  %9320 = vmatprep.mubr.msk.f32.mxu1 %vm504_vm1, %v12641_v40  ;;  %v12659_v13 = vld [vmem:[#allocation2 + $0xaa] sm:$0xff] }
 0x25c   : > { %9384 = vmatprep.mubr.msk.f32.mxu0 %vm504_vm1, %v12333_v0  ;;  %9425 = vmatpush3.msra.mxu1 %v7656_v44  ;;  %v7694_v0 = vld [vmem:[%s13854_s2 + $0x140] sm:$0xff]  ;;  %v12682_v44 = vld [vmem:[%s13854_s2 + $0x1b8] sm:$0xff] }
 0x25d   : > { %9489 = vmatpush3.msra.mxu0 %v7696_v45  ;;  %9426 = vmatprep.subr.mxu1 %v7655_v27  ;;  %v12698_v45 = vld [vmem:[#allocation2 + $0xda] sm:$0xff] }
 0x25e   : > { %9490 = vmatprep.subr.mxu0 %v7695_v53  ;;  %9321 = vmatmul.mubr.msk.f32.gmra.mxu1 %vm504_vm1, %v12653_v26 }
 0x25f   : > { %9385 = vmatmul.mubr.msk.f32.gmra.mxu0 %vm504_vm1, %v12335_v10  ;;  %9323 = vmatprep.mubr.msk.f32.mxu1 %vm504_vm1, %v12659_v13  ;;  %v12677_v10 = vld [vmem:[#allocation2 + $0xc2] sm:$0xff] }
 0x260   : > { %9387 = vmatprep.mubr.msk.f32.mxu0 %vm504_vm1, %v12358_v23  ;;  %9427 = vmatpush3.msra.mxu1 %v7655_v27  ;;  %v7781_v23 = vld [vmem:[%s13854_s2 + $0x1f8] sm:$0xff] }
 0x261   : > { %9491 = vmatpush3.msra.mxu0 %v7695_v53  ;;  %9428 = vmatprep.subr.mxu1 %v7654_v20  ;;  %v12710_v27 = vld [vmem:[#allocation2 + $0xf2] sm:$0xff]  ;;  %v12772_v53 = vld [vmem:[#allocation2 + $0x180] sm:$0xff] }
 0x262   : > { %9492 = vmatprep.subr.mxu0 %v7694_v0  ;;  %9324 = vmatmul.mubr.msk.f32.gmra.mxu1 %vm504_vm1, %v12671_v12 }
 0x263   : > { %9388 = vmatmul.mubr.msk.f32.gmra.mxu0 %vm504_vm1, %v12360_v36  ;;  %9326 = vmatprep.mubr.msk.f32.mxu1 %vm504_vm1, %v12677_v10  ;;  %v12691_v36 = vld [vmem:[#allocation2 + $0xca] sm:$0xff] }
 0x264   : > { %9390 = vmatprep.mubr.msk.f32.mxu0 %vm504_vm1, %v12386_v1  ;;  %9429 = vmatpush3.msra.mxu1 %v7654_v20  ;;  %v12704_v1 = vld [vmem:[#allocation2 + $0xe2] sm:$0xff]  ;;  %v7780_v20 = vld [vmem:[%s13854_s2 + $0x1f0] sm:$0xff] }
 0x265   : > { %9493 = vmatpush3.msra.mxu0 %v7694_v0  ;;  %9542 = vmatprep.subr.mxu1 %v12682_v44 }
 0x266   : > { %9606 = vmatprep.subr.mxu0 %v7781_v23  ;;  %9327 = vmatmul.mubr.msk.f32.gmra.mxu1 %vm504_vm1, %v12691_v36 }
 0x267   : > { %9391 = vmatmul.mubr.msk.f32.gmra.mxu0 %vm504_vm1, %v12388_v31  ;;  %9329 = vmatprep.mubr.msk.f32.mxu1 %vm504_vm1, %v12698_v45  ;;  %v12716_v31 = vld [vmem:[#allocation2 + $0xfa] sm:$0xff] }
 0x268   : > { %9393 = vmatprep.mubr.msk.f32.mxu0 %vm504_vm1, %v12417_v4  ;;  %v12722_v4 = vld [vmem:[#allocation2 + $0x10a] sm:$0xff] }
 0x26a   : > { %9330 = vmatmul.mubr.msk.f32.gmra.mxu1 %vm504_vm1, %v12704_v1 }
 0x26b   : > { %9394 = vmatmul.mubr.msk.f32.gmra.mxu0 %vm504_vm1, %v12419_v48  ;;  %9332 = vmatprep.mubr.msk.f32.mxu1 %vm504_vm1, %v12710_v27  ;;  %v12728_v48 = vld [vmem:[#allocation2 + $0x112] sm:$0xff] }
 0x26c   : > { %9396 = vmatprep.mubr.msk.f32.mxu0 %vm504_vm1, %v12441_v22  ;;  %v12734_v22 = vld [vmem:[#allocation2 + $0x122] sm:$0xff] }
 0x26e   : > { %9333 = vmatmul.mubr.msk.f32.gmra.mxu1 %vm504_vm1, %v12716_v31 }
 0x26f   : > { %9397 = vmatmul.mubr.msk.f32.gmra.mxu0 %vm504_vm1, %v12443_v59  ;;  %9335 = vmatprep.mubr.msk.f32.mxu1 %vm504_vm1, %v12722_v4  ;;  %v12740_v59 = vld [vmem:[#allocation2 + $0x12a] sm:$0xff] }
 0x270   : > { %9399 = vmatprep.mubr.msk.f32.mxu0 %vm504_vm1, %v12467_v51  ;;  %v12746_v51 = vld [vmem:[#allocation2 + $0x13a] sm:$0xff] }
 0x272   : > { %9336 = vmatmul.mubr.msk.f32.gmra.mxu1 %vm504_vm1, %v12728_v48 }
 0x273   : > { %9400 = vmatmul.mubr.msk.f32.gmra.mxu0 %vm504_vm1, %v12469_v9  ;;  %9338 = vmatprep.mubr.msk.f32.mxu1 %vm504_vm1, %v12734_v22  ;;  %v12752_v9 = vld [vmem:[#allocation2 + $0x142] sm:$0xff] }
 0x274   : > { %9402 = vmatprep.mubr.msk.f32.mxu0 %vm504_vm1, %v12489_v38  ;;  %v12758_v38 = vld [vmem:[#allocation2 + $0x152] sm:$0xff] }
 0x276   : > { %9339 = vmatmul.mubr.msk.f32.gmra.mxu1 %vm504_vm1, %v12740_v59 }
 0x277   : > { %9403 = vmatmul.mubr.msk.f32.gmra.mxu0 %vm504_vm1, %v12491_v63  ;;  %9341 = vmatprep.mubr.msk.f32.mxu1 %vm504_vm1, %v12746_v51  ;;  %v12764_v63 = vld [vmem:[#allocation2 + $0x15a] sm:$0xff] }
 0x278   : > { %9405 = vmatprep.mubr.msk.f32.mxu0 %vm504_vm1, %v12508_v11  ;;  %v12770_v11 = vld [vmem:[#allocation2 + $0x16a] sm:$0xff] }
 0x27a   : > { %9342 = vmatmul.mubr.msk.f32.gmra.mxu1 %vm504_vm1, %v12752_v9 }
 0x27b   : > { %9406 = vmatmul.mubr.msk.f32.gmra.mxu0 %vm504_vm1, %v12510_v58  ;;  %9344 = vmatprep.mubr.msk.f32.mxu1 %vm504_vm1, %v12758_v38  ;;  %v12778_v58 = vld [vmem:[#allocation2 + $0x172] sm:$0xff] }
 0x27c   : > { %9408 = vmatprep.mubr.msk.f32.mxu0 %vm504_vm1, %v12525_v39  ;;  %v12780_v39 = vld [vmem:[#allocation2 + $0x188] sm:$0xff] }
 0x27e   : > { %9345 = vmatmul.mubr.msk.f32.gmra.mxu1 %vm504_vm1, %v12764_v63 }
 0x27f   : > { %9409 = vmatmul.mubr.msk.f32.gmra.mxu0 %vm504_vm1, %v12527_v17  ;;  %9347 = vmatprep.mubr.msk.f32.mxu1 %vm504_vm1, %v12770_v11  ;;  %v7740_v17 = vld [vmem:[%s13854_s2 + $0x1b0] sm:$0xff] }
 0x280   : > { %9411 = vmatprep.mubr.msk.f32.mxu0 %vm504_vm1, %v12772_v53 }
 0x282   : > { %9348 = vmatmul.mubr.msk.f32.gmra.mxu1 %vm504_vm1, %v12778_v58 }
 0x283   : > { %9412 = vmatmul.mubr.msk.f32.gmra.mxu0 %vm504_vm1, %v12780_v39  ;;  %9430 = vmatprep.mubr.msk.f32.mxu1 %vm504_vm1, %v12116_v21  ;;  %v7739_v21 = vld [vmem:[%s13854_s2 + $0x1a8] sm:$0xff] }
 0x284   : > { %9494 = vmatprep.mubr.msk.f32.mxu0 %vm504_vm1, %v12545_v28  ;;  %v6137_v28 = vld [vmem:[#allocation2 + $0x49] sm:$0xff] }
 0x286   : > { %9431 = vmatmul.mubr.msk.f32.vlgmr.msra.gmra.mxu1 %vm504_vm1, %v12131_v43  ;;  %v7779_v43 = vld [vmem:[%s13854_s2 + $0x1e8] sm:$0xff] }
 0x287   : > { %9495 = vmatmul.mubr.msk.f32.vlgmr.msra.gmra.mxu0 %vm504_vm1, %v12563_v5  ;;  %9433 = vmatprep.mubr.msk.f32.mxu1 %vm504_vm1, %v12160_v30  ;;  %v7738_v30 = vld [vmem:[%s13854_s2 + $0x1a0] sm:$0xff]  ;;  %v7820_v5 = vld [vmem:[%s13854_s2 + $0x230] sm:$0xff] }
 0x288   : > { %9497 = vmatprep.mubr.msk.f32.mxu0 %vm504_vm1, %v12569_v52  ;;  %9543 = vmatpush3.msra.mxu1 %v12682_v44  ;;  %v12975_v52 = vpop.f32.mrf.mxu1  ;;  %v6140_v44 = vld [vmem:[#allocation2 + $0x69] sm:$0xff] }
 0x289   : > { %9607 = vmatpush3.msra.mxu0 %v7781_v23  ;;  %9544 = vmatprep.subr.mxu1 %v7740_v17 }
 0x28a   : > { %9608 = vmatprep.subr.mxu0 %v7780_v20  ;;  %9434 = vmatmul.mubr.msk.f32.gmra.mxu1 %vm504_vm1, %v12175_v57  ;;  %v7778_v57 = vld [vmem:[%s13854_s2 + $0x1e0] sm:$0xff] }
 0x28b   : > { %9498 = vmatmul.mubr.msk.f32.gmra.mxu0 %vm504_vm1, %v12581_v56  ;;  %9436 = vmatprep.mubr.msk.f32.mxu1 %vm504_vm1, %v12188_v3  ;;  %v7737_v3 = vld [vmem:[%s13854_s2 + $0x198] sm:$0xff]  ;;  %v12977_v56 = vpop.f32.mrf.mxu0 }
 0x28c   : > { %9500 = vmatprep.mubr.msk.f32.mxu0 %vm504_vm1, %v12587_v2  ;;  %9545 = vmatpush3.msra.mxu1 %v7740_v17 }
 0x28d   : > { %9609 = vmatpush3.msra.mxu0 %v7780_v20  ;;  %9546 = vmatprep.subr.mxu1 %v7739_v21 }
 0x28e   : > { %9610 = vmatprep.subr.mxu0 %v7779_v43  ;;  %9437 = vmatmul.mubr.msk.f32.gmra.mxu1 %vm504_vm1, %v12207_v29  ;;  %v7777_v29 = vld [vmem:[%s13854_s2 + $0x1d8] sm:$0xff] }
 0x28f   : > { %9501 = vmatmul.mubr.msk.f32.gmra.mxu0 %vm504_vm1, %v12599_v34  ;;  %9439 = vmatprep.mubr.msk.f32.mxu1 %vm504_vm1, %v12220_v24  ;;  %v7736_v24 = vld [vmem:[%s13854_s2 + $0x190] sm:$0xff] }
 0x290   : > { %9503 = vmatprep.mubr.msk.f32.mxu0 %vm504_vm1, %v12605_v32  ;;  %9547 = vmatpush3.msra.mxu1 %v7739_v21  ;;  %v5744_v32 = vld [vmem:[#allocation2 + $0x50] sm:$0xff] }
 0x291   : > { %9611 = vmatpush3.msra.mxu0 %v7779_v43  ;;  %9548 = vmatprep.subr.mxu1 %v7738_v30 }
 0x292   : > { %9612 = vmatprep.subr.mxu0 %v7778_v57  ;;  %9440 = vmatmul.mubr.msk.f32.gmra.mxu1 %vm504_vm1, %v12242_v19  ;;  %v7776_v19 = vld [vmem:[%s13854_s2 + $0x1d0] sm:$0xff] }
 0x293   : > { %9504 = vmatmul.mubr.msk.f32.gmra.mxu0 %vm504_vm1, %v12617_v49  ;;  %9442 = vmatprep.mubr.msk.f32.mxu1 %vm504_vm1, %v12263_v50  ;;  %v7735_v50 = vld [vmem:[%s13854_s2 + $0x188] sm:$0xff]  ;;  %v6138_v49 = vld [vmem:[#allocation2 + $0x51] sm:$0xff] }
 0x294   : > { %9506 = vmatprep.mubr.msk.f32.mxu0 %vm504_vm1, %v12623_v54  ;;  %9549 = vmatpush3.msra.mxu1 %v7738_v30  ;;  %v5750_v30 = vld [vmem:[#allocation2 + $0x98] sm:$0xff] }
 0x295   : > { %9613 = vmatpush3.msra.mxu0 %v7778_v57  ;;  %9550 = vmatprep.subr.mxu1 %v7737_v3  ;;  %v6144_v57 = vld [vmem:[#allocation2 + $0x99] sm:$0xff] }
 0x296   : > { %9614 = vmatprep.subr.mxu0 %v7777_v29  ;;  %9443 = vmatmul.mubr.msk.f32.gmra.mxu1 %vm504_vm1, %v12279_v42  ;;  %v7775_v42 = vld [vmem:[%s13854_s2 + $0x1c8] sm:$0xff] }
 0x297   : > { %9507 = vmatmul.mubr.msk.f32.gmra.mxu0 %vm504_vm1, %v12635_v25  ;;  %9445 = vmatprep.mubr.msk.f32.mxu1 %vm504_vm1, %v12292_v15  ;;  %v7734_v15 = vld [vmem:[%s13854_s2 + $0x180] sm:$0xff] }
 0x298   : > { %9509 = vmatprep.mubr.msk.f32.mxu0 %vm504_vm1, %v12641_v40  ;;  %9551 = vmatpush3.msra.mxu1 %v7737_v3  ;;  %v5745_v25 = vld [vmem:[#allocation2 + $0x60] sm:$0xff] }
 0x299   : > { %9615 = vmatpush3.msra.mxu0 %v7777_v29  ;;  %9552 = vmatprep.subr.mxu1 %v7736_v24  ;;  %v6139_v40 = vld [vmem:[#allocation2 + $0x61] sm:$0xff] }
 0x29a   : > { %9616 = vmatprep.subr.mxu0 %v7776_v19  ;;  %9446 = vmatmul.mubr.msk.f32.gmra.mxu1 %vm504_vm1, %v12312_v33  ;;  %v7774_v33 = vld [vmem:[%s13854_s2 + $0x1c0] sm:$0xff] }
 0x29b   : > { %9510 = vmatmul.mubr.msk.f32.gmra.mxu0 %vm504_vm1, %v12653_v26  ;;  %9448 = vmatprep.mubr.msk.f32.mxu1 %vm504_vm1, %v12331_v55  ;;  %v7821_v55 = vld [vmem:[%s13854_s2 + $0x238] sm:$0xff]  ;;  %v7819_v26 = vld [vmem:[%s13854_s2 + $0x228] sm:$0xff] }
 0x29c   : > { %9512 = vmatprep.mubr.msk.f32.mxu0 %vm504_vm1, %v12659_v13  ;;  %9553 = vmatpush3.msra.mxu1 %v7736_v24  ;;  %v5751_v24 = vld [vmem:[#allocation2 + $0xa8] sm:$0xff] }
 0x29d   : > { %9617 = vmatpush3.msra.mxu0 %v7776_v19  ;;  %9554 = vmatprep.subr.mxu1 %v7735_v50  ;;  %v6145_v19 = vld [vmem:[#allocation2 + $0xa9] sm:$0xff] }
 0x29e   : > { %9618 = vmatprep.subr.mxu0 %v7775_v42  ;;  %9449 = vmatmul.mubr.msk.f32.gmra.mxu1 %vm504_vm1, %v12344_v37  ;;  %v14251_v37 = vld [vmem:[#allocation58_spill] sm:$0xff] }
 0x29f   : > { %9513 = vmatmul.mubr.msk.f32.gmra.mxu0 %vm504_vm1, %v12671_v12  ;;  %9451 = vmatprep.mubr.msk.f32.mxu1 %vm504_vm1, %v12356_v47  ;;  %v14252_v47 = vld [vmem:[#allocation41_spill] sm:$0xff] }
 0x2a0   : > { %9515 = vmatprep.mubr.msk.f32.mxu0 %vm504_vm1, %v12677_v10  ;;  %9555 = vmatpush3.msra.mxu1 %v7735_v50  ;;  %v5746_v10 = vld [vmem:[#allocation2 + $0x68] sm:$0xff]  ;;  %v7816_v50 = vld [vmem:[%s13854_s2 + $0x210] sm:$0xff] }
 0x2a1   : > { %9619 = vmatpush3.msra.mxu0 %v7775_v42  ;;  %9556 = vmatprep.subr.mxu1 %v7734_v15 }
 0x2a2   : > { %9620 = vmatprep.subr.mxu0 %v7774_v33  ;;  %9452 = vmatmul.mubr.msk.f32.gmra.mxu1 %vm504_vm1, %v12372_v8  ;;  %v14253_v8 = vld [vmem:[#allocation42_spill] sm:$0xff] }
 0x2a3   : > { %9516 = vmatmul.mubr.msk.f32.gmra.mxu0 %vm504_vm1, %v12691_v36  ;;  %9454 = vmatprep.mubr.msk.f32.mxu1 %vm504_vm1, %v12384_v41  ;;  %v14254_v41 = vld [vmem:[#allocation43_spill] sm:$0xff] }
 0x2a4   : > { %9518 = vmatprep.mubr.msk.f32.mxu0 %vm504_vm1, %v12698_v45  ;;  %9557 = vmatpush3.msra.mxu1 %v7734_v15  ;;  %v5747_v45 = vld [vmem:[#allocation2 + $0x78] sm:$0xff] }
 0x2a5   : > { %9621 = vmatpush3.msra.mxu0 %v7774_v33  ;;  %9670 = vmatprep.subr.mxu1 %v7821_v55 }
 0x2a6   : > { %9455 = vmatmul.mubr.msk.f32.gmra.mxu1 %vm504_vm1, %v14251_v37  ;;  %v5752_v37 = vld [vmem:[#allocation2 + $0xb0] sm:$0xff] }
 0x2a7   : > { %9519 = vmatmul.mubr.msk.f32.gmra.mxu0 %vm504_vm1, %v12704_v1  ;;  %9457 = vmatprep.mubr.msk.f32.mxu1 %vm504_vm1, %v12415_v7  ;;  %v12952_v7 = vld [vmem:[#allocation2 + $0x181] sm:$0xff]  ;;  %v6141_v1 = vld [vmem:[#allocation2 + $0x79] sm:$0xff] }
 0x2a8   : > { %9521 = vmatprep.mubr.msk.f32.mxu0 %vm504_vm1, %v12710_v27  ;;  %v7818_v27 = vld [vmem:[%s13854_s2 + $0x220] sm:$0xff] }
 0x2aa   : > { %9458 = vmatmul.mubr.msk.f32.gmra.mxu1 %vm504_vm1, %v12429_v35  ;;  %v12954_v35 = vld [vmem:[#allocation2 + $0x182] sm:$0xff] }
 0x2ab   : > { %9522 = vmatmul.mubr.msk.f32.gmra.mxu0 %vm504_vm1, %v12716_v31  ;;  %9460 = vmatprep.mubr.msk.f32.mxu1 %vm504_vm1, %v12439_v18  ;;  %v12960_v18 = vld [vmem:[#allocation2 + $0x189] sm:$0xff] }
 0x2ac   : > { %9524 = vmatprep.mubr.msk.f32.mxu0 %vm504_vm1, %v12722_v4 }
 0x2ae   : > { %9461 = vmatmul.mubr.msk.f32.gmra.mxu1 %vm504_vm1, %v12452_v46  ;;  %v12962_v46 = vld [vmem:[#allocation2 + $0x18a] sm:$0xff] }
 0x2af   : > { %9525 = vmatmul.mubr.msk.f32.gmra.mxu0 %vm504_vm1, %v12728_v48  ;;  %9463 = vmatprep.mubr.msk.f32.mxu1 %vm504_vm1, %v12465_v6  ;;  %v5741_v6 = vld [vmem:[#allocation2 + $0x30] sm:$0xff] }
 0x2b0   : > { %9527 = vmatprep.mubr.msk.f32.mxu0 %vm504_vm1, %v12734_v22 }
 0x2b2   : > { %9464 = vmatmul.mubr.msk.f32.gmra.mxu1 %vm504_vm1, %v12477_v62  ;;  %v6135_v62 = vld [vmem:[#allocation2 + $0x31] sm:$0xff] }
 0x2b3   : > { %9528 = vmatmul.mubr.msk.f32.gmra.mxu0 %vm504_vm1, %v12740_v59  ;;  %9466 = vmatprep.mubr.msk.f32.mxu1 %vm504_vm1, %v12487_v60  ;;  %v5742_v60 = vld [vmem:[#allocation2 + $0x38] sm:$0xff]  ;;  %v5748_v59 = vld [vmem:[#allocation2 + $0x80] sm:$0xff] }
 0x2b4   : > { %9530 = vmatprep.mubr.msk.f32.mxu0 %vm504_vm1, %v12746_v51  ;;  %v6142_v51 = vld [vmem:[#allocation2 + $0x81] sm:$0xff] }
 0x2b6   : > { %9467 = vmatmul.mubr.msk.f32.gmra.mxu1 %vm504_vm1, %v12499_v61  ;;  %v6136_v61 = vld [vmem:[#allocation2 + $0x39] sm:$0xff] }
 0x2b7   : > { %9531 = vmatmul.mubr.msk.f32.gmra.mxu0 %vm504_vm1, %v12752_v9  ;;  %9469 = vmatprep.mubr.msk.f32.mxu1 %vm504_vm1, %v12506_v16  ;;  %v5743_v16 = vld [vmem:[#allocation2 + $0x48] sm:$0xff] }
 0x2b8   : > { %9533 = vmatprep.mubr.msk.f32.mxu0 %vm504_vm1, %v12758_v38 }
 0x2ba   : > { %9470 = vmatmul.mubr.msk.f32.gmra.mxu1 %vm504_vm1, %v14252_v47  ;;  %v6146_v47 = vld [vmem:[#allocation2 + $0xb1] sm:$0xff] }
 0x2bb   : > { %9534 = vmatmul.mubr.msk.f32.gmra.mxu0 %vm504_vm1, %v12764_v63  ;;  %9472 = vmatprep.mubr.msk.f32.mxu1 %vm504_vm1, %v14253_v8  ;;  %v5749_v63 = vld [vmem:[#allocation2 + $0x90] sm:$0xff] }
 0x2bc   : > { %9536 = vmatprep.mubr.msk.f32.mxu0 %vm504_vm1, %v12770_v11  ;;  %v6143_v11 = vld [vmem:[#allocation2 + $0x91] sm:$0xff] }
 0x2be   : > { %9473 = vmatmul.mubr.msk.f32.gmra.mxu1 %vm504_vm1, %v14254_v41 }
 0x2bf   : > { %9537 = vmatmul.mubr.msk.f32.gmra.mxu0 %vm504_vm1, %v12778_v58  ;;  %9475 = vmatprep.mubr.msk.f32.mxu1 %vm504_vm1, %v12952_v7  ;;  %v7817_v58 = vld [vmem:[%s13854_s2 + $0x218] sm:$0xff] }
 0x2c0   : > { %9539 = vmatprep.mubr.msk.f32.mxu0 %vm504_vm1, %v12954_v35 }
 0x2c2   : > { %9476 = vmatmul.mubr.msk.f32.gmra.mxu1 %vm504_vm1, %v12960_v18 }
 0x2c3   : > { %9540 = vmatmul.mubr.msk.f32.gmra.mxu0 %vm504_vm1, %v12962_v46  ;;  %9558 = vmatprep.mubr.msk.f32.mxu1 %vm504_vm1, %v5741_v6  ;;  %v5753_v6 = vld [vmem:[#allocation2 + $0xc0] sm:$0xff] }
 0x2c4   : > { %9622 = vmatprep.mubr.msk.f32.mxu0 %vm504_vm1, %v6135_v62  ;;  %v6147_v62 = vld [vmem:[#allocation2 + $0xc1] sm:$0xff] }
 0x2c6   : > { %9559 = vmatmul.mubr.msk.f32.vlgmr.msra.gmra.mxu1 %vm504_vm1, %v5742_v60  ;;  %v7815_v60 = vld [vmem:[%s13854_s2 + $0x208] sm:$0xff] }
 0x2c7   : > { %9623 = vmatmul.mubr.msk.f32.vlgmr.msra.gmra.mxu0 %vm504_vm1, %v6136_v61  ;;  %9561 = vmatprep.mubr.msk.f32.mxu1 %vm504_vm1, %v5743_v16 }
 0x2c8   : > { %9625 = vmatprep.mubr.msk.f32.mxu0 %vm504_vm1, %v6137_v28  ;;  %9671 = vmatpush3.msra.mxu1 %v7821_v55  ;;  %v9179_v2 = vpop.f32.mrf.mxu1 }
 0x2c9   : > { %v9243_v34 = vpop.f32.mrf.mxu0  ;;  %9672 = vmatprep.subr.mxu1 %v7820_v5 }
 0x2ca   : > { %v12981_v54 = vadd.f32 %v9243_v34, %v9179_v2  ;;  %9562 = vmatmul.mubr.msk.f32.gmra.mxu1 %vm504_vm1, %v5744_v32  ;;  %v3694_v13 = vpop.f32.mrf.mxu1  ;;  %v5754_v2 = vld [vmem:[#allocation2 + $0xc8] sm:$0xff] }
 0x2cb   : > { %9626 = vmatmul.mubr.msk.f32.gmra.mxu0 %vm504_vm1, %v6138_v49  ;;  %9564 = vmatprep.mubr.msk.f32.mxu1 %vm504_vm1, %v5745_v25  ;;  %v4015_v0 = vpop.f32.mrf.mxu0  ;;  %v6148_v34 = vld [vmem:[#allocation2 + $0xc9] sm:$0xff]  ;;  %v5755_v25 = vld [vmem:[#allocation2 + $0xd8] sm:$0xff] }
 0x2cc   : > { %9628 = vmatprep.mubr.msk.f32.mxu0 %vm504_vm1, %v6139_v40  ;;  %v12990_v12 = vadd.f32 %v4015_v0, %v3694_v13  ;;  %9673 = vmatpush3.msra.mxu1 %v7820_v5  ;;  %v6149_v40 = vld [vmem:[#allocation2 + $0xd9] sm:$0xff] }
 0x2cd   : > { %9674 = vmatprep.subr.mxu1 %v7819_v26  ;;  %v9182_v23 = vpop.f32.mrf.mxu1 }
 0x2ce   : > { %v9246_v36 = vpop.f32.mrf.mxu0  ;;  %9565 = vmatmul.mubr.msk.f32.gmra.mxu1 %vm504_vm1, %v5746_v10 }
 0x2cf   : > { %9629 = vmatmul.mubr.msk.f32.gmra.mxu0 %vm504_vm1, %v6140_v44  ;;  %v12997_v31 = vadd.f32 %v9246_v36, %v9182_v23  ;;  %9567 = vmatprep.mubr.msk.f32.mxu1 %vm504_vm1, %v5747_v45  ;;  %v3704_v4 = vpop.f32.mrf.mxu1  ;;  %v5756_v23 = vld [vmem:[#allocation2 + $0xe0] sm:$0xff] }
 0x2d0   : > { %9631 = vmatprep.mubr.msk.f32.mxu0 %vm504_vm1, %v6141_v1  ;;  %v4025_v48 = vpop.f32.mrf.mxu0  ;;  %9675 = vmatpush3.msra.mxu1 %v7819_v26  ;;  %v7814_v26 = vld [vmem:[%s13854_s2 + $0x200] sm:$0xff] }
 0x2d1   : > { %v13001_v22 = vadd.f32 %v4025_v48, %v3704_v4  ;;  %9676 = vmatprep.subr.mxu1 %v7818_v27  ;;  %v9185_v9 = vpop.f32.mrf.mxu1  ;;  %v6150_v36 = vld [vmem:[#allocation2 + $0xe1] sm:$0xff]  ;;  %v6151_v4 = vld [vmem:[#allocation2 + $0xf1] sm:$0xff] }
 0x2d2   : > { %v9249_v38 = vpop.f32.mrf.mxu0  ;;  %9568 = vmatmul.mubr.msk.f32.gmra.mxu1 %vm504_vm1, %v5748_v59 }
 0x2d3   : > { %9632 = vmatmul.mubr.msk.f32.gmra.mxu0 %vm504_vm1, %v6142_v51  ;;  %v13008_v17 = vadd.f32 %v9249_v38, %v9185_v9  ;;  %9570 = vmatprep.mubr.msk.f32.mxu1 %vm504_vm1, %v5749_v63  ;;  %v3714_v20 = vpop.f32.mrf.mxu1  ;;  %v5758_v38 = vld [vmem:[#allocation2 + $0xf8] sm:$0xff] }
 0x2d4   : > { %9634 = vmatprep.mubr.msk.f32.mxu0 %vm504_vm1, %v6143_v11  ;;  %v4035_v21 = vpop.f32.mrf.mxu0  ;;  %9677 = vmatpush3.msra.mxu1 %v7818_v27  ;;  %v5757_v27 = vld [vmem:[#allocation2 + $0xf0] sm:$0xff]  ;;  %v6152_v63 = vld [vmem:[#allocation2 + $0xf9] sm:$0xff] }
 0x2d5   : > { %v13012_v43 = vadd.f32 %v4035_v21, %v3714_v20  ;;  %9678 = vmatprep.subr.mxu1 %v7817_v58  ;;  %v9188_v3 = vpop.f32.mrf.mxu1  ;;  %v5759_v20 = vld [vmem:[#allocation2 + $0x108] sm:$0xff] }
 0x2d6   : > { %v9252_v29 = vpop.f32.mrf.mxu0  ;;  %9571 = vmatmul.mubr.msk.f32.gmra.mxu1 %vm504_vm1, %v5750_v30  ;;  %v6153_v21 = vld [vmem:[#allocation2 + $0x109] sm:$0xff] }
 0x2d7   : > { %9635 = vmatmul.mubr.msk.f32.gmra.mxu0 %vm504_vm1, %v6144_v57  ;;  %v13019_v42 = vadd.f32 %v9252_v29, %v9188_v3  ;;  %9573 = vmatprep.mubr.msk.f32.mxu1 %vm504_vm1, %v5751_v24  ;;  %v3724_v15 = vpop.f32.mrf.mxu1  ;;  %v5760_v24 = vld [vmem:[#allocation2 + $0x110] sm:$0xff] }
 0x2d8   : > { %9637 = vmatprep.mubr.msk.f32.mxu0 %vm504_vm1, %v6145_v19  ;;  %v4045_v33 = vpop.f32.mrf.mxu0  ;;  %9679 = vmatpush3.msra.mxu1 %v7817_v58  ;;  %v6154_v19 = vld [vmem:[#allocation2 + $0x111] sm:$0xff] }
 0x2d9   : > { %v13023_v55 = vadd.f32 %v4045_v33, %v3724_v15  ;;  %9680 = vmatprep.subr.mxu1 %v7816_v50  ;;  %v9191_v8 = vpop.f32.mrf.mxu1  ;;  %v5761_v33 = vld [vmem:[#allocation2 + $0x120] sm:$0xff] }
 0x2da   : > { %v9255_v41 = vpop.f32.mrf.mxu0  ;;  %9574 = vmatmul.mubr.msk.f32.gmra.mxu1 %vm504_vm1, %v5752_v37  ;;  %v6155_v37 = vld [vmem:[#allocation2 + $0x121] sm:$0xff] }
 0x2db   : > { %9638 = vmatmul.mubr.msk.f32.gmra.mxu0 %vm504_vm1, %v6146_v47  ;;  %v13030_v61 = vadd.f32 %v9255_v41, %v9191_v8  ;;  %9576 = vmatprep.mubr.msk.f32.mxu1 %vm504_vm1, %v5753_v6  ;;  %v3734_v16 = vpop.f32.mrf.mxu1 }
 0x2dc   : > { %9640 = vmatprep.mubr.msk.f32.mxu0 %vm504_vm1, %v6147_v62  ;;  %v4055_v28 = vpop.f32.mrf.mxu0  ;;  %9681 = vmatpush3.msra.mxu1 %v7816_v50  ;;  %v5762_v62 = vld [vmem:[#allocation2 + $0x128] sm:$0xff] }
 0x2dd   : > { %v13034_v5 = vadd.f32 %v4055_v28, %v3734_v16  ;;  %9682 = vmatprep.subr.mxu1 %v7815_v60  ;;  %v9194_v32 = vpop.f32.mrf.mxu1 }
 0x2de   : > { %v9258_v49 = vpop.f32.mrf.mxu0  ;;  %9577 = vmatmul.mubr.msk.f32.gmra.mxu1 %vm504_vm1, %v5754_v2  ;;  %v5763_v2 = vld [vmem:[#allocation2 + $0x138] sm:$0xff] }
 0x2df   : > { %9641 = vmatmul.mubr.msk.f32.gmra.mxu0 %vm504_vm1, %v6148_v34  ;;  %v13041_v13 = vadd.f32 %v9258_v49, %v9194_v32  ;;  %9579 = vmatprep.mubr.msk.f32.mxu1 %vm504_vm1, %v5755_v25  ;;  %v3744_v0 = vpop.f32.mrf.mxu1  ;;  %v6157_v34 = vld [vmem:[#allocation2 + $0x139] sm:$0xff] }
 0x2e0   : > { %9643 = vmatprep.mubr.msk.f32.mxu0 %vm504_vm1, %v6149_v40  ;;  %v4065_v10 = vpop.f32.mrf.mxu0  ;;  %9683 = vmatpush3.msra.mxu1 %v7815_v60  ;;  %v6156_v60 = vld [vmem:[#allocation2 + $0x129] sm:$0xff] }
 0x2e1   : > { %v13045_v44 = vadd.f32 %v4065_v10, %v3744_v0  ;;  %9684 = vmatprep.subr.mxu1 %v7814_v26  ;;  %v9197_v45 = vpop.f32.mrf.mxu1  ;;  %v6158_v0 = vld [vmem:[#allocation2 + $0x141] sm:$0xff] }
 0x2e2   : > { %v9261_v1 = vpop.f32.mrf.mxu0  ;;  %9580 = vmatmul.mubr.msk.f32.gmra.mxu1 %vm504_vm1, %v5756_v23 }
 0x2e3   : > { %9644 = vmatmul.mubr.msk.f32.gmra.mxu0 %vm504_vm1, %v6150_v36  ;;  %v13049_v48 = vadd.f32 %v9261_v1, %v9197_v45  ;;  %9582 = vmatprep.mubr.msk.f32.mxu1 %vm504_vm1, %v5757_v27  ;;  %v3754_v59 = vpop.f32.mrf.mxu1  ;;  %v5765_v36 = vld [vmem:[#allocation2 + $0x150] sm:$0xff] }
 0x2e4   : > { %9646 = vmatprep.mubr.msk.f32.mxu0 %vm504_vm1, %v6151_v4  ;;  %v4075_v51 = vpop.f32.mrf.mxu0  ;;  %9685 = vmatpush3.msra.mxu1 %v7814_v26  ;;  %v5764_v26 = vld [vmem:[#allocation2 + $0x140] sm:$0xff]  ;;  %v6159_v45 = vld [vmem:[#allocation2 + $0x151] sm:$0xff] }
 0x2e5   : > { %v13053_v9 = vadd.f32 %v4075_v51, %v3754_v59  ;;  %v9200_v11 = vpop.f32.mrf.mxu1  ;;  %v5766_v51 = vld [vmem:[#allocation2 + $0x158] sm:$0xff] }
 0x2e6   : > { %v9264_v58 = vpop.f32.mrf.mxu0  ;;  %9583 = vmatmul.mubr.msk.f32.gmra.mxu1 %vm504_vm1, %v5758_v38  ;;  %v6160_v38 = vld [vmem:[#allocation2 + $0x159] sm:$0xff] }
 0x2e7   : > { %9647 = vmatmul.mubr.msk.f32.gmra.mxu0 %vm504_vm1, %v6152_v63  ;;  %v13057_v30 = vadd.f32 %v9264_v58, %v9200_v11  ;;  %9585 = vmatprep.mubr.msk.f32.mxu1 %vm504_vm1, %v5759_v20  ;;  %v3764_v57 = vpop.f32.mrf.mxu1  ;;  %v5767_v58 = vld [vmem:[#allocation2 + $0x168] sm:$0xff] }
 0x2e8   : > { %9649 = vmatprep.mubr.msk.f32.mxu0 %vm504_vm1, %v6153_v21  ;;  %v4085_v3 = vpop.f32.mrf.mxu0  ;;  %v6161_v20 = vld [vmem:[#allocation2 + $0x169] sm:$0xff] }
 0x2e9   : > { %v13061_v29 = vadd.f32 %v4085_v3, %v3764_v57  ;;  %v9203_v50 = vpop.f32.mrf.mxu1 }
 0x2ea   : > { %v9267_v15 = vpop.f32.mrf.mxu0  ;;  %9586 = vmatmul.mubr.msk.f32.gmra.mxu1 %vm504_vm1, %v5760_v24 }
 0x2eb   : > { %9650 = vmatmul.mubr.msk.f32.gmra.mxu0 %vm504_vm1, %v6154_v19  ;;  %v13065_v47 = vadd.f32 %v9267_v15, %v9203_v50  ;;  %9588 = vmatprep.mubr.msk.f32.mxu1 %vm504_vm1, %v5761_v33  ;;  %v3774_v8 = vpop.f32.mrf.mxu1  ;;  %v5768_v19 = vld [vmem:[#allocation2 + $0x170] sm:$0xff] }
 0x2ec   : > { %9652 = vmatprep.mubr.msk.f32.mxu0 %vm504_vm1, %v6155_v37  ;;  %v4095_v41 = vpop.f32.mrf.mxu0  ;;  %v6162_v50 = vld [vmem:[#allocation2 + $0x171] sm:$0xff] }
 0x2ed   : > { %v13069_v6 = vadd.f32 %v4095_v41, %v3774_v8  ;;  %v9206_v16 = vpop.f32.mrf.mxu1 }
 0x2ee   : > { %v9270_v28 = vpop.f32.mrf.mxu0  ;;  %9589 = vmatmul.mubr.msk.f32.gmra.mxu1 %vm504_vm1, %v5762_v62  ;;  %v5771_v62 = vld [vmem:[#allocation2 + $0x198] sm:$0xff] }
 0x2ef   : > { %9653 = vmatmul.mubr.msk.f32.gmra.mxu0 %vm504_vm1, %v6156_v60  ;;  %v13073_v32 = vadd.f32 %v9270_v28, %v9206_v16  ;;  %9591 = vmatprep.mubr.msk.f32.mxu1 %vm504_vm1, %v5763_v2  ;;  %v3784_v49 = vpop.f32.mrf.mxu1  ;;  %v6165_v60 = vld [vmem:[#allocation2 + $0x199] sm:$0xff] }
 0x2f0   : > { %9655 = vmatprep.mubr.msk.f32.mxu0 %vm504_vm1, %v6157_v34  ;;  %v4105_v25 = vpop.f32.mrf.mxu0 }
 0x2f1   : > { %v13077_v40 = vadd.f32 %v4105_v25, %v3784_v49  ;;  %v9209_v10 = vpop.f32.mrf.mxu1 }
 0x2f2   : > { %v9273_v23 = vpop.f32.mrf.mxu0  ;;  %9592 = vmatmul.mubr.msk.f32.gmra.mxu1 %vm504_vm1, %v5764_v26 }
 0x2f3   : > { %9656 = vmatmul.mubr.msk.f32.gmra.mxu0 %vm504_vm1, %v6158_v0  ;;  %v13081_v1 = vadd.f32 %v9273_v23, %v9209_v10  ;;  %9594 = vmatprep.mubr.msk.f32.mxu1 %vm504_vm1, %v5765_v36  ;;  %v3794_v27 = vpop.f32.mrf.mxu1 }
 0x2f4   : > { %9658 = vmatprep.mubr.msk.f32.mxu0 %vm504_vm1, %v6159_v45  ;;  %v4115_v4 = vpop.f32.mrf.mxu0 }
 0x2f5   : > { %v13085_v59 = vadd.f32 %v4115_v4, %v3794_v27  ;;  %v9212_v63 = vpop.f32.mrf.mxu1  ;;  %v6530_v27 = vld [vmem:[#allocation2 + $0x3a] sm:$0xff] }
 0x2f6   : > { %v9276_v11 = vpop.f32.mrf.mxu0  ;;  %9595 = vmatmul.mubr.msk.f32.gmra.mxu1 %vm504_vm1, %v5766_v51 }
 0x2f7   : > { %9659 = vmatmul.mubr.msk.f32.gmra.mxu0 %vm504_vm1, %v6160_v38  ;;  %v13089_v21 = vadd.f32 %v9276_v11, %v9212_v63  ;;  %9597 = vmatprep.mubr.msk.f32.mxu1 %vm504_vm1, %v5767_v58  ;;  %v3804_v57 = vpop.f32.mrf.mxu1  ;;  %v6531_v38 = vld [vmem:[#allocation2 + $0x4a] sm:$0xff]  ;;  %v4006_v63 = vadd.f32 %v12977_v56, %v12975_v52 }
 0x2f8   : > { %9661 = vmatprep.mubr.msk.f32.mxu0 %vm504_vm1, %v6161_v20  ;;  %v4125_v3 = vpop.f32.mrf.mxu0 }
 0x2f9   : > { %v13093_v24 = vadd.f32 %v4125_v3, %v3804_v57  ;;  %v9215_v15 = vpop.f32.mrf.mxu1 }
 0x2fa   : > { %v9279_v33 = vpop.f32.mrf.mxu0  ;;  %9598 = vmatmul.mubr.msk.f32.gmra.mxu1 %vm504_vm1, %v5768_v19  ;;  %v6532_v19 = vld [vmem:[#allocation2 + $0x52] sm:$0xff] }
 0x2fb   : > { %9662 = vmatmul.mubr.msk.f32.gmra.mxu0 %vm504_vm1, %v6162_v50  ;;  %v13097_v37 = vadd.f32 %v9279_v33, %v9215_v15  ;;  %9600 = vmatprep.mubr.msk.f32.mxu1 %vm504_vm1, %v12772_v53  ;;  %v3814_v8 = vpop.f32.mrf.mxu1  ;;  %v5772_v53 = vld [vmem:[#allocation2 + $0x1a0] sm:$0xff] }
 0x2fc   : > { %9664 = vmatprep.mubr.msk.f32.mxu0 %vm504_vm1, %v12952_v7  ;;  %v4135_v41 = vpop.f32.mrf.mxu0  ;;  %v6166_v7 = vld [vmem:[#allocation2 + $0x1a1] sm:$0xff] }
 0x2fd   : > { %v13103_v16 = vadd.f32 %v4135_v41, %v3814_v8  ;;  %v9218_v28 = vpop.f32.mrf.mxu1  ;;  %v6533_v33 = vld [vmem:[#allocation2 + $0x62] sm:$0xff] }
 0x2fe   : > { %v9282_v2 = vpop.f32.mrf.mxu0  ;;  %9601 = vmatmul.mubr.msk.f32.gmra.mxu1 %vm504_vm1, %v12780_v39  ;;  %v6529_v39 = vld [vmem:[#allocation2 + $0x32] sm:$0xff] }
 0x2ff   : > { %9665 = vmatmul.mubr.msk.f32.gmra.mxu0 %vm504_vm1, %v12960_v18  ;;  %v13109_v34 = vadd.f32 %v9282_v2, %v9218_v28  ;;  %9603 = vmatprep.mubr.msk.f32.mxu1 %vm504_vm1, %v5771_v62  ;;  %v3824_v49 = vpop.f32.mrf.mxu1 }
 0x300   : > { %9667 = vmatprep.mubr.msk.f32.mxu0 %vm504_vm1, %v6165_v60  ;;  %v4145_v25 = vpop.f32.mrf.mxu0  ;;  %v6534_v60 = vld [vmem:[#allocation2 + $0x6a] sm:$0xff] }
 0x301   : > { %v13113_v26 = vadd.f32 %v4145_v25, %v3824_v49 }
 0x302   : > { %v9221_v0 = vpop.f32.mrf.mxu1  ;;  %9604 = vmatmul.mubr.msk.f32.gmra.mxu1 %vm504_vm1, %v5772_v53  ;;  %v6535_v53 = vld [vmem:[#allocation2 + $0x7a] sm:$0xff] }
 0x303   : > { %v9285_v10 = vpop.f32.mrf.mxu0  ;;  %9668 = vmatmul.mubr.msk.f32.gmra.mxu0 %vm504_vm1, %v6166_v7  ;;  %9686 = vmatprep.mubr.msk.f32.mxu1 %vm504_vm1, %v6529_v39  ;;  %v6536_v39 = vld [vmem:[#allocation2 + $0x82] sm:$0xff] }
 0x304   : > { %v13117_v18 = vadd.f32 %v9285_v10, %v9221_v0  ;;  %v3834_v23 = vpop.f32.mrf.mxu1 }
 0x305   : > { %v4155_v36 = vpop.f32.mrf.mxu0 }
 0x306   : > { %v13120_v45 = vadd.f32 %v4155_v36, %v3834_v23  ;;  %v9304_v4 = vpop.f32.mrf.mxu1  ;;  %9687 = vmatmul.mubr.msk.f32.vlgmr.msra.gmra.mxu1 %vm504_vm1, %v6530_v27  ;;  %v6537_v36 = vld [vmem:[#allocation2 + $0x92] sm:$0xff] }
 0x307   : > { %v9368_v51 = vpop.f32.mrf.mxu0  ;;  %v4527_v11 = vadd.f32 %v9304_v4, %v12553_v14  ;;  %9689 = vmatprep.mubr.msk.f32.mxu1 %vm504_vm1, %v6531_v38 }
 0x308   : > { %v4367_v58 = vpop.f32.mrf.mxu1 }
 0x309   : > { %v4761_v20 = vpop.f32.mrf.mxu0  ;;  %v13127_v57 = vadd.f32 %v9368_v51, %v4527_v11  ;;  %v4526_v3 = vadd.f32 %v4367_v58, %v4006_v63  ;;  %v6538_v11 = vld [vmem:[#allocation2 + $0x9a] sm:$0xff] }
 0x30a   : > { %v9307_v50 = vpop.f32.mrf.mxu1  ;;  %9690 = vmatmul.mubr.msk.f32.gmra.mxu1 %vm504_vm1, %v6532_v19 }
 0x30b   : > { %v9371_v15 = vpop.f32.mrf.mxu0  ;;  %v13130_v8 = vadd.f32 %v4761_v20, %v4526_v3  ;;  %v4529_v41 = vadd.f32 %v9307_v50, %v12981_v54  ;;  %9692 = vmatprep.mubr.msk.f32.mxu1 %vm504_vm1, %v6533_v33  ;;  %v6539_v20 = vld [vmem:[#allocation2 + $0xaa] sm:$0xff] }
 0x30c   : > { %v4377_v14 = vpop.f32.mrf.mxu1 }
 0x30d   : > { %v4771_v52 = vpop.f32.mrf.mxu0  ;;  %v13134_v56 = vadd.f32 %v9371_v15, %v4529_v41  ;;  %v4528_v62 = vadd.f32 %v4377_v14, %v12990_v12  ;;  %v6540_v41 = vld [vmem:[#allocation2 + $0xb2] sm:$0xff] }
 0x30e   : > { %v9310_v28 = vpop.f32.mrf.mxu1  ;;  %9693 = vmatmul.mubr.msk.f32.gmra.mxu1 %vm504_vm1, %v6534_v60 }
 0x30f   : > { %v9374_v2 = vpop.f32.mrf.mxu0  ;;  %v13138_v7 = vadd.f32 %v4771_v52, %v4528_v62  ;;  %v4531_v49 = vadd.f32 %v9310_v28, %v12997_v31  ;;  %9695 = vmatprep.mubr.msk.f32.mxu1 %vm504_vm1, %v6535_v53  ;;  %v6541_v52 = vld [vmem:[#allocation2 + $0xc2] sm:$0xff] }
 0x310   : > { %v4387_v54 = vpop.f32.mrf.mxu1 }
 0x311   : > { %v4781_v25 = vpop.f32.mrf.mxu0  ;;  %v13142_v0 = vadd.f32 %v9374_v2, %v4531_v49  ;;  %v4530_v10 = vadd.f32 %v4387_v54, %v13001_v22  ;;  %v6542_v49 = vld [vmem:[#allocation2 + $0xca] sm:$0xff] }
 0x312   : > { %v9313_v12 = vpop.f32.mrf.mxu1  ;;  %9696 = vmatmul.mubr.msk.f32.gmra.mxu1 %vm504_vm1, %v6536_v39 }
 0x313   : > { %v9377_v23 = vpop.f32.mrf.mxu0  ;;  %v13146_v27 = vadd.f32 %v4781_v25, %v4530_v10  ;;  %v4533_v4 = vadd.f32 %v9313_v12, %v13008_v17  ;;  %9698 = vmatprep.mubr.msk.f32.mxu1 %vm504_vm1, %v6537_v36  ;;  %v6543_v25 = vld [vmem:[#allocation2 + $0xda] sm:$0xff] }
 0x314   : > { %v4397_v31 = vpop.f32.mrf.mxu1 }
 0x315   : > { %v4791_v51 = vpop.f32.mrf.mxu0  ;;  %v13150_v38 = vadd.f32 %v9377_v23, %v4533_v4  ;;  %v4532_v63 = vadd.f32 %v4397_v31, %v13012_v43  ;;  %v6544_v4 = vld [vmem:[#allocation2 + $0xe2] sm:$0xff] }
 0x316   : > { %v9316_v22 = vpop.f32.mrf.mxu1  ;;  %9699 = vmatmul.mubr.msk.f32.gmra.mxu1 %vm504_vm1, %v6538_v11 }
 0x317   : > { %v9380_v58 = vpop.f32.mrf.mxu0  ;;  %v13154_v3 = vadd.f32 %v4791_v51, %v4532_v63  ;;  %v4535_v19 = vadd.f32 %v9316_v22, %v13019_v42  ;;  %9701 = vmatprep.mubr.msk.f32.mxu1 %vm504_vm1, %v6539_v20  ;;  %v6545_v51 = vld [vmem:[#allocation2 + $0xf2] sm:$0xff] }
 0x318   : > { %v4407_v17 = vpop.f32.mrf.mxu1 }
 0x319   : > { %v4801_v50 = vpop.f32.mrf.mxu0  ;;  %v13158_v15 = vadd.f32 %v9380_v58, %v4535_v19  ;;  %v4534_v33 = vadd.f32 %v4407_v17, %v13023_v55  ;;  %v6546_v19 = vld [vmem:[#allocation2 + $0xfa] sm:$0xff] }
 0x31a   : > { %v9319_v43 = vpop.f32.mrf.mxu1  ;;  %9702 = vmatmul.mubr.msk.f32.gmra.mxu1 %vm504_vm1, %v6540_v41 }
 0x31b   : > { %v9383_v14 = vpop.f32.mrf.mxu0  ;;  %v13162_v62 = vadd.f32 %v4801_v50, %v4534_v33  ;;  %v4537_v60 = vadd.f32 %v9319_v43, %v13030_v61  ;;  %9704 = vmatprep.mubr.msk.f32.mxu1 %vm504_vm1, %v6541_v52  ;;  %v6547_v50 = vld [vmem:[#allocation2 + $0x10a] sm:$0xff] }
 0x31c   : > { %v4417_v42 = vpop.f32.mrf.mxu1 }
 0x31d   : > { %v4811_v28 = vpop.f32.mrf.mxu0  ;;  %v13166_v2 = vadd.f32 %v9383_v14, %v4537_v60  ;;  %v4536_v53 = vadd.f32 %v4417_v42, %v13034_v5  ;;  %v6548_v60 = vld [vmem:[#allocation2 + $0x112] sm:$0xff] }
 0x31e   : > { %v9322_v55 = vpop.f32.mrf.mxu1  ;;  %9705 = vmatmul.mubr.msk.f32.gmra.mxu1 %vm504_vm1, %v6542_v49 }
 0x31f   : > { %v9386_v54 = vpop.f32.mrf.mxu0  ;;  %v13170_v10 = vadd.f32 %v4811_v28, %v4536_v53  ;;  %v4539_v39 = vadd.f32 %v9322_v55, %v13041_v13  ;;  %9707 = vmatprep.mubr.msk.f32.mxu1 %vm504_vm1, %v6543_v25  ;;  %v6549_v28 = vld [vmem:[#allocation2 + $0x122] sm:$0xff] }
 0x320   : > { %v4427_v61 = vpop.f32.mrf.mxu1 }
 0x321   : > { %v4821_v12 = vpop.f32.mrf.mxu0  ;;  %v13174_v23 = vadd.f32 %v9386_v54, %v4539_v39  ;;  %v4538_v36 = vadd.f32 %v4427_v61, %v13045_v44  ;;  %v6550_v39 = vld [vmem:[#allocation2 + $0x12a] sm:$0xff] }
 0x322   : > { %v9325_v5 = vpop.f32.mrf.mxu1  ;;  %9708 = vmatmul.mubr.msk.f32.gmra.mxu1 %vm504_vm1, %v6544_v4 }
 0x323   : > { %v9389_v31 = vpop.f32.mrf.mxu0  ;;  %v13178_v63 = vadd.f32 %v4821_v12, %v4538_v36  ;;  %v4541_v11 = vadd.f32 %v9325_v5, %v13049_v48  ;;  %9710 = vmatprep.mubr.msk.f32.mxu1 %vm504_vm1, %v6545_v51  ;;  %v6551_v12 = vld [vmem:[#allocation2 + $0x13a] sm:$0xff] }
 0x324   : > { %v4437_v13 = vpop.f32.mrf.mxu1 }
 0x325   : > { %v4831_v22 = vpop.f32.mrf.mxu0  ;;  %v13182_v58 = vadd.f32 %v9389_v31, %v4541_v11  ;;  %v4540_v20 = vadd.f32 %v4437_v13, %v13053_v9  ;;  %v6552_v11 = vld [vmem:[#allocation2 + $0x142] sm:$0xff] }
 0x326   : > { %v9328_v44 = vpop.f32.mrf.mxu1  ;;  %9711 = vmatmul.mubr.msk.f32.gmra.mxu1 %vm504_vm1, %v6546_v19 }
 0x327   : > { %v9392_v17 = vpop.f32.mrf.mxu0  ;;  %v13186_v33 = vadd.f32 %v4831_v22, %v4540_v20  ;;  %v4543_v41 = vadd.f32 %v9328_v44, %v13057_v30  ;;  %9713 = vmatprep.mubr.msk.f32.mxu1 %vm504_vm1, %v6547_v50  ;;  %v6553_v22 = vld [vmem:[#allocation2 + $0x152] sm:$0xff] }
 0x328   : > { %v4447_v48 = vpop.f32.mrf.mxu1 }
 0x329   : > { %v4841_v43 = vpop.f32.mrf.mxu0  ;;  %v13190_v14 = vadd.f32 %v9392_v17, %v4543_v41  ;;  %v4542_v52 = vadd.f32 %v4447_v48, %v13061_v29  ;;  %v6554_v41 = vld [vmem:[#allocation2 + $0x15a] sm:$0xff] }
 0x32a   : > { %v9331_v9 = vpop.f32.mrf.mxu1  ;;  %9714 = vmatmul.mubr.msk.f32.gmra.mxu1 %vm504_vm1, %v6548_v60 }
 0x32b   : > { %v9395_v42 = vpop.f32.mrf.mxu0  ;;  %v13194_v53 = vadd.f32 %v4841_v43, %v4542_v52  ;;  %v4545_v49 = vadd.f32 %v9331_v9, %v13065_v47  ;;  %9716 = vmatprep.mubr.msk.f32.mxu1 %vm504_vm1, %v6549_v28  ;;  %v6555_v43 = vld [vmem:[#allocation2 + $0x16a] sm:$0xff] }
 0x32c   : > { %v4457_v30 = vpop.f32.mrf.mxu1 }
 0x32d   : > { %v4851_v55 = vpop.f32.mrf.mxu0  ;;  %v13198_v54 = vadd.f32 %v9395_v42, %v4545_v49  ;;  %v4544_v25 = vadd.f32 %v4457_v30, %v13069_v6  ;;  %v6556_v49 = vld [vmem:[#allocation2 + $0x172] sm:$0xff] }
 0x32e   : > { %v9334_v29 = vpop.f32.mrf.mxu1  ;;  %9717 = vmatmul.mubr.msk.f32.gmra.mxu1 %vm504_vm1, %v6550_v39 }
 0x32f   : > { %v9398_v61 = vpop.f32.mrf.mxu0  ;;  %v13202_v36 = vadd.f32 %v4851_v55, %v4544_v25  ;;  %v4547_v4 = vadd.f32 %v9334_v29, %v13073_v32  ;;  %9719 = vmatprep.mubr.msk.f32.mxu1 %vm504_vm1, %v6551_v12  ;;  %v6559_v29 = vld [vmem:[#allocation2 + $0x19a] sm:$0xff] }
 0x330   : > { %v4467_v47 = vpop.f32.mrf.mxu1 }
 0x331   : > { %v4861_v5 = vpop.f32.mrf.mxu0  ;;  %v13206_v31 = vadd.f32 %v9398_v61, %v4547_v4  ;;  %v4546_v51 = vadd.f32 %v4467_v47, %v13077_v40 }
 0x332   : > { %v9337_v6 = vpop.f32.mrf.mxu1  ;;  %9720 = vmatmul.mubr.msk.f32.gmra.mxu1 %vm504_vm1, %v6552_v11 }
 0x333   : > { %v9401_v13 = vpop.f32.mrf.mxu0  ;;  %v13210_v20 = vadd.f32 %v4861_v5, %v4546_v51  ;;  %v4549_v19 = vadd.f32 %v9337_v6, %v13081_v1  ;;  %9722 = vmatprep.mubr.msk.f32.mxu1 %vm504_vm1, %v6553_v22 }
 0x334   : > { %v4477_v32 = vpop.f32.mrf.mxu1 }
 0x335   : > { %v4871_v44 = vpop.f32.mrf.mxu0  ;;  %v13214_v17 = vadd.f32 %v9401_v13, %v4549_v19  ;;  %v4548_v50 = vadd.f32 %v4477_v32, %v13085_v59 }
 0x336   : > { %v9340_v40 = vpop.f32.mrf.mxu1  ;;  %9723 = vmatmul.mubr.msk.f32.gmra.mxu1 %vm504_vm1, %v6554_v41 }
 0x337   : > { %v9404_v48 = vpop.f32.mrf.mxu0  ;;  %v13218_v52 = vadd.f32 %v4871_v44, %v4548_v50  ;;  %v4551_v60 = vadd.f32 %v9340_v40, %v13089_v21  ;;  %9725 = vmatprep.mubr.msk.f32.mxu1 %vm504_vm1, %v6555_v43 }
 0x338   : > { %v4487_v1 = vpop.f32.mrf.mxu1 }
 0x339   : > { %v4881_v9 = vpop.f32.mrf.mxu0  ;;  %v13222_v42 = vadd.f32 %v9404_v48, %v4551_v60  ;;  %v4550_v28 = vadd.f32 %v4487_v1, %v13093_v24 }
 0x33a   : > { %v9343_v59 = vpop.f32.mrf.mxu1  ;;  %9726 = vmatmul.mubr.msk.f32.gmra.mxu1 %vm504_vm1, %v6556_v49 }
 0x33b   : > { %v9407_v30 = vpop.f32.mrf.mxu0  ;;  %v13226_v55 = vadd.f32 %v4881_v9, %v4550_v28  ;;  %v4553_v25 = vadd.f32 %v9343_v59, %v13097_v37  ;;  %9728 = vmatprep.mubr.msk.f32.mxu1 %vm504_vm1, %v12954_v35  ;;  %v6560_v37 = vld [vmem:[#allocation2 + $0x1a2] sm:$0xff] }
 0x33c   : > { %v4497_v21 = vpop.f32.mrf.mxu1 }
 0x33d   : > { %v4891_v39 = vpop.f32.mrf.mxu0  ;;  %v13231_v61 = vadd.f32 %v9407_v30, %v4553_v25  ;;  %v4552_v12 = vadd.f32 %v4497_v21, %v13103_v16 }
 0x33e   : > { %v9346_v24 = vpop.f32.mrf.mxu1  ;;  %9729 = vmatmul.mubr.msk.f32.gmra.mxu1 %vm504_vm1, %v12962_v46 }
 0x33f   : > { %v9410_v4 = vpop.f32.mrf.mxu0  ;;  %v13236_v47 = vadd.f32 %v4891_v39, %v4552_v12  ;;  %v4555_v5 = vadd.f32 %v9346_v24, %v13109_v34  ;;  %9731 = vmatprep.mubr.msk.f32.mxu1 %vm504_vm1, %v6559_v29 }
 0x340   : > { %v4507_v35 = vpop.f32.mrf.mxu1 }
 0x341   : > { %v4901_v51 = vpop.f32.mrf.mxu0  ;;  %v13240_v11 = vadd.f32 %v9410_v4, %v4555_v5  ;;  %v4554_v6 = vadd.f32 %v4507_v35, %v13113_v26 }
 0x342   : > { %v9349_v13 = vpop.f32.mrf.mxu1  ;;  %9732 = vmatmul.mubr.msk.f32.gmra.mxu1 %vm504_vm1, %v6560_v37 }
 0x343   : > { %v9413_v16 = vpop.f32.mrf.mxu0  ;;  %v13244_v22 = vadd.f32 %v4901_v51, %v4554_v6  ;;  %v4557_v46 = vadd.f32 %v9349_v13, %v13117_v18 }
 0x344   : > { %v4517_v19 = vpop.f32.mrf.mxu1 }
 0x345   : > { %v4911_v32 = vpop.f32.mrf.mxu0  ;;  %v13247_v34 = vadd.f32 %v9413_v16, %v4557_v46  ;;  %v4556_v44 = vadd.f32 %v4517_v19, %v13120_v45 }
 0x346   : > { %v9432_v50 = vpop.f32.mrf.mxu1 }
 0x347   : > { %v13250_v41 = vpop.f32.mrf.mxu0  ;;  %v13252_v40 = vadd.f32 %v4911_v32, %v4556_v44  ;;  %v13255_v26 = vadd.f32 %v9432_v50, %v13127_v57 }
 0x348   : > { %v5155_v48 = vpop.f32.mrf.mxu1 }
 0x349   : > { %v13257_v43 = vpop.f32.mrf.mxu0  ;;  %v13260_v60 = vadd.f32 %v5155_v48, %v13130_v8 }
 0x34a   : > { %v9435_v18 = vpop.f32.mrf.mxu1 }
 0x34b   : > { %v13262_v1 = vpop.f32.mrf.mxu0  ;;  %v13265_v9 = vadd.f32 %v9435_v18, %v13134_v56 }
 0x34c   : > { %v5165_v45 = vpop.f32.mrf.mxu1 }
 0x34d   : > { %v13267_v28 = vpop.f32.mrf.mxu0  ;;  %v13270_v49 = vadd.f32 %v5165_v45, %v13138_v7 }
 0x34e   : > { %v9438_v57 = vpop.f32.mrf.mxu1 }
 0x34f   : > { %v13272_v59 = vpop.f32.mrf.mxu0  ;;  %v13275_v30 = vadd.f32 %v9438_v57, %v13142_v0 }
 0x350   : > { %v5175_v8 = vpop.f32.mrf.mxu1 }
 0x351   : > { %v13277_v25 = vpop.f32.mrf.mxu0  ;;  %v13280_v21 = vadd.f32 %v5175_v8, %v13146_v27 }
 0x352   : > { %v9441_v56 = vpop.f32.mrf.mxu1 }
 0x353   : > { %v13282_v39 = vpop.f32.mrf.mxu0  ;;  %v13285_v29 = vadd.f32 %v9441_v56, %v13150_v38 }
 0x354   : > { %v5185_v7 = vpop.f32.mrf.mxu1 }
 0x355   : > { %v13287_v12 = vpop.f32.mrf.mxu0  ;;  %v13290_v24 = vadd.f32 %v5185_v7, %v13154_v3 }
 0x356   : > { %v9444_v0 = vpop.f32.mrf.mxu1 }
 0x357   : > { %v13292_v4 = vpop.f32.mrf.mxu0  ;;  %v13295_v5 = vadd.f32 %v9444_v0, %v13158_v15 }
 0x358   : > { %v5195_v27 = vpop.f32.mrf.mxu1 }
 0x359   : > { %v13297_v37 = vpop.f32.mrf.mxu0  ;;  %v13300_v35 = vadd.f32 %v5195_v27, %v13162_v62 }
 0x35a   : > { %v9447_v38 = vpop.f32.mrf.mxu1 }
 0x35b   : > { %v13302_v51 = vpop.f32.mrf.mxu0  ;;  %v13305_v6 = vadd.f32 %v9447_v38, %v13166_v2 }
 0x35c   : > { %v5205_v3 = vpop.f32.mrf.mxu1 }
 0x35d   : > { %v13307_v13 = vpop.f32.mrf.mxu0  ;;  %v13310_v16 = vadd.f32 %v5205_v3, %v13170_v10 }
 0x35e   : > { %v9450_v15 = vpop.f32.mrf.mxu1 }
 0x35f   : > { %v13312_v46 = vpop.f32.mrf.mxu0  ;;  %v13315_v19 = vadd.f32 %v9450_v15, %v13174_v23 }
 0x360   : > { %v5215_v62 = vpop.f32.mrf.mxu1 }
 0x361   : > { %v13317_v32 = vpop.f32.mrf.mxu0  ;;  %v13320_v44 = vadd.f32 %v5215_v62, %v13178_v63 }
 0x362   : > { %v9453_v2 = vpop.f32.mrf.mxu1 }
 0x363   : > { %v13322_v50 = vpop.f32.mrf.mxu0  ;;  %v13325_v48 = vadd.f32 %v9453_v2, %v13182_v58 }
 0x364   : > { %14255 = vst [vmem:[#allocation45_spill] sm:$0xff] %v13322_v50  ;;  %v5225_v10 = vpop.f32.mrf.mxu1 }
 0x365   : > { %v13327_v18 = vpop.f32.mrf.mxu0  ;;  %v13330_v45 = vadd.f32 %v5225_v10, %v13186_v33 }
 0x366   : > { %14256 = vst [vmem:[#allocation44_spill] sm:$0xff] %v13327_v18  ;;  %v9456_v23 = vpop.f32.mrf.mxu1 }
 0x367   : > { %14257 = vst [vmem:[#allocation46_spill] sm:$0xff] %v13330_v45  ;;  %v13332_v57 = vpop.f32.mrf.mxu0  ;;  %v13335_v8 = vadd.f32 %v9456_v23, %v13190_v14 }
 0x368   : > { %14258 = vst [vmem:[#allocation48_spill] sm:$0xff] %v13332_v57  ;;  %v5235_v63 = vpop.f32.mrf.mxu1 }
 0x369   : > { %14259 = vst [vmem:[#allocation47_spill] sm:$0xff] %v13335_v8  ;;  %v13337_v56 = vpop.f32.mrf.mxu0  ;;  %v13340_v7 = vadd.f32 %v5235_v63, %v13194_v53 }
 0x36a   : > { %14260 = vst [vmem:[#allocation49_spill] sm:$0xff] %v13337_v56  ;;  %v9459_v58 = vpop.f32.mrf.mxu1 }
 0x36b   : > { %14261 = vst [vmem:[#allocation51_spill] sm:$0xff] %v13340_v7  ;;  %v13342_v0 = vpop.f32.mrf.mxu0  ;;  %v13345_v27 = vadd.f32 %v9459_v58, %v13198_v54 }
 0x36c   : > { %14262 = vst [vmem:[#allocation50_spill] sm:$0xff] %v13342_v0  ;;  %v5245_v33 = vpop.f32.mrf.mxu1 }
 0x36d   : > { %14263 = vst [vmem:[#allocation53_spill] sm:$0xff] %v13345_v27  ;;  %v13347_v38 = vpop.f32.mrf.mxu0  ;;  %v13350_v3 = vadd.f32 %v5245_v33, %v13202_v36 }
 0x36e   : > { %14264 = vst [vmem:[#allocation57_spill] sm:$0xff] %v13347_v38  ;;  %v9462_v14 = vpop.f32.mrf.mxu1 }
 0x36f   : > { %14265 = vst [vmem:[#allocation56_spill] sm:$0xff] %v13350_v3  ;;  %v13352_v15 = vpop.f32.mrf.mxu0  ;;  %v13355_v62 = vadd.f32 %v9462_v14, %v13206_v31 }
 0x370   : > { %14266 = vst [vmem:[#allocation59_spill] sm:$0xff] %v13352_v15  ;;  %v5255_v53 = vpop.f32.mrf.mxu1 }
 0x371   : > { %14267 = vst [vmem:[#allocation60_spill] sm:$0xff] %v13355_v62  ;;  %v13357_v2 = vpop.f32.mrf.mxu0  ;;  %v13360_v10 = vadd.f32 %v5255_v53, %v13210_v20 }
 0x372   : > { %14268 = vst [vmem:[#allocation61_spill] sm:$0xff] %v13357_v2  ;;  %v9465_v54 = vpop.f32.mrf.mxu1 }
 0x373   : > { %14269 = vst [vmem:[#allocation63_spill] sm:$0xff] %v13360_v10  ;;  %v13362_v23 = vpop.f32.mrf.mxu0  ;;  %v13365_v63 = vadd.f32 %v9465_v54, %v13214_v17 }
 0x374   : > { %14270 = vst [vmem:[#allocation62_spill] sm:$0xff] %v13362_v23  ;;  %v5265_v36 = vpop.f32.mrf.mxu1 }
 0x375   : > { %14271 = vst [vmem:[#allocation64_spill] sm:$0xff] %v13365_v63  ;;  %v13367_v58 = vpop.f32.mrf.mxu0  ;;  %v13370_v33 = vadd.f32 %v5265_v36, %v13218_v52 }
 0x376   : > { %14272 = vst [vmem:[#allocation66_spill] sm:$0xff] %v13367_v58  ;;  %v9468_v31 = vpop.f32.mrf.mxu1 }
 0x377   : > { %14273 = vst [vmem:[#allocation65_spill] sm:$0xff] %v13370_v33  ;;  %v13372_v14 = vpop.f32.mrf.mxu0  ;;  %v13375_v2 = vadd.f32 %v9468_v31, %v13222_v42 }
 0x378   : > { %14274 = vst [vmem:[#allocation67_spill] sm:$0xff] %v13372_v14  ;;  %v5275_v20 = vpop.f32.mrf.mxu1 }
 0x379   : > { %14275 = vst [vmem:[#allocation69_spill] sm:$0xff] %v13375_v2  ;;  %v13377_v53 = vpop.f32.mrf.mxu0  ;;  %v13380_v23 = vadd.f32 %v5275_v20, %v13226_v55 }
 0x37a   : > { %14276 = vst [vmem:[#allocation68_spill] sm:$0xff] %v13377_v53  ;;  %v9471_v17 = vpop.f32.mrf.mxu1 }
 0x37b   : > { %14277 = vst [vmem:[#allocation70_spill] sm:$0xff] %v13380_v23  ;;  %v13382_v54 = vpop.f32.mrf.mxu0  ;;  %v13385_v58 = vadd.f32 %v9471_v17, %v13231_v61 }
 0x37c   : > { %14278 = vst [vmem:[#allocation72_spill] sm:$0xff] %v13382_v54  ;;  %v5285_v52 = vpop.f32.mrf.mxu1 }
 0x37d   : > { %14279 = vst [vmem:[#allocation71_spill] sm:$0xff] %v13385_v58  ;;  %v13387_v36 = vpop.f32.mrf.mxu0  ;;  %v13390_v14 = vadd.f32 %v5285_v52, %v13236_v47 }
 0x37e   : > { %14280 = vst [vmem:[#allocation73_spill] sm:$0xff] %v13387_v36  ;;  %v9474_v42 = vpop.f32.mrf.mxu1 }
 0x37f   : > { %14281 = vst [vmem:[#allocation75_spill] sm:$0xff] %v13390_v14  ;;  %v13392_v31 = vpop.f32.mrf.mxu0  ;;  %v13395_v53 = vadd.f32 %v9474_v42, %v13240_v11 }
 0x380   : > { %14282 = vst [vmem:[#allocation74_spill] sm:$0xff] %v13392_v31  ;;  %v5295_v55 = vpop.f32.mrf.mxu1 }
 0x381   : > { %14283 = vst [vmem:[#allocation76_spill] sm:$0xff] %v13395_v53  ;;  %v13397_v20 = vpop.f32.mrf.mxu0  ;;  %v13400_v54 = vadd.f32 %v5295_v55, %v13244_v22 }
 0x382   : > { %14284 = vst [vmem:[#allocation78_spill] sm:$0xff] %v13397_v20  ;;  %v9477_v61 = vpop.f32.mrf.mxu1 }
 0x383   : > { %14285 = vst [vmem:[#allocation77_spill] sm:$0xff] %v13400_v54  ;;  %v13402_v17 = vpop.f32.mrf.mxu0  ;;  %v13405_v36 = vadd.f32 %v9477_v61, %v13247_v34 }
 0x384   : > { %14286 = vst [vmem:[#allocation79_spill] sm:$0xff] %v13402_v17  ;;  %v5305_v47 = vpop.f32.mrf.mxu1 }
 0x385   : > { %14287 = vst [vmem:[#allocation81_spill] sm:$0xff] %v13405_v36  ;;  %v13407_v52 = vpop.f32.mrf.mxu0  ;;  %v13410_v31 = vadd.f32 %v5305_v47, %v13252_v40 }
 0x386   : > { %14288 = vst [vmem:[#allocation80_spill] sm:$0xff] %v13407_v52  ;;  %v9560_v11 = vpop.f32.mrf.mxu1 }
 0x387   : > { %14289 = vst [vmem:[#allocation82_spill] sm:$0xff] %v13410_v31  ;;  %v9624_v42 = vpop.f32.mrf.mxu0 }
 0x388   : > { %v5944_v53 = vpop.f32.mrf.mxu1 }
 0x389   : > { %v6338_v14 = vpop.f32.mrf.mxu0 }
 0x38a   : > { %v9563_v20 = vpop.f32.mrf.mxu1 }
 0x38b   : > { %v9627_v22 = vpop.f32.mrf.mxu0 }
 0x38c   : > { %v5954_v58 = vpop.f32.mrf.mxu1 }
 0x38d   : > { %v13414_v17 = vpop.f32.mrf.mxu0 }
 0x38e   : > { %v9566_v55 = vpop.f32.mrf.mxu1 }
 0x38f   : > { %v13420_v52 = vpop.f32.mrf.mxu0 }
 0x390   : > { %v13412_v54 = vpop.f32.mrf.mxu1 }
 0x391   : > { %v13426_v31 = vpop.f32.mrf.mxu0 }
 0x392   : > { %v13416_v34 = vpop.f32.mrf.mxu1 }
 0x393   : > { %v13432_v2 = vpop.f32.mrf.mxu0 }
 0x394   : > { %v13418_v61 = vpop.f32.mrf.mxu1 }
 0x395   : > { %v13438_v10 = vpop.f32.mrf.mxu0 }
 0x396   : > { %v13422_v40 = vpop.f32.mrf.mxu1 }
 0x397   : > { %v13444_v38 = vpop.f32.mrf.mxu0 }
 0x398   : > { %v13424_v47 = vpop.f32.mrf.mxu1 }
 0x399   : > { %v13450_v27 = vpop.f32.mrf.mxu0 }
 0x39a   : > { %v13428_v36 = vpop.f32.mrf.mxu1 }
 0x39b   : > { %v13456_v57 = vpop.f32.mrf.mxu0 }
 0x39c   : > { %v13430_v23 = vpop.f32.mrf.mxu1 }
 0x39e   : > { %v13434_v33 = vpop.f32.mrf.mxu1 }
 0x3a0   : > { %v13436_v63 = vpop.f32.mrf.mxu1 }
 0x3a1   : > { %14290 = vst [vmem:[#allocation97_spill] sm:$0xff] %v13436_v63 }
 0x3a2   : > { %v13440_v15 = vpop.f32.mrf.mxu1 }
 0x3a3   : > { %14291 = vst [vmem:[#allocation84_spill] sm:$0xff] %v13440_v15  ;;  %v13462_v15 = vpop.f32.mrf.mxu0 }
 0x3a4   : > { %v13442_v62 = vpop.f32.mrf.mxu1 }
 0x3a5   : > { %14292 = vst [vmem:[#allocation83_spill] sm:$0xff] %v13442_v62 }
 0x3a6   : > { %v13446_v3 = vpop.f32.mrf.mxu1 }
 0x3a7   : > { %14293 = vst [vmem:[#allocation85_spill] sm:$0xff] %v13446_v3  ;;  %v13468_v3 = vpop.f32.mrf.mxu0 }
 0x3a8   : > { %v13448_v0 = vpop.f32.mrf.mxu1  ;;  %14301 = vst [vmem:[#allocation99_spill] sm:$0xff] %v13468_v3 }
 0x3a9   : > { %14294 = vst [vmem:[#allocation87_spill] sm:$0xff] %v13448_v0 }
 0x3aa   : > { %v13452_v56 = vpop.f32.mrf.mxu1 }
 0x3ab   : > { %14295 = vst [vmem:[#allocation86_spill] sm:$0xff] %v13452_v56  ;;  %v13474_v56 = vpop.f32.mrf.mxu0 }
 0x3ac   : > { %v13454_v7 = vpop.f32.mrf.mxu1  ;;  %14304 = vst [vmem:[#allocation104_spill] sm:$0xff] %v13474_v56 }
 0x3ad   : > { %14296 = vst [vmem:[#allocation88_spill] sm:$0xff] %v13454_v7 }
 0x3ae   : > { %v13458_v8 = vpop.f32.mrf.mxu1 }
 0x3af   : > { %14297 = vst [vmem:[#allocation90_spill] sm:$0xff] %v13458_v8  ;;  %v13480_v8 = vpop.f32.mrf.mxu0 }
 0x3b0   : > { %v13460_v18 = vpop.f32.mrf.mxu1  ;;  %14307 = vst [vmem:[#allocation98_spill] sm:$0xff] %v13480_v8 }
 0x3b1   : > { %14298 = vst [vmem:[#allocation89_spill] sm:$0xff] %v13460_v18  ;;  %v13490_v3 = vpop.f32.mrf.mxu0 }
 0x3b2   : > { %v13464_v62 = vpop.f32.mrf.mxu1 }
 0x3b3   : > { %14299 = vst [vmem:[#allocation94_spill] sm:$0xff] %v13464_v62 }
 0x3b4   : > { %v13466_v45 = vpop.f32.mrf.mxu1 }
 0x3b5   : > { %14300 = vst [vmem:[#allocation96_spill] sm:$0xff] %v13466_v45  ;;  %v5709_v45 = vadd.f32 %v13250_v41, %v13255_v26 }
 0x3b6   : > { %v13470_v0 = vpop.f32.mrf.mxu1 }
 0x3b7   : > { %14302 = vst [vmem:[#allocation101_spill] sm:$0xff] %v13470_v0  ;;  %v5708_v0 = vadd.f32 %v13257_v43, %v13260_v60  ;;  %v5713_v43 = vadd.f32 %v13272_v59, %v13275_v30 }
 0x3b8   : > { %v13472_v63 = vpop.f32.mrf.mxu1 }
 0x3b9   : > { %14303 = vst [vmem:[#allocation102_spill] sm:$0xff] %v13472_v63  ;;  %v6104_v63 = vadd.f32 %v9560_v11, %v5709_v45 }
 0x3ba   : > { %v13476_v7 = vpop.f32.mrf.mxu1 }
 0x3bb   : > { %14305 = vst [vmem:[#allocation105_spill] sm:$0xff] %v13476_v7  ;;  %v6103_v7 = vadd.f32 %v5944_v53, %v5708_v0  ;;  %v6498_v41 = vadd.f32 %v9624_v42, %v6104_v63  ;;  %v5714_v42 = vadd.f32 %v13287_v12, %v13290_v24 }
 0x3bc   : > { %v13478_v50 = vpop.f32.mrf.mxu1 }
 0x3bd   : > { %14306 = vst [vmem:[#allocation91_spill] sm:$0xff] %v13478_v50  ;;  %v5711_v50 = vadd.f32 %v13262_v1, %v13265_v9  ;;  %v13508_v1 = vld [vmem:[%s13858_s6] ss:$0 sm:$0xff]  ;;  %v6497_v9 = vadd.f32 %v6338_v14, %v6103_v7  ;;  %v6109_v12 = vadd.f32 %v13418_v61, %v5714_v42  ;;  %v14314_v42 = vld [vmem:[#allocation11_spill] sm:$0xff] }
 0x3be   : > { %v13482_v18 = vpop.f32.mrf.mxu1 }
 0x3bf   : > { %14308 = vst [vmem:[#allocation107_spill] sm:$0xff] %v13482_v18  ;;  %v5710_v18 = vadd.f32 %v13267_v28, %v13270_v49  ;;  %v6106_v26 = vadd.f32 %v9563_v20, %v5711_v50  ;;  %v5712_v28 = vadd.f32 %v13277_v25, %v13280_v21  ;;  %v6108_v49 = vadd.f32 %v9566_v55, %v5713_v43  ;;  %v13515_v50 = vld [vmem:[%s13859_s7] ss:$0 sm:$0xff] }
 0x3c0   : > { %v13486_v62 = vpop.f32.mrf.mxu1 }
 0x3c1   : > { %14309 = vst [vmem:[#allocation93_spill] sm:$0xff] %v13486_v62  ;;  %v13500_v62 = vpop.f32.mrf.mxu0  ;;  %v6105_v45 = vadd.f32 %v5954_v58, %v5710_v18  ;;  %v6500_v30 = vadd.f32 %v9627_v22, %v6106_v26  ;;  %v5715_v18 = vadd.f32 %v13282_v39, %v13285_v29  ;;  %v6107_v25 = vadd.f32 %v13412_v54, %v5712_v28  ;;  %v14310_v39 = vld [vmem:[#allocation7_spill] sm:$0xff] }
 0x3c2   : > { %v13492_v56 = vpop.f32.mrf.mxu1  ;;  %v6502_v22 = vadd.f32 %v13420_v52, %v6108_v49  ;;  %v14311_v52 = vld [vmem:[#allocation6_spill] sm:$0xff] }
 0x3c3   : > { %v13517_v63 = vpop.f32.mrf.mxu0  ;;  %v6499_v58 = vadd.f32 %v13414_v17, %v6105_v45  ;;  %v6110_v55 = vadd.f32 %v13416_v34, %v5715_v18 }
 0x3c4   : > { %v13496_v8 = vpop.f32.mrf.mxu1 }
 0x3c5   : > { %v13532_v26 = vpop.f32.mrf.mxu0 }
 0x3c6   : > { %v9688_v60 = vpop.f32.mrf.mxu1 }
 0x3c7   : > { %v6892_v0 = vadd.f32 %v9688_v60, %v6498_v41  ;;  %v5717_v60 = vadd.f32 %v13292_v4, %v13295_v5  ;;  %v5716_v4 = vadd.f32 %v13297_v37, %v13300_v35  ;;  %v6504_v5 = vadd.f32 %v13432_v2, %v6110_v55  ;;  %v13552_v49 = vpop.f32.mrf.mxu0 }
 0x3c8   : > { %v6732_v59 = vpop.f32.mrf.mxu1  ;;  %v5719_v37 = vadd.f32 %v13302_v51, %v13305_v6  ;;  %v6503_v35 = vadd.f32 %v13438_v10, %v6109_v12  ;;  %v14316_v12 = vld [vmem:[#allocation13_spill] sm:$0xff] }
 0x3c9   : > { %v6931_v53 = vmul.f32 %v13508_v1, %v6892_v0  ;;  %v6891_v7 = vadd.f32 %v6732_v59, %v6497_v9  ;;  %v6501_v9 = vadd.f32 %v13426_v31, %v6107_v25  ;;  %v6112_v31 = vadd.f32 %v13422_v40, %v5717_v60  ;;  %v14312_v59 = vld [vmem:[#allocation9_spill] sm:$0xff]  ;;  %v14313_v25 = vld [vmem:[#allocation8_spill] sm:$0xff] }
 0x3ca   : > { %v9691_v21 = vpop.f32.mrf.mxu1  ;;  %v6111_v2 = vadd.f32 %v13424_v47, %v5716_v4  ;;  %v6114_v6 = vadd.f32 %v13428_v36, %v5719_v37  ;;  %v13572_v47 = vpop.f32.mrf.mxu0  ;;  %v14319_v4 = vld [vmem:[#allocation12_spill] sm:$0xff] }
 0x3cb   : > { %v6970_v14 = vadd.f32 %v13515_v50, %v6931_v53  ;;  %v6930_v20 = vmul.f32 %v13508_v1, %v6891_v7  ;;  %v6894_v11 = vadd.f32 %v9691_v21, %v6500_v30  ;;  %v6506_v51 = vadd.f32 %v13444_v38, %v6112_v31  ;;  %v14323_v37 = vld [vmem:[#allocation84_spill] sm:$0xff] }
 0x3cc   : > { %v6742_v41 = vpop.f32.mrf.mxu1 }
 0x3cd   : > { %v7002_v29 = vadd.f32 %v6970_v14, %v14310_v39  ;;  %v6969_v54 = vadd.f32 %v13515_v50, %v6930_v20  ;;  %v6933_v17 = vmul.f32 %v13508_v1, %v6894_v11  ;;  %v6893_v43 = vadd.f32 %v6742_v41, %v6499_v58 }
 0x3ce   : > { %v9694_v24 = vpop.f32.mrf.mxu1  ;;  %v5718_v11 = vadd.f32 %v13307_v13, %v13310_v16  ;;  %v5721_v13 = vadd.f32 %v13312_v46, %v13315_v19  ;;  %v6505_v16 = vadd.f32 %v13450_v27, %v6111_v2  ;;  %v6508_v46 = vadd.f32 %v13456_v57, %v6114_v6  ;;  %v14318_v57 = vld [vmem:[#allocation97_spill] sm:$0xff]  ;;  %v14327_v6 = vld [vmem:[#allocation104_spill] sm:$0xff] }
 0x3cf   : > { %7034 = vst.msk [vmem:[%s13541_s21 + $0x8] sm:$0xff] %vm504_vm1, %v7002_v29  ;;  %v7001_v34 = vadd.f32 %v6969_v54, %v14311_v52  ;;  %v6972_v45 = vadd.f32 %v13515_v50, %v6933_v17  ;;  %v6932_v0 = vmul.f32 %v13508_v1, %v6893_v43  ;;  %v6896_v28 = vadd.f32 %v9694_v24, %v6502_v22  ;;  %v14315_v29 = vld [vmem:[#allocation10_spill] sm:$0xff] }
 0x3d0   : > { %v6752_v61 = vpop.f32.mrf.mxu1  ;;  %v6113_v38 = vadd.f32 %v13430_v23, %v5718_v11  ;;  %v6116_v19 = vadd.f32 %v13434_v33, %v5721_v13  ;;  %v13592_v23 = vpop.f32.mrf.mxu0  ;;  %v14326_v11 = vld [vmem:[#allocation48_spill] sm:$0xff] }
 0x3d1   : > { %7033 = vst.msk [vmem:[%s13541_s21] sm:$0xff] %vm504_vm1, %v7001_v34  ;;  %v7004_v30 = vadd.f32 %v6972_v45, %v14312_v59  ;;  %v6971_v53 = vadd.f32 %v13515_v50, %v6932_v0  ;;  %v6935_v7 = vmul.f32 %v13508_v1, %v6896_v28  ;;  %v6895_v18 = vadd.f32 %v6752_v61, %v6501_v9  ;;  %v14317_v0 = vld [vmem:[#allocation45_spill] sm:$0xff] }
 0x3d2   : > { %v9697_v40 = vpop.f32.mrf.mxu1  ;;  %v5720_v9 = vadd.f32 %v13317_v32, %v13320_v44  ;;  %v5723_v32 = vadd.f32 %v14317_v0, %v13325_v48  ;;  %v6507_v44 = vadd.f32 %v13462_v15, %v6113_v38  ;;  %v13612_v2 = vpop.f32.mrf.mxu0  ;;  %v14336_v0 = vld [vmem:[#allocation50_spill] sm:$0xff] }
 0x3d3   : > { %7036 = vst.msk [vmem:[%s13541_s21 + $0x18] sm:$0xff] %vm504_vm1, %v7004_v30  ;;  %v7003_v21 = vadd.f32 %v6971_v53, %v14313_v25  ;;  %v6974_v58 = vadd.f32 %v13515_v50, %v6935_v7  ;;  %v6934_v14 = vmul.f32 %v13508_v1, %v6895_v18  ;;  %v6898_v20 = vadd.f32 %v9697_v40, %v6504_v5  ;;  %v14320_v30 = vld [vmem:[#allocation46_spill] sm:$0xff]  ;;  %v14321_v53 = vld [vmem:[#allocation44_spill] sm:$0xff]  ;;  %v14322_v18 = vld [vmem:[#allocation99_spill] sm:$0xff] }
 0x3d4   : > { %v6762_v10 = vpop.f32.mrf.mxu1  ;;  %v6115_v33 = vadd.f32 %v14318_v57, %v5720_v9  ;;  %v5722_v7 = vadd.f32 %v14321_v53, %v14320_v30  ;;  %v6510_v48 = vadd.f32 %v14322_v18, %v6116_v19  ;;  %v6118_v15 = vadd.f32 %v14323_v37, %v5723_v32  ;;  %v14324_v40 = vld [vmem:[#allocation15_spill] sm:$0xff]  ;;  %v13632_v19 = vpop.f32.mrf.mxu0  ;;  %v14339_v30 = vld [vmem:[#allocation56_spill] sm:$0xff]  ;;  %v14340_v53 = vld [vmem:[#allocation57_spill] sm:$0xff] }
 0x3d5   : > { %7035 = vst.msk [vmem:[%s13541_s21 + $0x10] sm:$0xff] %vm504_vm1, %v7003_v21  ;;  %v7006_v22 = vadd.f32 %v6974_v58, %v14314_v42  ;;  %v6973_v55 = vadd.f32 %v13515_v50, %v6934_v14  ;;  %v6937_v41 = vmul.f32 %v13508_v1, %v6898_v20  ;;  %v6897_v39 = vadd.f32 %v6762_v10, %v6503_v35  ;;  %v14325_v20 = vld [vmem:[#allocation47_spill] sm:$0xff] }
 0x3d6   : > { %v9700_v36 = vpop.f32.mrf.mxu1  ;;  %v6509_v10 = vadd.f32 %v14327_v6, %v6115_v33  ;;  %v14328_v42 = vld [vmem:[#allocation83_spill] sm:$0xff] }
 0x3d7   : > { %7038 = vst.msk [vmem:[%s13541_s21 + $0x28] sm:$0xff] %vm504_vm1, %v7006_v22  ;;  %v7005_v54 = vadd.f32 %v6973_v55, %v14315_v29  ;;  %v6976_v17 = vadd.f32 %v13515_v50, %v6937_v41  ;;  %v6936_v43 = vmul.f32 %v13508_v1, %v6897_v39  ;;  %v6900_v60 = vadd.f32 %v9700_v36, %v6506_v51  ;;  %v14329_v41 = vld [vmem:[#allocation14_spill] sm:$0xff]  ;;  %v14330_v36 = vld [vmem:[#allocation51_spill] sm:$0xff]  ;;  %v14331_v29 = vld [vmem:[#allocation49_spill] sm:$0xff] }
 0x3d8   : > { %v6772_v27 = vpop.f32.mrf.mxu1  ;;  %v5725_v51 = vadd.f32 %v14326_v11, %v14325_v20  ;;  %v6117_v22 = vadd.f32 %v14328_v42, %v5722_v7  ;;  %v14337_v57 = vld [vmem:[#allocation87_spill] sm:$0xff]  ;;  %v5726_v7 = vadd.f32 %v14340_v53, %v14339_v30  ;;  %v14346_v42 = vld [vmem:[#allocation18_spill] sm:$0xff] }
 0x3d9   : > { %7037 = vst.msk [vmem:[%s13541_s21 + $0x20] sm:$0xff] %vm504_vm1, %v7005_v54  ;;  %v7008_v24 = vadd.f32 %v6976_v17, %v14316_v12  ;;  %v6975_v52 = vadd.f32 %v13515_v50, %v6936_v43  ;;  %v6939_v34 = vmul.f32 %v13508_v1, %v6900_v60  ;;  %v6899_v45 = vadd.f32 %v6772_v27, %v6505_v16  ;;  %v14332_v17 = vld [vmem:[#allocation98_spill] sm:$0xff]  ;;  %v14333_v60 = vld [vmem:[#allocation85_spill] sm:$0xff]  ;;  %v14344_v20 = vld [vmem:[#allocation59_spill] sm:$0xff] }
 0x3da   : > { %v9703_v28 = vpop.f32.mrf.mxu1  ;;  %v5724_v54 = vadd.f32 %v14331_v29, %v14330_v36  ;;  %v6512_v43 = vadd.f32 %v14332_v17, %v6118_v15  ;;  %v6120_v9 = vadd.f32 %v14333_v60, %v5725_v51  ;;  %v14334_v27 = vld [vmem:[#allocation17_spill] sm:$0xff]  ;;  %v13652_v15 = vpop.f32.mrf.mxu0  ;;  %v14345_v51 = vld [vmem:[#allocation88_spill] sm:$0xff]  ;;  %v14349_v29 = vld [vmem:[#allocation90_spill] sm:$0xff] }
 0x3db   : > { %7040 = vst.msk [vmem:[%s13541_s21 + $0x38] sm:$0xff] %vm504_vm1, %v7008_v24  ;;  %v7007_v5 = vadd.f32 %v6975_v52, %v14319_v4  ;;  %v6978_v31 = vadd.f32 %v13515_v50, %v6939_v34  ;;  %v6938_v61 = vmul.f32 %v13508_v1, %v6899_v45  ;;  %v6902_v59 = vadd.f32 %v9703_v28, %v6508_v46  ;;  %v14335_v45 = vld [vmem:[#allocation53_spill] sm:$0xff]  ;;  %v14338_v4 = vld [vmem:[#allocation16_spill] sm:$0xff] }
 0x3dc   : > { %v6782_v35 = vpop.f32.mrf.mxu1  ;;  %v5727_v32 = vadd.f32 %v14336_v0, %v14335_v45  ;;  %v6119_v33 = vadd.f32 %v14337_v57, %v5724_v54  ;;  %v6514_v18 = vadd.f32 %v13500_v62, %v6120_v9  ;;  %v6121_v6 = vadd.f32 %v14345_v51, %v5726_v7  ;;  %v13672_v17 = vpop.f32.mrf.mxu0  ;;  %v14358_v7 = vld [vmem:[#allocation23_spill] sm:$0xff] }
 0x3dd   : > { %7039 = vst.msk [vmem:[%s13541_s21 + $0x30] sm:$0xff] %vm504_vm1, %v7007_v5  ;;  %v7010_v25 = vadd.f32 %v6978_v31, %v14324_v40  ;;  %v6977_v21 = vadd.f32 %v13515_v50, %v6938_v61  ;;  %v6941_v58 = vmul.f32 %v13508_v1, %v6902_v59  ;;  %v6901_v14 = vadd.f32 %v6782_v35, %v6507_v44  ;;  %v14342_v35 = vld [vmem:[#allocation19_spill] sm:$0xff] }
 0x3de   : > { %v9706_v55 = vpop.f32.mrf.mxu1  ;;  %v6511_v44 = vadd.f32 %v13490_v3, %v6117_v22  ;;  %v6513_v62 = vadd.f32 %v13517_v63, %v6119_v33  ;;  %v9663_v53 = vpop.f32.mrf.mxu0 }
 0x3df   : > { %7042 = vst.msk [vmem:[%s13541_s21 + $0x48] sm:$0xff] %vm504_vm1, %v7010_v25  ;;  %v7009_v39 = vadd.f32 %v6977_v21, %v14329_v41  ;;  %v6980_v13 = vadd.f32 %v13515_v50, %v6941_v58  ;;  %v6940_v16 = vmul.f32 %v13508_v1, %v6901_v14  ;;  %v6904_v38 = vadd.f32 %v9706_v55, %v6510_v48  ;;  %v14341_v48 = vld [vmem:[#allocation86_spill] sm:$0xff]  ;;  %v14343_v14 = vld [vmem:[#allocation60_spill] sm:$0xff] }
 0x3e0   : > { %v6792_v46 = vpop.f32.mrf.mxu1  ;;  %v6122_v3 = vadd.f32 %v14341_v48, %v5727_v32  ;;  %v5729_v11 = vadd.f32 %v14344_v20, %v14343_v14  ;;  %v14354_v32 = vld [vmem:[#allocation20_spill] sm:$0xff]  ;;  %v14362_v20 = vld [vmem:[#allocation22_spill] sm:$0xff] }
 0x3e1   : > { %7041 = vst.msk [vmem:[%s13541_s21 + $0x40] sm:$0xff] %vm504_vm1, %v7009_v39  ;;  %v7012_v12 = vadd.f32 %v6980_v13, %v14334_v27  ;;  %v6979_v24 = vadd.f32 %v13515_v50, %v6940_v16  ;;  %v6943_v52 = vmul.f32 %v13508_v1, %v6904_v38  ;;  %v6903_v34 = vadd.f32 %v6792_v46, %v6509_v10  ;;  %v14347_v13 = vld [vmem:[#allocation63_spill] sm:$0xff]  ;;  %v14348_v16 = vld [vmem:[#allocation61_spill] sm:$0xff] }
 0x3e2   : > { %v9709_v28 = vpop.f32.mrf.mxu1  ;;  %v5728_v38 = vadd.f32 %v14348_v16, %v14347_v13  ;;  %v6516_v36 = vadd.f32 %v13532_v26, %v6122_v3  ;;  %v6124_v63 = vadd.f32 %v14349_v29, %v5729_v11  ;;  %v6515_v26 = vadd.f32 %v13552_v49, %v6121_v6  ;;  %v6468_v13 = vpop.f32.mrf.mxu0  ;;  %v14366_v16 = vld [vmem:[#allocation25_spill] sm:$0xff] }
 0x3e3   : > { %7044 = vst.msk [vmem:[%s13541_s21 + $0x58] sm:$0xff] %vm504_vm1, %v7012_v12  ;;  %v7011_v5 = vadd.f32 %v6979_v24, %v14338_v4  ;;  %v6982_v31 = vadd.f32 %v13515_v50, %v6943_v52  ;;  %v6942_v61 = vmul.f32 %v13508_v1, %v6903_v34  ;;  %v6906_v59 = vadd.f32 %v9709_v28, %v6512_v43  ;;  %v14350_v43 = vld [vmem:[#allocation21_spill] sm:$0xff]  ;;  %v14351_v12 = vld [vmem:[#allocation64_spill] sm:$0xff]  ;;  %v14352_v24 = vld [vmem:[#allocation62_spill] sm:$0xff] }
 0x3e4   : > { %v6802_v37 = vpop.f32.mrf.mxu1  ;;  %v5731_v52 = vadd.f32 %v14352_v24, %v14351_v12  ;;  %v14353_v34 = vld [vmem:[#allocation89_spill] sm:$0xff]  ;;  %v14370_v12 = vld [vmem:[#allocation24_spill] sm:$0xff] }
 0x3e5   : > { %7043 = vst.msk [vmem:[%s13541_s21 + $0x50] sm:$0xff] %vm504_vm1, %v7011_v5  ;;  %v7014_v40 = vadd.f32 %v6982_v31, %v14342_v35  ;;  %v6981_v25 = vadd.f32 %v13515_v50, %v6942_v61  ;;  %v6945_v21 = vmul.f32 %v13508_v1, %v6906_v59  ;;  %v6905_v58 = vadd.f32 %v6802_v37, %v6511_v44  ;;  %v14355_v4 = vld [vmem:[#allocation65_spill] sm:$0xff]  ;;  %v14356_v5 = vld [vmem:[#allocation66_spill] sm:$0xff] }
 0x3e6   : > { %v9712_v10 = vpop.f32.mrf.mxu1  ;;  %v6123_v45 = vadd.f32 %v14353_v34, %v5728_v38  ;;  %v5730_v31 = vadd.f32 %v14356_v5, %v14355_v4  ;;  %v6518_v61 = vadd.f32 %v13572_v47, %v6124_v63  ;;  %v14357_v59 = vld [vmem:[#allocation94_spill] sm:$0xff]  ;;  %v14359_v35 = vld [vmem:[#allocation69_spill] sm:$0xff]  ;;  %v14361_v47 = vld [vmem:[#allocation96_spill] sm:$0xff] }
 0x3e7   : > { %7046 = vst.msk [vmem:[%s13541_s21 + $0x68] sm:$0xff] %vm504_vm1, %v7014_v40  ;;  %v7013_v22 = vadd.f32 %v6981_v25, %v14346_v42  ;;  %v6984_v55 = vadd.f32 %v13515_v50, %v6945_v21  ;;  %v6944_v41 = vmul.f32 %v13508_v1, %v6905_v58  ;;  %v6908_v39 = vadd.f32 %v9712_v10, %v6514_v18  ;;  %v14360_v40 = vld [vmem:[#allocation67_spill] sm:$0xff]  ;;  %v14363_v10 = vld [vmem:[#allocation70_spill] sm:$0xff]  ;;  %v14364_v42 = vld [vmem:[#allocation68_spill] sm:$0xff] }
 0x3e8   : > { %v6812_v54 = vpop.f32.mrf.mxu1  ;;  %v6126_v49 = vadd.f32 %v14357_v59, %v5731_v52  ;;  %v5733_v25 = vadd.f32 %v14360_v40, %v14359_v35  ;;  %v6517_v21 = vadd.f32 %v13592_v23, %v6123_v45  ;;  %v6125_v58 = vadd.f32 %v14361_v47, %v5730_v31  ;;  %v14371_v45 = vld [vmem:[#allocation75_spill] sm:$0xff]  ;;  %v14379_v47 = vld [vmem:[#allocation77_spill] sm:$0xff] }
 0x3e9   : > { %7045 = vst.msk [vmem:[%s13541_s21 + $0x60] sm:$0xff] %vm504_vm1, %v7013_v22  ;;  %v7016_v60 = vadd.f32 %v6984_v55, %v14350_v43  ;;  %v6983_v9 = vadd.f32 %v13515_v50, %v6944_v41  ;;  %v6947_v46 = vmul.f32 %v13508_v1, %v6908_v39  ;;  %v6907_v27 = vadd.f32 %v6812_v54, %v6513_v62  ;;  %v14365_v41 = vld [vmem:[#allocation101_spill] sm:$0xff]  ;;  %v14367_v54 = vld [vmem:[#allocation71_spill] sm:$0xff]  ;;  %v14368_v43 = vld [vmem:[#allocation72_spill] sm:$0xff] }
 0x3ea   : > { %v9715_v0 = vpop.f32.mrf.mxu1  ;;  %v5732_v22 = vadd.f32 %v14364_v42, %v14363_v10  ;;  %v6520_v55 = vadd.f32 %v13612_v2, %v6126_v49  ;;  %v6128_v23 = vadd.f32 %v14365_v41, %v5733_v25  ;;  %v14369_v2 = vld [vmem:[#allocation102_spill] sm:$0xff]  ;;  %v14374_v4 = vld [vmem:[#allocation27_spill] sm:$0xff]  ;;  %v14375_v49 = vld [vmem:[#allocation76_spill] sm:$0xff] }
 0x3eb   : > { %7048 = vst.msk [vmem:[%s13541_s21 + $0x78] sm:$0xff] %vm504_vm1, %v7016_v60  ;;  %v7015_v44 = vadd.f32 %v6983_v9, %v14354_v32  ;;  %v6986_v57 = vadd.f32 %v13515_v50, %v6947_v46  ;;  %v6946_v33 = vmul.f32 %v13508_v1, %v6907_v27  ;;  %v6910_v28 = vadd.f32 %v9715_v0, %v6516_v36  ;;  %v14372_v0 = vld [vmem:[#allocation73_spill] sm:$0xff] }
 0x3ec   : > { %v6822_v30 = vpop.f32.mrf.mxu1  ;;  %v5735_v60 = vadd.f32 %v14368_v43, %v14367_v54  ;;  %v6519_v9 = vadd.f32 %v13632_v19, %v6125_v58  ;;  %v6127_v46 = vadd.f32 %v14369_v2, %v5732_v22  ;;  %v5734_v32 = vadd.f32 %v14372_v0, %v14371_v45  ;;  %v14380_v58 = vld [vmem:[#allocation78_spill] sm:$0xff]  ;;  %v14383_v41 = vld [vmem:[#allocation81_spill] sm:$0xff] }
 0x3ed   : > { %7047 = vst.msk [vmem:[%s13541_s21 + $0x70] sm:$0xff] %vm504_vm1, %v7015_v44  ;;  %v7018_v18 = vadd.f32 %v6986_v57, %v14358_v7  ;;  %v6985_v48 = vadd.f32 %v13515_v50, %v6946_v33  ;;  %v6949_v3 = vmul.f32 %v13508_v1, %v6910_v28  ;;  %v6909_v37 = vadd.f32 %v6822_v30, %v6515_v26  ;;  %v14373_v57 = vld [vmem:[#allocation105_spill] sm:$0xff]  ;;  %v9666_v28 = vpop.f32.mrf.mxu0  ;;  %v14376_v30 = vld [vmem:[#allocation74_spill] sm:$0xff] }
 0x3ee   : > { %v9718_v14 = vpop.f32.mrf.mxu1  ;;  %v6522_v44 = vadd.f32 %v13652_v15, %v6128_v23  ;;  %v6130_v19 = vadd.f32 %v14373_v57, %v5735_v60  ;;  %v5737_v7 = vadd.f32 %v14376_v30, %v14375_v49  ;;  %v14377_v15 = vld [vmem:[#allocation91_spill] sm:$0xff]  ;;  %v14387_v2 = vld [vmem:[#allocation82_spill] sm:$0xff] }
 0x3ef   : > { %7050 = vst.msk [vmem:[%s13541_s21 + $0x88] sm:$0xff] %vm504_vm1, %v7018_v18  ;;  %v7017_v11 = vadd.f32 %v6985_v48, %v14362_v20  ;;  %v6988_v62 = vadd.f32 %v13515_v50, %v6949_v3  ;;  %v6948_v51 = vmul.f32 %v13508_v1, %v6909_v37  ;;  %v6912_v6 = vadd.f32 %v9718_v14, %v6518_v61  ;;  %v14378_v37 = vld [vmem:[#allocation26_spill] sm:$0xff]  ;;  %v14384_v23 = vld [vmem:[#allocation79_spill] sm:$0xff] }
 0x3f0   : > { %v6832_v39 = vpop.f32.mrf.mxu1  ;;  %v6521_v18 = vadd.f32 %v13672_v17, %v6127_v46  ;;  %v6129_v48 = vadd.f32 %v14377_v15, %v5734_v32  ;;  %v5736_v14 = vadd.f32 %v14380_v58, %v14379_v47  ;;  %v6524_v20 = vadd.f32 %v9663_v53, %v6130_v19  ;;  %v14388_v46 = vld [vmem:[#allocation80_spill] sm:$0xff] }
 0x3f1   : > { %7049 = vst.msk [vmem:[%s13541_s21 + $0x80] sm:$0xff] %vm504_vm1, %v7017_v11  ;;  %v7020_v38 = vadd.f32 %v6988_v62, %v14366_v16  ;;  %v6987_v36 = vadd.f32 %v13515_v50, %v6948_v51  ;;  %v6951_v29 = vmul.f32 %v13508_v1, %v6912_v6  ;;  %v6911_v63 = vadd.f32 %v6832_v39, %v6517_v21  ;;  %v14381_v11 = vld [vmem:[#allocation107_spill] sm:$0xff]  ;;  %v6478_v51 = vpop.f32.mrf.mxu0  ;;  %v14382_v6 = vld [vmem:[#allocation29_spill] sm:$0xff] }
 0x3f2   : > { %v9721_v27 = vpop.f32.mrf.mxu1  ;;  %v6132_v62 = vadd.f32 %v14381_v11, %v5737_v7  ;;  %v5739_v39 = vadd.f32 %v14384_v23, %v14383_v41  ;;  %v6523_v16 = vadd.f32 %v6468_v13, %v6129_v48  ;;  %v14392_v48 = vld [vmem:[#allocation32_spill] sm:$0xff]  ;;  %v14394_v11 = vld [vmem:[#allocation34_spill] sm:$0xff] }
 0x3f3   : > { %7052 = vst.msk [vmem:[%s13541_s21 + $0x98] sm:$0xff] %vm504_vm1, %v7020_v38  ;;  %v7019_v24 = vadd.f32 %v6987_v36, %v14370_v12  ;;  %v6990_v52 = vadd.f32 %v13515_v50, %v6951_v29  ;;  %v6950_v26 = vmul.f32 %v13508_v1, %v6911_v63  ;;  %v6914_v34 = vadd.f32 %v9721_v27, %v6520_v55  ;;  %v14385_v38 = vld [vmem:[#allocation93_spill] sm:$0xff]  ;;  %v9669_v29 = vpop.f32.mrf.mxu0  ;;  %v14386_v63 = vld [vmem:[#allocation28_spill] sm:$0xff] }
 0x3f4   : > { %v6842_v33 = vpop.f32.mrf.mxu1  ;;  %v6131_v53 = vadd.f32 %v14385_v38, %v5736_v14  ;;  %v5738_v27 = vadd.f32 %v14388_v46, %v14387_v2  ;;  %v6526_v12 = vadd.f32 %v9666_v28, %v6132_v62  ;;  %v6134_v13 = vadd.f32 %v13492_v56, %v5739_v39  ;;  %v14390_v56 = vld [vmem:[#allocation30_spill] sm:$0xff] }
 0x3f5   : > { %7051 = vst.msk [vmem:[%s13541_s21 + $0x90] sm:$0xff] %vm504_vm1, %v7019_v24  ;;  %v7022_v5 = vadd.f32 %v6990_v52, %v14374_v4  ;;  %v6989_v31 = vadd.f32 %v13515_v50, %v6950_v26  ;;  %v6953_v61 = vmul.f32 %v13508_v1, %v6914_v34  ;;  %v6913_v59 = vadd.f32 %v6842_v33, %v6519_v9  ;;  %v14389_v52 = vld [vmem:[#allocation31_spill] sm:$0xff]  ;;  %v6488_v19 = vpop.f32.mrf.mxu0 }
 0x3f6   : > { %v9724_v3 = vpop.f32.mrf.mxu1  ;;  %v6525_v32 = vadd.f32 %v6478_v51, %v6131_v53 }
 0x3f7   : > { %7054 = vst.msk [vmem:[%s13541_s21 + $0xa8] sm:$0xff] %vm504_vm1, %v7022_v5  ;;  %v7021_v35 = vadd.f32 %v6989_v31, %v14378_v37  ;;  %v6992_v40 = vadd.f32 %v13515_v50, %v6953_v61  ;;  %v6952_v25 = vmul.f32 %v13508_v1, %v6913_v59  ;;  %v6916_v21 = vadd.f32 %v9724_v3, %v6522_v44  ;;  %v14391_v59 = vld [vmem:[#allocation33_spill] sm:$0xff] }
 0x3f8   : > { %v6852_v17 = vpop.f32.mrf.mxu1  ;;  %v6133_v44 = vadd.f32 %v13496_v8, %v5738_v27  ;;  %v6528_v31 = vadd.f32 %v9669_v29, %v6134_v13 }
 0x3f9   : > { %7053 = vst.msk [vmem:[%s13541_s21 + $0xa0] sm:$0xff] %vm504_vm1, %v7021_v35  ;;  %v7024_v10 = vadd.f32 %v6992_v40, %v14382_v6  ;;  %v6991_v42 = vadd.f32 %v13515_v50, %v6952_v25  ;;  %v6955_v22 = vmul.f32 %v13508_v1, %v6916_v21  ;;  %v6915_v55 = vadd.f32 %v6852_v17, %v6521_v18  ;;  %v14393_v21 = vld [vmem:[#allocation35_spill] sm:$0xff] }
 0x3fa   : > { %v9727_v36 = vpop.f32.mrf.mxu1  ;;  %v6527_v18 = vadd.f32 %v6488_v19, %v6133_v44  ;;  %v14395_v6 = vld [vmem:[#allocation55_spill] sm:$0xff] }
 0x3fb   : > { %7056 = vst.msk [vmem:[%s13541_s21 + $0xb8] sm:$0xff] %vm504_vm1, %v7024_v10  ;;  %v7023_v54 = vadd.f32 %v6991_v42, %v14386_v63  ;;  %v6994_v43 = vadd.f32 %v13515_v50, %v6955_v22  ;;  %v6954_v60 = vmul.f32 %v13508_v1, %v6915_v55  ;;  %v6918_v9 = vadd.f32 %v9727_v36, %v6524_v20 }
 0x3fc   : > { %v6862_v24 = vpop.f32.mrf.mxu1 }
 0x3fd   : > { %7055 = vst.msk [vmem:[%s13541_s21 + $0xb0] sm:$0xff] %vm504_vm1, %v7023_v54  ;;  %v7026_v26 = vadd.f32 %v6994_v43, %v14389_v52  ;;  %v6993_v34 = vadd.f32 %v13515_v50, %v6954_v60  ;;  %v6957_v45 = vmul.f32 %v13508_v1, %v6918_v9  ;;  %v6917_v0 = vadd.f32 %v6862_v24, %v6523_v16 }
 0x3fe   : > { %v9730_v57 = vpop.f32.mrf.mxu1 }
 0x3ff   : > { %7058 = vst.msk [vmem:[%s13541_s21 + $0xc8] sm:$0xff] %vm504_vm1, %v7026_v26  ;;  %v7025_v33 = vadd.f32 %v6993_v34, %v14390_v56  ;;  %v6996_v28 = vadd.f32 %v13515_v50, %v6957_v45  ;;  %v6956_v4 = vmul.f32 %v13508_v1, %v6917_v0  ;;  %v6920_v5 = vadd.f32 %v9730_v57, %v6526_v12 }
 0x400   : > { %v6872_v61 = vpop.f32.mrf.mxu1 }
 0x401   : > { %7057 = vst.msk [vmem:[%s13541_s21 + $0xc0] sm:$0xff] %vm504_vm1, %v7025_v33  ;;  %v7028_v49 = vadd.f32 %v6996_v28, %v14391_v59  ;;  %v6995_v8 = vadd.f32 %v13515_v50, %v6956_v4  ;;  %v6959_v30 = vmul.f32 %v13508_v1, %v6920_v5  ;;  %v6919_v7 = vadd.f32 %v6872_v61, %v6525_v32 }
 0x402   : > { %v9733_v15 = vpop.f32.mrf.mxu1 }
 0x403   : > { %7060 = vst.msk [vmem:[%s13541_s21 + $0xd8] sm:$0xff] %vm504_vm1, %v7028_v49  ;;  %v7027_v3 = vadd.f32 %v6995_v8, %v14392_v48  ;;  %v6998_v37 = vadd.f32 %v13515_v50, %v6959_v30  ;;  %v6958_v35 = vmul.f32 %v13508_v1, %v6919_v7  ;;  %v6922_v40 = vadd.f32 %v9733_v15, %v6528_v31 }
 0x404   : > { %v6882_v25 = vpop.f32.mrf.mxu1 }
 0x405   : > { %7059 = vst.msk [vmem:[%s13541_s21 + $0xd0] sm:$0xff] %vm504_vm1, %v7027_v3  ;;  %v7030_v47 = vadd.f32 %v6998_v37, %v14393_v21  ;;  %v6997_v58 = vadd.f32 %v13515_v50, %v6958_v35  ;;  %v6961_v14 = vmul.f32 %v13508_v1, %v6922_v40  ;;  %v6921_v20 = vadd.f32 %v6882_v25, %v6527_v18 }
 0x407   : > { %7062 = vst.msk [vmem:[%s13541_s21 + $0xe8] sm:$0xff] %vm504_vm1, %v7030_v47  ;;  %v7029_v62 = vadd.f32 %v6997_v58, %v14394_v11  ;;  %v7000_v17 = vadd.f32 %v13515_v50, %v6961_v14  ;;  %v6960_v51 = vmul.f32 %v13508_v1, %v6921_v20  ;;  %v14396_v1 = vld [vmem:[#allocation54_spill] sm:$0xff] }
 0x409   : > { %7061 = vst.msk [vmem:[%s13541_s21 + $0xe0] sm:$0xff] %vm504_vm1, %v7029_v62  ;;  %v7032_v10 = vadd.f32 %v7000_v17, %v14395_v6  ;;  %v6999_v42 = vadd.f32 %v13515_v50, %v6960_v51 }
 0x40b   : > { %7064 = vst.msk [vmem:[%s13541_s21 + $0xf8] sm:$0xff] %vm504_vm1, %v7032_v10  ;;  %v7031_v22 = vadd.f32 %v6999_v42, %v14396_v1 }
 0x40d   : > { %7063 = vst.msk [vmem:[%s13541_s21 + $0xf0] sm:$0xff] %vm504_vm1, %v7031_v22 }
 0x40e   : > { %9812 = shalt.err (!%p9809_p3)
}
 0x40f   : > { %s9813_s13 = scalar_lea.hbm %s13801_s26, 4096  ;;  %s9817_s21 = scalar_lea.hbm %s13860_s8, 8192 }
 0x410   : > { %p9814_p4 = scmp.ne.s32.totalorder %s13801_s26, %s9813_s13  ;;  %p9818_p9 = scmp.lt.s32.totalorder %s13801_s26, %s13860_s8 }
 0x411   : > { %p9819_p10 = scmp.lt.s32.totalorder %s9817_s21, %s9813_s13 }
 0x412   : > { %p9815_p7 = pnand %p9814_p4, %p9948_p5 }
 0x413   : > { %p9820_p11 = por %p9819_p10, %p9818_p9 }
 0x414   : > { %p9816_p8 = pneg %p9815_p7 }
 0x416   : > { %p9821_p12 = pnand %p9820_p11, %p9816_p8 }
 0x418   : > { %9824 = shalt.err (!%p9821_p12)
}
 0x419   : > { %s9863_s25 = smov 128   ;;  %s9864_s10 = smov 8  }
 0x41a   : > { %9735 = dma.vmem_to_hbm [thread:$0]  (%p9948_p5), %s13803_s23, 4096, %s13801_s26, %s13812_s9, %s9863_s25, %s9863_s25, %s9864_s10  }
 0x41b PF: > { %p9741_p13 = scmp.ge.s32.totalorder %s9859_s30, 2  ;;  %s7094_s17 = sand.u32 1, %s9847_s27  }
 0x41c   : > { %s7095_s18 = scalar_lea.sflag [#allocation4], %s7094_s17 }
 0x41d   : > { %p9738_p0 = pnand %p9741_p13, %p9952_p6 }
 0x41f   : > { %p9739_p1 = pneg %p9738_p0 }
 0x421   : > { %9842 = dma.done.wait (%p9739_p1), %s7095_s18, 4096  }
 0x422   : > { %9844 = vsyncadd (%p9739_p1), %s7095_s18, 4294963200  ;;  %p18_p2 = scmp.ge.s32.totalorder %s9935_s11, 4   ;;  %s14397_s27 = smov %s9851_s28 }
 0x423   : > { %s14398_s28 = smov %s9855_s29  ;;  %s14399_s29 = smov %s9946_s14 }
 0x424   : > { %s14400_s30 = smov %s9935_s11  ;;  %20 = sbr.rel (!%p18_p2) target bundleno = 3 (0x3), region = 105 }
 0x429   :  { %7100 = vsyncpa [#allocation4], 1 }
 0x42a   :  { %7102 = vsyncpa [#allocation4 + $0x1], 1 }

</bundles_post_ra>
